<compile_context>
chip_gen: v7x
topology: tpu7x:2x2x1
jax: 0.10.0
libtpu: 0.0.40
codegen_flags: <defaults>
</compile_context>

<pallas_src>
import jax
import jax.numpy as jnp
from jax.experimental import pallas as pl
from jax.experimental.pallas import tpu as pltpu

# Layer sizes from the PyTorch __init__
ENC_DIMS = [28 * 28, 128, 64, 12, 3]
DEC_DIMS = [3, 12, 64, 128, 28 * 28]

LANE = 128
MAX_TILE_B = 1024  # fits v5e/v6e (128 MiB VMEM) and v7x (64 MiB) comfortably


def _round_up(x, m):
    return ((x + m - 1) // m) * m


def _pad_lane(d):
    """Pad sub-128 feature dims up to one full lane group; leave >=128 dims alone."""
    return d if d >= LANE else LANE


def autoencoder_kernel(
    x_ref,
    # encoder weights/biases, stored (in, out), small dims zero-padded to 128
    we0, be0, we1, be1, we2, be2, we3, be3,
    # decoder weights/biases
    wd0, bd0, wd1, bd1, wd2, bd2, wd3, bd3,
    enc_ref, dec_ref,
):
    compute_dt = we0.dtype  # bf16 storage/compute dtype for MXU inputs

    def linear(h, w_ref, b_ref):
        # bf16 x bf16 on the MXU, f32 accumulate; bias add stays in f32.
        y = jnp.dot(h, w_ref[...], preferred_element_type=jnp.float32)
        return y + b_ref[...].astype(jnp.float32)

    def tanh_layer(h, w_ref, b_ref):
        # tanh on the EUP (f32 for accuracy), back to bf16 for the next MXU pass.
        return jnp.tanh(linear(h, w_ref, b_ref)).astype(compute_dt)

    # Input cast happens here on the VPU — no separate wrapper-side HBM pass.
    x = x_ref[...].astype(compute_dt)

    # ---- encoder: Linear+Tanh x3, final Linear (no activation) ----
    h = tanh_layer(x, we0, be0)
    h = tanh_layer(h, we1, be1)
    h = tanh_layer(h, we2, be2)
    encoded = linear(h, we3, be3)          # (tile_b, 128) f32; lanes 3.. are exactly 0

    # ---- decoder: Linear+Tanh x3, final Linear + Sigmoid ----
    h = tanh_layer(encoded.astype(compute_dt), wd0, bd0)
    h = tanh_layer(h, wd1, bd1)
    h = tanh_layer(h, wd2, bd2)
    z = linear(h, wd3, bd3)                # (tile_b, 784) f32

    # sigmoid = 1 / (1 + exp(-z)); the dominant 784-lane exp runs in bf16
    # (2 rows/vreg on v6e/v7x EUP; promoted to f32 on v5e -> neutral there),
    # the cheap 1+x and approximate reciprocal (EUP vrcp) stay in f32.
    e = jnp.exp((-z).astype(compute_dt)).astype(jnp.float32)
    decoded = pl.reciprocal(1.0 + e, approx=True)

    enc_ref[...] = encoded.astype(enc_ref.dtype)
    dec_ref[...] = decoded.astype(dec_ref.dtype)


def make_params(key):
    """Deterministic PyTorch-style init (U(-1/sqrt(fan_in), 1/sqrt(fan_in))).

    Weights stored as (in, out) = transpose of PyTorch's (out, in), unpadded, f32.
    """
    params = []
    for dims in (ENC_DIMS, DEC_DIMS):
        layer_params = []
        for fan_in, fan_out in zip(dims[:-1], dims[1:]):
            key, kw, kb = jax.random.split(key, 3)
            bound = 1.0 / jnp.sqrt(fan_in)
            w = jax.random.uniform(kw, (fan_in, fan_out), jnp.float32, -bound, bound)
            b = jax.random.uniform(kb, (1, fan_out), jnp.float32, -bound, bound)
            layer_params.append((w, b))
        params.append(layer_params)
    return params  # [encoder_layers, decoder_layers]


def pad_params(params, io_dtype=jnp.bfloat16):
    """One-time prep (hoisted out of the forward path): zero-pad sub-128 feature
    dims to 128 lanes, weights -> io_dtype (bf16), biases stay f32. Returns the
    flat [w0, b0, w1, b1, ...] list the kernel expects (encoder then decoder)."""
    flat = []
    for layers in params:
        for w, b in layers:
            fi, fo = w.shape
            fi_p, fo_p = _pad_lane(fi), _pad_lane(fo)
            wp = jnp.zeros((fi_p, fo_p), io_dtype).at[:fi, :fo].set(w.astype(io_dtype))
            bp = jnp.zeros((1, fo_p), jnp.float32).at[:, :fo].set(b.astype(jnp.float32))
            flat.append(wp)
            flat.append(bp)
    return flat


def autoencoder_forward(x, padded_params, *, max_tile_b=MAX_TILE_B):
    """x: (B, 784) f32 (or bf16 if the caller already has bf16 upstream)."""
    B, d_in = x.shape
    assert d_in == ENC_DIMS[0]

    enc_pad = _pad_lane(ENC_DIMS[-1])   # 128 (lane-dense encoded output)
    d_out = DEC_DIMS[-1]                # 784
    out_dtype = padded_params[0].dtype  # bf16

    # >=2 grid steps whenever possible so the "parallel" batch axis shards
    # across v7x's two TensorCores; cap at max_tile_b so the tile fits every
    # generation's VMEM. Ragged last tile is handled by Pallas (no jnp.pad).
    tile_b = min(max_tile_b, _round_up(pl.cdiv(B, 2), 8))
    grid = (pl.cdiv(B, tile_b),)

    batch_map = lambda i: (i, 0)
    const_map = lambda i: (0, 0)

    # x / outputs batch-tiled; the 16 weight/bias arrays are full-array blocks
    # with a constant index map -> fetched once, VMEM-resident across the grid.
    in_specs = [pl.BlockSpec((tile_b, d_in), batch_map)]
    for arr in padded_params:
        in_specs.append(pl.BlockSpec(arr.shape, const_map))

    out_specs = (
        pl.BlockSpec((tile_b, enc_pad), batch_map),
        pl.BlockSpec((tile_b, d_out), batch_map),
    )
    out_shape = (
        jax.ShapeDtypeStruct((B, enc_pad), out_dtype),  # encoded (lane-dense, bf16)
        jax.ShapeDtypeStruct((B, d_out), out_dtype),    # decoded (bf16 storage)
    )

    encoded_p, decoded = pl.pallas_call(
        autoencoder_kernel,
        out_shape=out_shape,
        grid=grid,
        in_specs=in_specs,
        out_specs=out_specs,
        compiler_params=pltpu.CompilerParams(
            dimension_semantics=("parallel",),        # batch rows independent -> megacore
            vmem_limit_bytes=48 * 1024 * 1024,        # ~20-25 MB live at tile_b=1024
        ),
    )(x, *padded_params)

    encoded = encoded_p[:, : ENC_DIMS[-1]]
    return encoded, decoded


def reference_forward(x, params, io_dtype=jnp.bfloat16):
    """Plain-JAX reference with the same bf16 storage of x/weights/activations."""
    enc_layers, dec_layers = params

    def q(a):  # simulate bf16 storage
        return a.astype(io_dtype).astype(jnp.float32)

    h = q(x)
    for i, (w, b) in enumerate(enc_layers):
        h = h @ q(w) + b
        if i < len(enc_layers) - 1:
            h = q(jnp.tanh(h))
    encoded = h

    h = q(encoded)
    for i, (w, b) in enumerate(dec_layers):
        h = h @ q(w) + b
        if i < len(dec_layers) - 1:
            h = q(jnp.tanh(h))
        else:
            h = jax.nn.sigmoid(h)
    return encoded, h


if __name__ == "__main__":
    key = jax.random.PRNGKey(0)
    key, kx = jax.random.split(key)

    # Small shapes; B=200 exercises 2 grid steps (tile_b=104) with a ragged
    # last tile (rows 200..207 are garbage in-kernel and dropped on store).
    B = 200
    x = jax.random.uniform(kx, (B, 28 * 28), jnp.float32)  # MNIST-like in [0,1)

    params = make_params(key)
    padded = pad_params(params)   # hoisted out of the per-call hot path

    encoded, decoded = autoencoder_forward(x, padded)
    jax.block_until_ready((encoded, decoded))

    # correctness check against plain-JAX reference (bf16 storage -> loose tols)
    enc_ref, dec_ref = reference_forward(x, params)
    assert encoded.shape == (B, 3) and decoded.shape == (B, 784)
    assert jnp.allclose(encoded.astype(jnp.float32), enc_ref, atol=2e-2, rtol=2e-2), (
        "encoded mismatch")
    assert jnp.allclose(decoded.astype(jnp.float32), dec_ref, atol=2e-2), (
        "decoded mismatch")

    print("KERNEL_OK")
</pallas_src>

<mosaic_0001>
module attributes {stable_mosaic.version = 11 : i64} {
  func.func @autoencoder_kernel(%arg0: i32, %arg1: memref<104x784xf32, #tpu.memory_space<vmem>>, %arg2: memref<784x128xbf16, #tpu.memory_space<vmem>>, %arg3: memref<1x128xf32, #tpu.memory_space<vmem>>, %arg4: memref<128x128xbf16, #tpu.memory_space<vmem>>, %arg5: memref<1x128xf32, #tpu.memory_space<vmem>>, %arg6: memref<128x128xbf16, #tpu.memory_space<vmem>>, %arg7: memref<1x128xf32, #tpu.memory_space<vmem>>, %arg8: memref<128x128xbf16, #tpu.memory_space<vmem>>, %arg9: memref<1x128xf32, #tpu.memory_space<vmem>>, %arg10: memref<128x128xbf16, #tpu.memory_space<vmem>>, %arg11: memref<1x128xf32, #tpu.memory_space<vmem>>, %arg12: memref<128x128xbf16, #tpu.memory_space<vmem>>, %arg13: memref<1x128xf32, #tpu.memory_space<vmem>>, %arg14: memref<128x128xbf16, #tpu.memory_space<vmem>>, %arg15: memref<1x128xf32, #tpu.memory_space<vmem>>, %arg16: memref<128x784xbf16, #tpu.memory_space<vmem>>, %arg17: memref<1x784xf32, #tpu.memory_space<vmem>>, %arg18: memref<104x128xbf16, #tpu.memory_space<vmem>>, %arg19: memref<104x784xbf16, #tpu.memory_space<vmem>>) attributes {dimension_semantics = [#tpu.dimension_semantics<parallel>], iteration_bounds = array<i64: 2>, scalar_prefetch = 0 : i64, scratch_operands = 0 : i64, tpu.core_type = #tpu.core_type<tc>, window_params = [{transform_indices = @transform_0, window_bounds = array<i64: 104, 784>}, {pipeline_mode = #tpu.pipeline_mode<synchronous>, transform_indices = @transform_1, window_bounds = array<i64: 784, 128>}, {pipeline_mode = #tpu.pipeline_mode<synchronous>, transform_indices = @transform_2, window_bounds = array<i64: 1, 128>}, {pipeline_mode = #tpu.pipeline_mode<synchronous>, transform_indices = @transform_3, window_bounds = array<i64: 128, 128>}, {pipeline_mode = #tpu.pipeline_mode<synchronous>, transform_indices = @transform_4, window_bounds = array<i64: 1, 128>}, {pipeline_mode = #tpu.pipeline_mode<synchronous>, transform_indices = @transform_5, window_bounds = array<i64: 128, 128>}, {pipeline_mode = #tpu.pipeline_mode<synchronous>, transform_indices = @transform_6, window_bounds = array<i64: 1, 128>}, {pipeline_mode = #tpu.pipeline_mode<synchronous>, transform_indices = @transform_7, window_bounds = array<i64: 128, 128>}, {pipeline_mode = #tpu.pipeline_mode<synchronous>, transform_indices = @transform_8, window_bounds = array<i64: 1, 128>}, {pipeline_mode = #tpu.pipeline_mode<synchronous>, transform_indices = @transform_9, window_bounds = array<i64: 128, 128>}, {pipeline_mode = #tpu.pipeline_mode<synchronous>, transform_indices = @transform_10, window_bounds = array<i64: 1, 128>}, {pipeline_mode = #tpu.pipeline_mode<synchronous>, transform_indices = @transform_11, window_bounds = array<i64: 128, 128>}, {pipeline_mode = #tpu.pipeline_mode<synchronous>, transform_indices = @transform_12, window_bounds = array<i64: 1, 128>}, {pipeline_mode = #tpu.pipeline_mode<synchronous>, transform_indices = @transform_13, window_bounds = array<i64: 128, 128>}, {pipeline_mode = #tpu.pipeline_mode<synchronous>, transform_indices = @transform_14, window_bounds = array<i64: 1, 128>}, {pipeline_mode = #tpu.pipeline_mode<synchronous>, transform_indices = @transform_15, window_bounds = array<i64: 128, 784>}, {pipeline_mode = #tpu.pipeline_mode<synchronous>, transform_indices = @transform_16, window_bounds = array<i64: 1, 784>}, {transform_indices = @transform_17, window_bounds = array<i64: 104, 128>}, {transform_indices = @transform_18, window_bounds = array<i64: 104, 784>}]} {
    %c0 = arith.constant 0 : index
    %c0_0 = arith.constant 0 : index
    %0 = vector.load %arg1[%c0, %c0_0] : memref<104x784xf32, #tpu.memory_space<vmem>>, vector<104x784xf32>
    %1 = arith.truncf %0 : vector<104x784xf32> to vector<104x784xbf16>
    %c0_1 = arith.constant 0 : index
    %c0_2 = arith.constant 0 : index
    %2 = vector.load %arg2[%c0_1, %c0_2] : memref<784x128xbf16, #tpu.memory_space<vmem>>, vector<784x128xbf16>
    %cst = arith.constant dense<0.000000e+00> : vector<104x128xf32>
    %3 = tpu.matmul %1, %2, %cst {dimension_numbers = #tpu.dot_dimension_numbers<[1], [0], [0], [1], [0, 0, 1, 1], [], []>} : vector<104x784xbf16>, vector<784x128xbf16>, vector<104x128xf32> -> vector<104x128xf32>
    %c0_3 = arith.constant 0 : index
    %c0_4 = arith.constant 0 : index
    %4 = vector.load %arg3[%c0_3, %c0_4] : memref<1x128xf32, #tpu.memory_space<vmem>>, vector<1x128xf32>
    %5 = vector.broadcast %4 : vector<1x128xf32> to vector<104x128xf32>
    %6 = arith.addf %3, %5 : vector<104x128xf32>
    %7 = math.tanh %6 : vector<104x128xf32>
    %8 = arith.truncf %7 : vector<104x128xf32> to vector<104x128xbf16>
    %c0_5 = arith.constant 0 : index
    %c0_6 = arith.constant 0 : index
    %9 = vector.load %arg4[%c0_5, %c0_6] : memref<128x128xbf16, #tpu.memory_space<vmem>>, vector<128x128xbf16>
    %cst_7 = arith.constant dense<0.000000e+00> : vector<104x128xf32>
    %10 = tpu.matmul %8, %9, %cst_7 {dimension_numbers = #tpu.dot_dimension_numbers<[1], [0], [0], [1], [0, 0, 1, 1], [], []>} : vector<104x128xbf16>, vector<128x128xbf16>, vector<104x128xf32> -> vector<104x128xf32>
    %c0_8 = arith.constant 0 : index
    %c0_9 = arith.constant 0 : index
    %11 = vector.load %arg5[%c0_8, %c0_9] : memref<1x128xf32, #tpu.memory_space<vmem>>, vector<1x128xf32>
    %12 = vector.broadcast %11 : vector<1x128xf32> to vector<104x128xf32>
    %13 = arith.addf %10, %12 : vector<104x128xf32>
    %14 = math.tanh %13 : vector<104x128xf32>
    %15 = arith.truncf %14 : vector<104x128xf32> to vector<104x128xbf16>
    %c0_10 = arith.constant 0 : index
    %c0_11 = arith.constant 0 : index
    %16 = vector.load %arg6[%c0_10, %c0_11] : memref<128x128xbf16, #tpu.memory_space<vmem>>, vector<128x128xbf16>
    %cst_12 = arith.constant dense<0.000000e+00> : vector<104x128xf32>
    %17 = tpu.matmul %15, %16, %cst_12 {dimension_numbers = #tpu.dot_dimension_numbers<[1], [0], [0], [1], [0, 0, 1, 1], [], []>} : vector<104x128xbf16>, vector<128x128xbf16>, vector<104x128xf32> -> vector<104x128xf32>
    %c0_13 = arith.constant 0 : index
    %c0_14 = arith.constant 0 : index
    %18 = vector.load %arg7[%c0_13, %c0_14] : memref<1x128xf32, #tpu.memory_space<vmem>>, vector<1x128xf32>
    %19 = vector.broadcast %18 : vector<1x128xf32> to vector<104x128xf32>
    %20 = arith.addf %17, %19 : vector<104x128xf32>
    %21 = math.tanh %20 : vector<104x128xf32>
    %22 = arith.truncf %21 : vector<104x128xf32> to vector<104x128xbf16>
    %c0_15 = arith.constant 0 : index
    %c0_16 = arith.constant 0 : index
    %23 = vector.load %arg8[%c0_15, %c0_16] : memref<128x128xbf16, #tpu.memory_space<vmem>>, vector<128x128xbf16>
    %cst_17 = arith.constant dense<0.000000e+00> : vector<104x128xf32>
    %24 = tpu.matmul %22, %23, %cst_17 {dimension_numbers = #tpu.dot_dimension_numbers<[1], [0], [0], [1], [0, 0, 1, 1], [], []>} : vector<104x128xbf16>, vector<128x128xbf16>, vector<104x128xf32> -> vector<104x128xf32>
    %c0_18 = arith.constant 0 : index
    %c0_19 = arith.constant 0 : index
    %25 = vector.load %arg9[%c0_18, %c0_19] : memref<1x128xf32, #tpu.memory_space<vmem>>, vector<1x128xf32>
    %26 = vector.broadcast %25 : vector<1x128xf32> to vector<104x128xf32>
    %27 = arith.addf %24, %26 : vector<104x128xf32>
    %28 = arith.truncf %27 : vector<104x128xf32> to vector<104x128xbf16>
    %c0_20 = arith.constant 0 : index
    %c0_21 = arith.constant 0 : index
    %29 = vector.load %arg10[%c0_20, %c0_21] : memref<128x128xbf16, #tpu.memory_space<vmem>>, vector<128x128xbf16>
    %cst_22 = arith.constant dense<0.000000e+00> : vector<104x128xf32>
    %30 = tpu.matmul %28, %29, %cst_22 {dimension_numbers = #tpu.dot_dimension_numbers<[1], [0], [0], [1], [0, 0, 1, 1], [], []>} : vector<104x128xbf16>, vector<128x128xbf16>, vector<104x128xf32> -> vector<104x128xf32>
    %c0_23 = arith.constant 0 : index
    %c0_24 = arith.constant 0 : index
    %31 = vector.load %arg11[%c0_23, %c0_24] : memref<1x128xf32, #tpu.memory_space<vmem>>, vector<1x128xf32>
    %32 = vector.broadcast %31 : vector<1x128xf32> to vector<104x128xf32>
    %33 = arith.addf %30, %32 : vector<104x128xf32>
    %34 = math.tanh %33 : vector<104x128xf32>
    %35 = arith.truncf %34 : vector<104x128xf32> to vector<104x128xbf16>
    %c0_25 = arith.constant 0 : index
    %c0_26 = arith.constant 0 : index
    %36 = vector.load %arg12[%c0_25, %c0_26] : memref<128x128xbf16, #tpu.memory_space<vmem>>, vector<128x128xbf16>
    %cst_27 = arith.constant dense<0.000000e+00> : vector<104x128xf32>
    %37 = tpu.matmul %35, %36, %cst_27 {dimension_numbers = #tpu.dot_dimension_numbers<[1], [0], [0], [1], [0, 0, 1, 1], [], []>} : vector<104x128xbf16>, vector<128x128xbf16>, vector<104x128xf32> -> vector<104x128xf32>
    %c0_28 = arith.constant 0 : index
    %c0_29 = arith.constant 0 : index
    %38 = vector.load %arg13[%c0_28, %c0_29] : memref<1x128xf32, #tpu.memory_space<vmem>>, vector<1x128xf32>
    %39 = vector.broadcast %38 : vector<1x128xf32> to vector<104x128xf32>
    %40 = arith.addf %37, %39 : vector<104x128xf32>
    %41 = math.tanh %40 : vector<104x128xf32>
    %42 = arith.truncf %41 : vector<104x128xf32> to vector<104x128xbf16>
    %c0_30 = arith.constant 0 : index
    %c0_31 = arith.constant 0 : index
    %43 = vector.load %arg14[%c0_30, %c0_31] : memref<128x128xbf16, #tpu.memory_space<vmem>>, vector<128x128xbf16>
    %cst_32 = arith.constant dense<0.000000e+00> : vector<104x128xf32>
    %44 = tpu.matmul %42, %43, %cst_32 {dimension_numbers = #tpu.dot_dimension_numbers<[1], [0], [0], [1], [0, 0, 1, 1], [], []>} : vector<104x128xbf16>, vector<128x128xbf16>, vector<104x128xf32> -> vector<104x128xf32>
    %c0_33 = arith.constant 0 : index
    %c0_34 = arith.constant 0 : index
    %45 = vector.load %arg15[%c0_33, %c0_34] : memref<1x128xf32, #tpu.memory_space<vmem>>, vector<1x128xf32>
    %46 = vector.broadcast %45 : vector<1x128xf32> to vector<104x128xf32>
    %47 = arith.addf %44, %46 : vector<104x128xf32>
    %48 = math.tanh %47 : vector<104x128xf32>
    %49 = arith.truncf %48 : vector<104x128xf32> to vector<104x128xbf16>
    %c0_35 = arith.constant 0 : index
    %c0_36 = arith.constant 0 : index
    %50 = vector.load %arg16[%c0_35, %c0_36] : memref<128x784xbf16, #tpu.memory_space<vmem>>, vector<128x784xbf16>
    %cst_37 = arith.constant dense<0.000000e+00> : vector<104x784xf32>
    %51 = tpu.matmul %49, %50, %cst_37 {dimension_numbers = #tpu.dot_dimension_numbers<[1], [0], [0], [1], [0, 0, 1, 1], [], []>} : vector<104x128xbf16>, vector<128x784xbf16>, vector<104x784xf32> -> vector<104x784xf32>
    %c0_38 = arith.constant 0 : index
    %c0_39 = arith.constant 0 : index
    %52 = vector.load %arg17[%c0_38, %c0_39] : memref<1x784xf32, #tpu.memory_space<vmem>>, vector<1x784xf32>
    %53 = vector.broadcast %52 : vector<1x784xf32> to vector<104x784xf32>
    %54 = arith.addf %51, %53 : vector<104x784xf32>
    %cst_40 = arith.constant 0.000000e+00 : f32
    %55 = vector.broadcast %cst_40 : f32 to vector<104x784xf32>
    %56 = arith.subf %55, %54 : vector<104x784xf32>
    %57 = arith.truncf %56 : vector<104x784xf32> to vector<104x784xbf16>
    %58 = math.exp %57 : vector<104x784xbf16>
    %59 = arith.extf %58 : vector<104x784xbf16> to vector<104x784xf32>
    %cst_41 = arith.constant 1.000000e+00 : f32
    %60 = vector.broadcast %cst_41 : f32 to vector<104x784xf32>
    %61 = arith.addf %60, %59 : vector<104x784xf32>
    %62 = tpu.reciprocal %61 {approx = true} : vector<104x784xf32> -> vector<104x784xf32>
    %63 = arith.truncf %27 : vector<104x128xf32> to vector<104x128xbf16>
    %c0_42 = arith.constant 0 : index
    %c0_43 = arith.constant 0 : index
    %64 = vector.load %arg18[%c0_42, %c0_43] : memref<104x128xbf16, #tpu.memory_space<vmem>>, vector<104x128xbf16>
    tpu.vector_store %arg18[%c0_42, %c0_43], %63 {strides = array<i32>} : memref<104x128xbf16, #tpu.memory_space<vmem>>, vector<104x128xbf16>,
    %65 = arith.truncf %62 : vector<104x784xf32> to vector<104x784xbf16>
    %c0_44 = arith.constant 0 : index
    %c0_45 = arith.constant 0 : index
    %66 = vector.load %arg19[%c0_44, %c0_45] : memref<104x784xbf16, #tpu.memory_space<vmem>>, vector<104x784xbf16>
    tpu.vector_store %arg19[%c0_44, %c0_45], %65 {strides = array<i32>} : memref<104x784xbf16, #tpu.memory_space<vmem>>, vector<104x784xbf16>,
    return
  }
  func.func @transform_0(%arg0: i32) -> (i32, i32) {
    %c0_i32 = arith.constant 0 : i32
    %c0_i32_0 = arith.constant 0 : i32
    return %arg0, %c0_i32 : i32, i32
  }
  func.func @transform_1(%arg0: i32) -> (i32, i32) {
    %c0_i32 = arith.constant 0 : i32
    %c0_i32_0 = arith.constant 0 : i32
    %c0_i32_1 = arith.constant 0 : i32
    return %c0_i32, %c0_i32_0 : i32, i32
  }
  func.func @transform_2(%arg0: i32) -> (i32, i32) {
    %c0_i32 = arith.constant 0 : i32
    %c0_i32_0 = arith.constant 0 : i32
    %c0_i32_1 = arith.constant 0 : i32
    return %c0_i32, %c0_i32_0 : i32, i32
  }
  func.func @transform_3(%arg0: i32) -> (i32, i32) {
    %c0_i32 = arith.constant 0 : i32
    %c0_i32_0 = arith.constant 0 : i32
    %c0_i32_1 = arith.constant 0 : i32
    return %c0_i32, %c0_i32_0 : i32, i32
  }
  func.func @transform_4(%arg0: i32) -> (i32, i32) {
    %c0_i32 = arith.constant 0 : i32
    %c0_i32_0 = arith.constant 0 : i32
    %c0_i32_1 = arith.constant 0 : i32
    return %c0_i32, %c0_i32_0 : i32, i32
  }
  func.func @transform_5(%arg0: i32) -> (i32, i32) {
    %c0_i32 = arith.constant 0 : i32
    %c0_i32_0 = arith.constant 0 : i32
    %c0_i32_1 = arith.constant 0 : i32
    return %c0_i32, %c0_i32_0 : i32, i32
  }
  func.func @transform_6(%arg0: i32) -> (i32, i32) {
    %c0_i32 = arith.constant 0 : i32
    %c0_i32_0 = arith.constant 0 : i32
    %c0_i32_1 = arith.constant 0 : i32
    return %c0_i32, %c0_i32_0 : i32, i32
  }
  func.func @transform_7(%arg0: i32) -> (i32, i32) {
    %c0_i32 = arith.constant 0 : i32
    %c0_i32_0 = arith.constant 0 : i32
    %c0_i32_1 = arith.constant 0 : i32
    return %c0_i32, %c0_i32_0 : i32, i32
  }
  func.func @transform_8(%arg0: i32) -> (i32, i32) {
    %c0_i32 = arith.constant 0 : i32
    %c0_i32_0 = arith.constant 0 : i32
    %c0_i32_1 = arith.constant 0 : i32
    return %c0_i32, %c0_i32_0 : i32, i32
  }
  func.func @transform_9(%arg0: i32) -> (i32, i32) {
    %c0_i32 = arith.constant 0 : i32
    %c0_i32_0 = arith.constant 0 : i32
    %c0_i32_1 = arith.constant 0 : i32
    return %c0_i32, %c0_i32_0 : i32, i32
  }
  func.func @transform_10(%arg0: i32) -> (i32, i32) {
    %c0_i32 = arith.constant 0 : i32
    %c0_i32_0 = arith.constant 0 : i32
    %c0_i32_1 = arith.constant 0 : i32
    return %c0_i32, %c0_i32_0 : i32, i32
  }
  func.func @transform_11(%arg0: i32) -> (i32, i32) {
    %c0_i32 = arith.constant 0 : i32
    %c0_i32_0 = arith.constant 0 : i32
    %c0_i32_1 = arith.constant 0 : i32
    return %c0_i32, %c0_i32_0 : i32, i32
  }
  func.func @transform_12(%arg0: i32) -> (i32, i32) {
    %c0_i32 = arith.constant 0 : i32
    %c0_i32_0 = arith.constant 0 : i32
    %c0_i32_1 = arith.constant 0 : i32
    return %c0_i32, %c0_i32_0 : i32, i32
  }
  func.func @transform_13(%arg0: i32) -> (i32, i32) {
    %c0_i32 = arith.constant 0 : i32
    %c0_i32_0 = arith.constant 0 : i32
    %c0_i32_1 = arith.constant 0 : i32
    return %c0_i32, %c0_i32_0 : i32, i32
  }
  func.func @transform_14(%arg0: i32) -> (i32, i32) {
    %c0_i32 = arith.constant 0 : i32
    %c0_i32_0 = arith.constant 0 : i32
    %c0_i32_1 = arith.constant 0 : i32
    return %c0_i32, %c0_i32_0 : i32, i32
  }
  func.func @transform_15(%arg0: i32) -> (i32, i32) {
    %c0_i32 = arith.constant 0 : i32
    %c0_i32_0 = arith.constant 0 : i32
    %c0_i32_1 = arith.constant 0 : i32
    return %c0_i32, %c0_i32_0 : i32, i32
  }
  func.func @transform_16(%arg0: i32) -> (i32, i32) {
    %c0_i32 = arith.constant 0 : i32
    %c0_i32_0 = arith.constant 0 : i32
    %c0_i32_1 = arith.constant 0 : i32
    return %c0_i32, %c0_i32_0 : i32, i32
  }
  func.func @transform_17(%arg0: i32) -> (i32, i32) {
    %c0_i32 = arith.constant 0 : i32
    %c0_i32_0 = arith.constant 0 : i32
    return %arg0, %c0_i32 : i32, i32
  }
  func.func @transform_18(%arg0: i32) -> (i32, i32) {
    %c0_i32 = arith.constant 0 : i32
    %c0_i32_0 = arith.constant 0 : i32
    return %arg0, %c0_i32 : i32, i32
  }
}

</mosaic_0001>

<bundles_post_ra>
// kernel: tpu_custom_call.1
= control target key start
LH: loop header
LB: loop body
LE: loop exit
PB: predicated region body
PF: predicated region fallthrough
CT: control target
= control target key end

     0   :  { %s8109_s0 = inlined_call_operand.hbm [shape: f32[200,784], index: 0, kind: input, shape index: {}]   ;;  %s8110_s1 = inlined_call_operand.vmem [shape: bf16[784,128], index: 1, kind: input, shape index: {}]   ;;  %s8111_s2 = inlined_call_operand.vmem [shape: f32[1,128], index: 2, kind: input, shape index: {}]   ;;  %s8112_s3 = inlined_call_operand.vmem [shape: bf16[128,128], index: 3, kind: input, shape index: {}]   ;;  %s8113_s4 = inlined_call_operand.vmem [shape: f32[1,128], index: 4, kind: input, shape index: {}]   ;;  %s8114_s5 = inlined_call_operand.vmem [shape: bf16[128,128], index: 5, kind: input, shape index: {}]   ;;  %s8115_s6 = inlined_call_operand.vmem [shape: f32[1,128], index: 6, kind: input, shape index: {}]   ;;  %s8116_s7 = inlined_call_operand.vmem [shape: bf16[128,128], index: 7, kind: input, shape index: {}]   ;;  %s8117_s8 = inlined_call_operand.vmem [shape: f32[1,128], index: 8, kind: input, shape index: {}]   ;;  %s8118_s9 = inlined_call_operand.vmem [shape: bf16[128,128], index: 9, kind: input, shape index: {}]   ;;  %s8119_s10 = inlined_call_operand.vmem [shape: f32[1,128], index: 10, kind: input, shape index: {}]   ;;  %s8120_s11 = inlined_call_operand.vmem [shape: bf16[128,128], index: 11, kind: input, shape index: {}]   ;;  %s8121_s12 = inlined_call_operand.vmem [shape: f32[1,128], index: 12, kind: input, shape index: {}]   ;;  %s8122_s13 = inlined_call_operand.vmem [shape: bf16[128,128], index: 13, kind: input, shape index: {}]   ;;  %s8123_s14 = inlined_call_operand.vmem [shape: f32[1,128], index: 14, kind: input, shape index: {}]   ;;  %s8124_s15 = inlined_call_operand.vmem [shape: bf16[128,784], index: 15, kind: input, shape index: {}]   ;;  %s8125_s16 = inlined_call_operand.vmem [shape: f32[1,784], index: 16, kind: input, shape index: {}]   ;;  %s8126_s17 = inlined_call_operand.hbm [shape: bf16[200,128], index: 17, kind: output, shape index: {0}]   ;;  %s8127_s18 = inlined_call_operand.hbm [shape: bf16[200,784], index: 18, kind: output, shape index: {1}]  }
   0x1   :  { %8145 = sst [smem:[#allocation18_spill]] %s8109_s0 }
   0x2   :  { %8146 = sst [smem:[#allocation19_spill]] %s8110_s1 }
   0x3   :  { %8147 = sst [smem:[#allocation20_spill]] %s8111_s2 }
   0x4   :  { %8148 = sst [smem:[#allocation21_spill]] %s8112_s3 }
   0x5   :  { %8149 = sst [smem:[#allocation22_spill]] %s8126_s17 }
   0x6   :  { %8150 = sst [smem:[#allocation23_spill]] %s8127_s18 }
   0x7   :  { %24 = vsyncpa [#allocation3], 0 }
   0x8   :  { %26 = vsyncpa [#allocation3 + $0x1], 0 }
   0x9   :  { %27 = vsyncpa [#allocation4], 0 }
   0xa   :  { %29 = vsyncpa [#allocation4 + $0x1], 0 }
   0xb   :  { %30 = vsyncpa [#allocation7], 0 }
   0xc   :  { %32 = vsyncpa [#allocation7 + $0x1], 0  ;;  %s6411_s27 = smov 0   ;;  %s6413_s28 = smov 0  }
   0xd   :  { %s6415_s29 = smov 0   ;;  %s6417_s30 = smov 0  }
   0xe LB: > { %8151 = sst [smem:[#allocation11_spill]] %s6290_s27  ;;  %s6432_s0 = sadd.s32 4294967295, %s6302_s30   ;;  %s6302_s30 = sphi %s6417_s30, %s8181_s30   ;;  %s6298_s29 = sphi %s6415_s29, %s8183_s29   ;;  %s6294_s28 = sphi %s6413_s28, %s8185_s28   ;;  %s6290_s27 = sphi %s6411_s27, %s8184_s27  }
   0xf   : > { %8152 = sst [smem:[#allocation12_spill]] %s6298_s29  ;;  %s4524_s19 = sadd.s32 4294967294, %s6302_s30  }
  0x10   : > { %8153 = sst [smem:[#allocation13_spill]] %s6432_s0  ;;  %s6436_s1 = sadd.s32 1, %s6302_s30  }
  0x11   : > { %8154 = sst [smem:[#allocation14_spill]] %s6436_s1  ;;  %s45_s20 = sadd.s32 1, %s6298_s29 }
  0x12   : > { %s42_s21 = ssub.s32 %s6302_s30, %s6436_s1  ;;  %p52_p0 = scmp.ne.s32.totalorder %s6298_s29, %s6294_s28 }
  0x13   : > { %p43_p1 = scmp.eq.s32.totalorder %s42_s21, 0  ;;  %p53_p2 = scmp.eq.s32.totalorder %s6302_s30, 0 }
  0x14   : > { %p58_p3 = scmp.ne.s32.totalorder %s6294_s28, %s6290_s27  ;;  %p59_p4 = scmp.eq.s32.totalorder %s6432_s0, 0 }
  0x15   : > { %s6448_s22 = scalar_select %p43_p1, %s6298_s29, %s45_s20  }
  0x16   : > { %p54_p5 = por %p53_p2, %p52_p0  ;;  %p6450_p6 = por %p59_p4, %p58_p3 }
  0x17   : > { %8155 = sst [smem:[#allocation15_spill]] %s6448_s22  ;;  %p418_p7 = scmp.eq.s32.totalorder %s6432_s0, 1 }
  0x18   : > { %p424_p8 = scmp.eq.s32.totalorder %s4524_s19, 1  ;;  %p8141_p11 = scmp.ge.s32.totalorder %s6302_s30, 2 }
  0x19   : > { %p6455_p9 = por %p418_p7, %p52_p0 }
  0x1a   : > { %p6459_p10 = por %p424_p8, %p58_p3  ;;  %514 = sbr.rel (%p8141_p11) target bundleno = 74 (0x4a), region = 80 }
  0x1b   : > { %s8157_s23 = scalar_select %p6455_p9, 1, 0 }
  0x1c   : > { %s8159_s24 = scalar_select %p6459_p10, 1, 0 }
  0x1d   : > { %8158 = sst [smem:[#allocation16_spill]] %s8157_s23 }
  0x1e   : > { %8160 = sst [smem:[#allocation17_spill]] %s8159_s24 }
  0x21   : > { %517 = sbr.rel (!%p54_p5) target bundleno = 74 (0x4a), region = 84  ;;  %s518_s25 = sand.u32 (%p54_p5), 1, %s6298_s29  }
  0x22   : > { %s523_s26 = smul.u32 (%p54_p5), 13, %s6302_s30  ;;  %s6471_s1 = scalar_lea.sflag (%p54_p5), [#allocation3], %s518_s25 }
  0x23   : > { %s5503_s20 = smul.u32 (%p54_p5), 728, %s518_s25 }
  0x24   : > { %s524_s19 = ssub.s32 (%p54_p5), 25, %s523_s26 }
  0x25   : > { %p525_p12 = scmp.lt.s32.totalorder (%p54_p5), %s524_s19, 13  ;;  %s522_s24 = scalar_lea.vmem (%p54_p5), [#allocation2], %s5503_s20 }
  0x28   : > { %s8187_s19 = smov (!%p525_p12, %s524_s19), 13 }
  0x29   : > { %s6468_s21 = smul.u32 896, %s8187_s19 }
  0x2b   : > { %s530_s22 = ssub.s32 11648, %s6468_s21 }
  0x2c   : > { %531 = vsyncadd %s6471_s1, %s530_s22  ;;  %p4529_p13 = scmp.ne.s32.totalorder %s6468_s21, 0  ;;  %s5519_s29 = smul.u32 11648, %s6302_s30 }
  0x2d   : > { %s537_s27 = sshll.u32 %s522_s24, 4  ;;  %s8161_s17 = sld [smem:[#allocation18_spill]]  ;;  %s6481_s27 = int_to_ptr.vmem [resolvable:$true] %s537_s27 }
  0x33   : > { %s6479_s0 = scalar_lea.hbm %s8161_s17, %s5519_s29  ;;  %s6180_s24 = scalar_lea.hbm %s8161_s17, 22400 }
  0x34   : > { %s6176_s25 = scalar_lea.hbm %s6479_s0, %s6468_s21  ;;  %p6181_p3 = scmp.lt.u32.totalorder %s6479_s0, %s8161_s17 }
  0x35   : > { %p6177_p0 = scmp.ne.s32.totalorder %s6479_s0, %s6176_s25  ;;  %p6182_p4 = scmp.lt.u32.totalorder %s6180_s24, %s6176_s25 }
  0x36   : > { %p6184_p7 = scmp.lt.u32.totalorder %s6176_s25, %s6479_s0 }
  0x37   : > { %p6178_p1 = pnand %p6177_p0, %p4529_p13  ;;  %p6183_p5 = por %p6182_p4, %p6181_p3 }
  0x39   : > { %p6179_p2 = pneg %p6178_p1  ;;  %p6185_p8 = por %p6184_p7, %p6183_p5 }
  0x3b   : > { %p6186_p12 = pnand %p6185_p8, %p6179_p2 }
  0x3d   : > { %6189 = shalt.err (!%p6186_p12)
}
  0x3e   : > { %s6190_s18 = scalar_lea.vmem %s6481_s27, %s6468_s21  ;;  %s6304_s29 = smov [#allocation2]  }
  0x3f   : > { %p6191_p0 = scmp.ne.s32.totalorder %s6481_s27, %s6190_s18  ;;  %s6194_s26 = sshll.u32 %s6304_s29, 4  ;;  %s6195_s26 = int_to_ptr.vmem [resolvable:$false] %s6194_s26 }
  0x40   : > { %s6196_s23 = scalar_lea.vmem %s6195_s26, 23296  ;;  %p6197_p10 = scmp.lt.s32.totalorder %s6481_s27, %s6195_s26 }
  0x41   : > { %p6192_p1 = pnand %p6191_p0, %p4529_p13  ;;  %p6198_p3 = scmp.lt.s32.totalorder %s6196_s23, %s6190_s18 }
  0x43   : > { %p6193_p11 = pneg %p6192_p1  ;;  %p6199_p4 = por %p6198_p3, %p6197_p10 }
  0x45   : > { %p6200_p5 = pnand %p6199_p4, %p6193_p11 }
  0x47   : > { %6203 = shalt.err (!%p6200_p5)
}
  0x48   : > { %s6305_s25 = smov 896   ;;  %s6306_s22 = smov 56  }
  0x49   : > { %543 = dma.hbm_to_vmem [thread:$0]  (%p4529_p13), %s6479_s0, %s6468_s21, %s6481_s27, %s6471_s1, %s6305_s25, %s6305_s25, %s6306_s22  }
  0x4a PF: > { %p4532_p2 = scmp.ge.s32.totalorder %s6302_s30, 1  ;;  %p545_p7 = scmp.lt.s32.totalorder %s6302_s30, 3 }
  0x4c   : > { %p546_p8 = pnand %p4532_p2, %p545_p7 }
  0x4d   : > { %s6511_s20 = sand.u32 (!%p546_p8), 1, %s6294_s28  }
  0x4e   : > { %549 = sbr.rel (%p546_p8) target bundleno = 2260 (0x8d4), region = 88  ;;  %s552_s19 = scalar_lea.sflag (!%p546_p8), [#allocation3], %s6511_s20 }
  0x4f   : > { %s5505_s24 = smul.u32 (!%p546_p8), 728, %s6511_s20 }
  0x51   : > { %s6515_s18 = scalar_lea.vmem (!%p546_p8), [#allocation2], %s5505_s24 }
  0x55   : > { %6277 = dma.done.wait (%p6450_p6), %s552_s19, 11648  }
  0x56   : > { %6279 = vsyncadd (%p6450_p6), %s552_s19, 4294955648  ;;  %s8162_s1 = sld [smem:[#allocation19_spill]]  ;;  %v632_v31 = vld [vmem:[%s6515_s18 + $0x8] sm:$0xff]  ;;  %v639_v32 = vld [vmem:[%s6515_s18 + $0x40] sm:$0xff]  ;;  %v6307_v43 = vmov 0.0   ;;  %vm1170_vm0 = vcmask 130048  }
  0x57   : > { %v723_v33 = vpack.c.bf16 %v639_v32, %v632_v31  ;;  %v631_v35 = vld [vmem:[%s6515_s18] sm:$0xff]  ;;  %v638_v36 = vld [vmem:[%s6515_s18 + $0x38] sm:$0xff]  ;;  %v641_v40 = vld [vmem:[%s6515_s18 + $0x50] sm:$0xff]  ;;  %vm6308_vm1 = vmmov 0   ;;  %s8163_s3 = sld [smem:[#allocation21_spill]]  ;;  %s8164_s25 = sld [smem:[#allocation20_spill]] }
  0x58   : > { %v722_v37 = vpack.c.bf16 %v638_v36, %v631_v35  ;;  %v634_v39 = vld [vmem:[%s6515_s18 + $0x18] sm:$0xff]  ;;  %v633_v44 = vld [vmem:[%s6515_s18 + $0x10] sm:$0xff]  ;;  %v640_v45 = vld [vmem:[%s6515_s18 + $0x48] sm:$0xff]  ;;  %s5506_s27 = smul.u32 52, %s6511_s20  ;;  %vm4320_vm2 = vcmask 125952   ;;  %s8168_s29 = sld [smem:[#allocation13_spill]] (%p6455_p9) }
  0x59   : > { %1224 = vmatprep.mubr.bf16.mxu0 %v723_v33  ;;  %v725_v41 = vpack.c.bf16 %v641_v40, %v634_v39  ;;  %v724_v46 = vpack.c.bf16 %v640_v45, %v633_v44  ;;  %v646_v48 = vld [vmem:[%s6515_s18 + $0x78] sm:$0xff]  ;;  %v653_v49 = vld [vmem:[%s6515_s18 + $0xb0] sm:$0xff]  ;;  %v652_v53 = vld [vmem:[%s6515_s18 + $0xa8] sm:$0xff]  ;;  %s5507_s24 = smul.u32 364, %s6511_s20 }
  0x5a   : > { %v730_v50 = vpack.c.bf16 %v653_v49, %v646_v48  ;;  %v645_v52 = vld [vmem:[%s6515_s18 + $0x70] sm:$0xff]  ;;  %v648_v56 = vld [vmem:[%s6515_s18 + $0x88] sm:$0xff]  ;;  %v655_v57 = vld [vmem:[%s6515_s18 + $0xc0] sm:$0xff]  ;;  %s7082_s0 = scalar_lea.vmem [#allocation5], %s5506_s27  ;;  %s8143_s27 = scalar_lea.sflag [#allocation4], %s6511_s20 }
  0x5b   : > { %1312 = vmatprep.mubr.bf16.mxu1 %v725_v41  ;;  %v729_v54 = vpack.c.bf16 %v652_v53, %v645_v52  ;;  %v647_v58 = vld [vmem:[%s6515_s18 + $0x80] sm:$0xff]  ;;  %v732_v59 = vpack.c.bf16 %v655_v57, %v648_v56  ;;  %v654_v60 = vld [vmem:[%s6515_s18 + $0xb8] sm:$0xff]  ;;  %v660_v63 = vld [vmem:[%s6515_s18 + $0xe8] sm:$0xff]  ;;  %s7608_s19 = scalar_lea.vmem [#allocation6], %s5507_s24 }
  0x5c   : > { %v5563_v0 = vld [vmem:[%s8162_s1 + $0x40] sm:$0xff]   ;;  %v5567_v4 = vld [vmem:[%s8162_s1 + $0x48] sm:$0xff]   ;;  %v5571_v8 = vld [vmem:[%s8162_s1 + $0x50] sm:$0xff]   ;;  %v731_v61 = vpack.c.bf16 %v654_v60, %v647_v58 }
  0x5d   : > { %v5564_v1 = vld [vmem:[%s8162_s1] sm:$0xff]   ;;  %4878 = vmatprep.subr.bf16.mxu0 %v5563_v0  ;;  %v5568_v5 = vld [vmem:[%s8162_s1 + $0x8] sm:$0xff]   ;;  %v5572_v9 = vld [vmem:[%s8162_s1 + $0x10] sm:$0xff]  }
  0x5e   : > { %v5565_v2 = vld [vmem:[%s8162_s1 + $0xc0] sm:$0xff]   ;;  %4879 = vmatpush3.bf16.msra.mxu0 %v5564_v1  ;;  %v5569_v6 = vld [vmem:[%s8162_s1 + $0xc8] sm:$0xff]   ;;  %v5573_v10 = vld [vmem:[%s8162_s1 + $0xd0] sm:$0xff]   ;;  %s4383_s26 = smul.u32 (%p6455_p9), 13, %s8168_s29 }
  0x5f   : > { %v5566_v3 = vld [vmem:[%s8162_s1 + $0x80] sm:$0xff]   ;;  %4936 = vmatprep.subr.bf16.mxu1 %v5565_v2  ;;  %4880 = vmatprep.subr.bf16.mxu0 %v5567_v4  ;;  %v5570_v7 = vld [vmem:[%s8162_s1 + $0x88] sm:$0xff]   ;;  %v5574_v11 = vld [vmem:[%s8162_s1 + $0x90] sm:$0xff]  }
  0x60   : > { %4937 = vmatpush3.bf16.msra.mxu1 %v5566_v3  ;;  %v5575_v12 = vld [vmem:[%s8162_s1 + $0x58] sm:$0xff]   ;;  %v5579_v16 = vld [vmem:[%s8162_s1 + $0x60] sm:$0xff]   ;;  %v5583_v20 = vld [vmem:[%s8162_s1 + $0x68] sm:$0xff]   ;;  %s4384_s23 = ssub.s32 (%p6455_p9), 25, %s4383_s26 }
  0x61   : > { %4938 = vmatprep.subr.bf16.mxu1 %v5569_v6  ;;  %v5576_v13 = vld [vmem:[%s8162_s1 + $0x18] sm:$0xff]   ;;  %v5580_v17 = vld [vmem:[%s8162_s1 + $0x20] sm:$0xff]   ;;  %v5584_v21 = vld [vmem:[%s8162_s1 + $0x28] sm:$0xff]   ;;  %p4385_p6 = scmp.lt.s32.totalorder (%p6455_p9), %s4384_s23, 13 }
  0x62   : > { %4881 = vmatpush3.bf16.msra.mxu0 %v5568_v5  ;;  %v5577_v14 = vld [vmem:[%s8162_s1 + $0xd8] sm:$0xff]   ;;  %v5581_v18 = vld [vmem:[%s8162_s1 + $0xe0] sm:$0xff]   ;;  %v5585_v22 = vld [vmem:[%s8162_s1 + $0xe8] sm:$0xff]  }
  0x63   : > { %4882 = vmatprep.subr.bf16.mxu0 %v5571_v8  ;;  %v5578_v15 = vld [vmem:[%s8162_s1 + $0x98] sm:$0xff]   ;;  %v5582_v19 = vld [vmem:[%s8162_s1 + $0xa0] sm:$0xff]   ;;  %v5586_v23 = vld [vmem:[%s8162_s1 + $0xa8] sm:$0xff]  }
  0x64   : > { %4939 = vmatpush3.bf16.msra.mxu1 %v5570_v7  ;;  %v5587_v24 = vld [vmem:[%s8162_s1 + $0x70] sm:$0xff]   ;;  %v5591_v28 = vld [vmem:[%s8162_s1 + $0x78] sm:$0xff]   ;;  %v5595_v38 = vld [vmem:[%s8162_s1 + $0x140] sm:$0xff]  }
  0x65   : > { %4940 = vmatprep.subr.bf16.mxu1 %v5573_v10  ;;  %v5588_v25 = vld [vmem:[%s8162_s1 + $0x30] sm:$0xff]   ;;  %v5592_v29 = vld [vmem:[%s8162_s1 + $0x38] sm:$0xff]   ;;  %v5596_v42 = vld [vmem:[%s8162_s1 + $0x100] sm:$0xff]  }
  0x66   : > { %4883 = vmatpush3.bf16.msra.mxu0 %v5572_v9  ;;  %v5589_v26 = vld [vmem:[%s8162_s1 + $0xf0] sm:$0xff]   ;;  %v5593_v30 = vld [vmem:[%s8162_s1 + $0xf8] sm:$0xff]   ;;  %v5597_v47 = vld [vmem:[%s8162_s1 + $0x180] sm:$0xff]  }
  0x67   : > { %4884 = vmatprep.subr.bf16.mxu0 %v5575_v12  ;;  %v5590_v27 = vld [vmem:[%s8162_s1 + $0xb0] sm:$0xff]   ;;  %v5594_v34 = vld [vmem:[%s8162_s1 + $0xb8] sm:$0xff]   ;;  %v5598_v51 = vld [vmem:[%s8162_s1 + $0x148] sm:$0xff]  }
  0x68   : > { %4941 = vmatpush3.bf16.msra.mxu1 %v5574_v11  ;;  %v5599_v55 = vld [vmem:[%s8162_s1 + $0x108] sm:$0xff]   ;;  %v5600_v62 = vld [vmem:[%s8162_s1 + $0x150] sm:$0xff]   ;;  %v667_v0 = vld [vmem:[%s6515_s18 + $0x120] sm:$0xff] }
  0x69   : > { %4942 = vmatprep.subr.bf16.mxu1 %v5577_v14  ;;  %v737_v1 = vpack.c.bf16 %v667_v0, %v660_v63  ;;  %v5601_v2 = vld [vmem:[%s8162_s1 + $0x110] sm:$0xff]   ;;  %v659_v3 = vld [vmem:[%s6515_s18 + $0xe0] sm:$0xff]  ;;  %v668_v8 = vld [vmem:[%s6515_s18 + $0x128] sm:$0xff] }
  0x6a   : > { %4885 = vmatpush3.bf16.msra.mxu0 %v5576_v13  ;;  %v666_v4 = vld [vmem:[%s6515_s18 + $0x118] sm:$0xff]  ;;  %v669_v6 = vld [vmem:[%s6515_s18 + $0x130] sm:$0xff]  ;;  %v687_v35 = vld [vmem:[%s6515_s18 + $0x1c0] sm:$0xff] }
  0x6b   : > { %4886 = vmatprep.subr.bf16.mxu0 %v5579_v16  ;;  %v662_v5 = vld [vmem:[%s6515_s18 + $0xf8] sm:$0xff]  ;;  %v661_v7 = vld [vmem:[%s6515_s18 + $0xf0] sm:$0xff]  ;;  %v736_v11 = vpack.c.bf16 %v666_v4, %v659_v3  ;;  %v676_v16 = vld [vmem:[%s6515_s18 + $0x168] sm:$0xff] }
  0x6c   : > { %4943 = vmatpush3.bf16.msra.mxu1 %v5578_v15  ;;  %v739_v9 = vpack.c.bf16 %v669_v6, %v662_v5  ;;  %v5602_v10 = vld [vmem:[%s8162_s1 + $0x158] sm:$0xff]   ;;  %v681_v14 = vld [vmem:[%s6515_s18 + $0x190] sm:$0xff]  ;;  %v696_v44 = vld [vmem:[%s6515_s18 + $0x208] sm:$0xff] }
  0x6d   : > { %4944 = vmatprep.subr.bf16.mxu1 %v5581_v18  ;;  %v5603_v12 = vld [vmem:[%s8162_s1 + $0x118] sm:$0xff]   ;;  %v738_v18 = vpack.c.bf16 %v668_v8, %v661_v7  ;;  %v5606_v32 = vld [vmem:[%s8162_s1 + $0x168] sm:$0xff]   ;;  %v5608_v40 = vld [vmem:[%s8162_s1 + $0x170] sm:$0xff]  }
  0x6e   : > { %4887 = vmatpush3.bf16.msra.mxu0 %v5580_v17  ;;  %v674_v13 = vld [vmem:[%s6515_s18 + $0x158] sm:$0xff]  ;;  %v683_v17 = vld [vmem:[%s6515_s18 + $0x1a0] sm:$0xff]  ;;  %v5607_v33 = vld [vmem:[%s8162_s1 + $0x128] sm:$0xff]  }
  0x6f   : > { %4888 = vmatprep.subr.bf16.mxu0 %v5583_v20  ;;  %v744_v15 = vpack.c.bf16 %v681_v14, %v674_v13  ;;  %v746_v20 = vpack.c.bf16 %v683_v17, %v676_v16  ;;  %v694_v36 = vld [vmem:[%s6515_s18 + $0x1f8] sm:$0xff]  ;;  %v709_v39 = vld [vmem:[%s6515_s18 + $0x270] sm:$0xff]  ;;  %v704_v45 = vld [vmem:[%s6515_s18 + $0x248] sm:$0xff] }
  0x70   : > { %4945 = vmatpush3.bf16.msra.mxu1 %v5582_v19  ;;  %v673_v19 = vld [vmem:[%s6515_s18 + $0x150] sm:$0xff]  ;;  %v711_v49 = vld [vmem:[%s6515_s18 + $0x280] sm:$0xff]  ;;  %v710_v58 = vld [vmem:[%s6515_s18 + $0x278] sm:$0xff] }
  0x71   : > { %4946 = vmatprep.subr.bf16.mxu1 %v5585_v22  ;;  %v680_v22 = vld [vmem:[%s6515_s18 + $0x188] sm:$0xff]  ;;  %v5609_v41 = vld [vmem:[%s8162_s1 + $0x130] sm:$0xff]   ;;  %v760_v52 = vpack.c.bf16 %v711_v49, %v704_v45  ;;  %v703_v57 = vld [vmem:[%s6515_s18 + $0x240] sm:$0xff] }
  0x72   : > { %4889 = vmatpush3.bf16.msra.mxu0 %v5584_v21  ;;  %v5604_v21 = vld [vmem:[%s8162_s1 + $0x160] sm:$0xff]   ;;  %v701_v53 = vld [vmem:[%s6515_s18 + $0x230] sm:$0xff]  ;;  %v718_v60 = vld [vmem:[%s6515_s18 + $0x2b8] sm:$0xff] }
  0x73   : > { %4890 = vmatprep.subr.bf16.mxu0 %v5587_v24  ;;  %v688_v24 = vld [vmem:[%s6515_s18 + $0x1c8] sm:$0xff]  ;;  %v715_v63 = vld [vmem:[%s6515_s18 + $0x2a0] sm:$0xff]  ;;  %v642_v7 = vld [vmem:[%s6515_s18 + $0x58] sm:$0xff] }
  0x74   : > { %4947 = vmatpush3.bf16.msra.mxu1 %v5586_v23  ;;  %v5605_v23 = vld [vmem:[%s8162_s1 + $0x120] sm:$0xff]   ;;  %v764_v3 = vpack.c.bf16 %v715_v63, %v715_v63  ;;  %v650_v8 = vld [vmem:[%s6515_s18 + $0x98] sm:$0xff] }
  0x75   : > { %4948 = vmatprep.subr.bf16.mxu1 %v5589_v26  ;;  %v675_v26 = vld [vmem:[%s6515_s18 + $0x160] sm:$0xff]  ;;  %v636_v0 = vld [vmem:[%s6515_s18 + $0x28] sm:$0xff]  ;;  %v706_v45 = vld [vmem:[%s6515_s18 + $0x258] sm:$0xff] }
  0x76   : > { %4891 = vmatpush3.bf16.msra.mxu0 %v5588_v25  ;;  %v695_v25 = vld [vmem:[%s6515_s18 + $0x200] sm:$0xff]  ;;  %v656_v16 = vld [vmem:[%s6515_s18 + $0xc8] sm:$0xff] }
  0x77   : > { %4892 = vmatprep.subr.bf16.mxu0 %v5591_v28  ;;  %v690_v28 = vld [vmem:[%s6515_s18 + $0x1d8] sm:$0xff]  ;;  %v751_v31 = vpack.c.bf16 %v695_v25, %v688_v24  ;;  %v635_v6 = vld [vmem:[%s6515_s18 + $0x20] sm:$0xff]  ;;  %v664_v17 = vld [vmem:[%s6515_s18 + $0x108] sm:$0xff] }
  0x78   : > { %4949 = vmatpush3.bf16.msra.mxu1 %v5590_v27  ;;  %v682_v27 = vld [vmem:[%s6515_s18 + $0x198] sm:$0xff]  ;;  %v663_v24 = vld [vmem:[%s6515_s18 + $0x100] sm:$0xff] }
  0x79   : > { %4950 = vmatprep.subr.bf16.mxu1 %v5593_v30  ;;  %v697_v30 = vld [vmem:[%s6515_s18 + $0x210] sm:$0xff]  ;;  %v670_v25 = vld [vmem:[%s6515_s18 + $0x138] sm:$0xff] }
  0x7a   : > { %4893 = vmatpush3.bf16.msra.mxu0 %v5592_v29  ;;  %v743_v29 = vpack.c.bf16 %v680_v22, %v673_v19  ;;  %v651_v19 = vld [vmem:[%s6515_s18 + $0xa0] sm:$0xff] }
  0x7b   : > { %4994 = vmatprep.subr.bf16.mxu0 %v5595_v38  ;;  %v702_v38 = vld [vmem:[%s6515_s18 + $0x238] sm:$0xff] }
  0x7c   : > { %4951 = vmatpush3.bf16.msra.mxu1 %v5594_v34  ;;  %v745_v34 = vpack.c.bf16 %v682_v27, %v675_v26  ;;  %v758_v48 = vpack.c.bf16 %v709_v39, %v702_v38  ;;  %v678_v26 = vld [vmem:[%s6515_s18 + $0x178] sm:$0xff]  ;;  %v685_v27 = vld [vmem:[%s6515_s18 + $0x1b0] sm:$0xff] }
  0x7d   : > { %5165 = vmatprep.subr.bf16.mxu1 %v6307_v43  ;;  %1225 = vmatmul.mubr.bf16.vlgmr.msra.gmra.mrb[0].mxu0 %v722_v37  ;;  %v753_v37 = vpack.c.bf16 %v697_v30, %v690_v28  ;;  %v665_v28 = vld [vmem:[%s6515_s18 + $0x110] sm:$0xff]  ;;  %v740_v30 = vpack.c.bf16 %v670_v25, %v663_v24  ;;  %v686_v38 = vld [vmem:[%s6515_s18 + $0x1b8] sm:$0xff] }
  0x7e   : > { %4995 = vmatpush3.bf16.msra.mxu0 %v5596_v42  ;;  %1232 = vmatprep.mubr.bf16.mxu0 %v730_v50  ;;  %v689_v42 = vld [vmem:[%s6515_s18 + $0x1d0] sm:$0xff]  ;;  %v5611_v50 = vld [vmem:[%s8162_s1 + $0x138] sm:$0xff]  }
  0x7f   : > { %1313 = vmatmul.mubr.bf16.vlgmr.msra.gmra.mrb[0].mxu1 %v724_v46  ;;  %4996 = vmatprep.subr.bf16.mxu0 %v5598_v51  ;;  %v750_v46 = vpack.c.bf16 %v694_v36, %v687_v35  ;;  %v752_v51 = vpack.c.bf16 %v696_v44, %v689_v42  ;;  %v692_v35 = vld [vmem:[%s6515_s18 + $0x1e8] sm:$0xff]  ;;  %v699_v36 = vld [vmem:[%s6515_s18 + $0x220] sm:$0xff]  ;;  %v698_v44 = vld [vmem:[%s6515_s18 + $0x218] sm:$0xff] }
  0x80   : > { %5166 = vmatpush3.bf16.msra.mxu1 %v5597_v47  ;;  %1320 = vmatprep.mubr.bf16.mxu1 %v732_v59  ;;  %v5610_v47 = vld [vmem:[%s8162_s1 + $0x178] sm:$0xff]  }
  0x81   : > { %5239 = vmatprep.subr.bf16.mxu1 %v6307_v43  ;;  %v691_v42 = vld [vmem:[%s6515_s18 + $0x1e0] sm:$0xff] }
  0x82   : > { %4997 = vmatpush3.bf16.msra.mxu0 %v5599_v55  ;;  %v716_v55 = vld [vmem:[%s6515_s18 + $0x2a8] sm:$0xff]  ;;  %v754_v49 = vpack.c.bf16 %v698_v44, %v691_v42 }
  0x83   : > { %4998 = vmatprep.subr.bf16.mxu0 %v5600_v62  ;;  %v765_v59 = vpack.c.bf16 %v716_v55, %v716_v55  ;;  %v767_v62 = vpack.c.bf16 %v718_v60, %v718_v60  ;;  %v707_v55 = vld [vmem:[%s6515_s18 + $0x260] sm:$0xff] }
  0x84   : > { %v719_v60 = vld [vmem:[%s6515_s18 + $0x2c0] sm:$0xff] }
  0x85   : > { %1233 = vmatmul.mubr.bf16.gmra.mrb[4].mxu0 %v729_v54  ;;  %v708_v54 = vld [vmem:[%s6515_s18 + $0x268] sm:$0xff] }
  0x86   : > { %1240 = vmatprep.mubr.bf16.mxu0 %v737_v1  ;;  %4999 = vmatpush3.bf16.msra.mxu0 %v5601_v2  ;;  %v757_v56 = vpack.c.bf16 %v708_v54, %v701_v53  ;;  %v643_v1 = vld [vmem:[%s6515_s18 + $0x60] sm:$0xff]  ;;  %v717_v2 = vld [vmem:[%s6515_s18 + $0x2b0] sm:$0xff]  ;;  %v712_v53 = vld [vmem:[%s6515_s18 + $0x288] sm:$0xff] }
  0x87   : > { %1321 = vmatmul.mubr.bf16.gmra.mrb[4].mxu1 %v731_v61  ;;  %5000 = vmatprep.subr.bf16.mxu0 %v5602_v10  ;;  %v759_v61 = vpack.c.bf16 %v710_v58, %v703_v57  ;;  %v727_v4 = vpack.c.bf16 %v643_v1, %v636_v0  ;;  %v766_v5 = vpack.c.bf16 %v717_v2, %v717_v2  ;;  %v637_v10 = vld [vmem:[%s6515_s18 + $0x30] sm:$0xff]  ;;  %v720_v54 = vld [vmem:[%s6515_s18 + $0x2c8] sm:$0xff] }
  0x88   : > { %1328 = vmatprep.mubr.bf16.mxu1 %v739_v9  ;;  %v657_v9 = vld [vmem:[%s6515_s18 + $0xd0] sm:$0xff]  ;;  %v769_v58 = vpack.c.bf16 %v720_v54, %v720_v54  ;;  %v5612_v0 = vld [vmem:[%s8163_s3] sm:$0xff]  }
  0x89   : > { %v734_v13 = vpack.c.bf16 %v657_v9, %v650_v8  ;;  %v5613_v1 = vld [vmem:[%s8163_s3 + $0x8] sm:$0xff]   ;;  %v5614_v2 = vld [vmem:[%s8163_s3 + $0x10] sm:$0xff]   ;;  %v5620_v8 = vld [vmem:[%s8114_s5] sm:$0xff]  }
  0x8a   : > { %5001 = vmatpush3.bf16.msra.mxu0 %v5603_v12  ;;  %v726_v12 = vpack.c.bf16 %v642_v7, %v635_v6  ;;  %v5618_v6 = vld [vmem:[%s8163_s3 + $0x30] sm:$0xff]   ;;  %v5619_v7 = vld [vmem:[%s8163_s3 + $0x38] sm:$0xff]  }
  0x8b   : > { %5002 = vmatprep.subr.bf16.mxu0 %v5604_v21 }
  0x8d   : > { %1241 = vmatmul.mubr.bf16.gmra.mrb[8].mxu0 %v736_v11  ;;  %v644_v11 = vld [vmem:[%s6515_s18 + $0x68] sm:$0xff] }
  0x8e   : > { %1248 = vmatprep.mubr.bf16.mxu0 %v744_v15  ;;  %5003 = vmatpush3.bf16.msra.mxu0 %v5605_v23  ;;  %v728_v14 = vpack.c.bf16 %v644_v11, %v637_v10  ;;  %v649_v15 = vld [vmem:[%s6515_s18 + $0x90] sm:$0xff]  ;;  %v6825_v10 = vld [vmem:[%s8164_s25] ss:$0 sm:$0xff] }
  0x8f   : > { %1329 = vmatmul.mubr.bf16.gmra.mrb[8].mxu1 %v738_v18  ;;  %5004 = vmatprep.subr.bf16.mxu0 %v5606_v32  ;;  %v671_v18 = vld [vmem:[%s6515_s18 + $0x140] sm:$0xff]  ;;  %v733_v21 = vpack.c.bf16 %v656_v16, %v649_v15 }
  0x90   : > { %1336 = vmatprep.mubr.bf16.mxu1 %v746_v20  ;;  %v658_v20 = vld [vmem:[%s6515_s18 + $0xd8] sm:$0xff]  ;;  %v741_v22 = vpack.c.bf16 %v671_v18, %v664_v17 }
  0x91   : > { %v735_v23 = vpack.c.bf16 %v658_v20, %v651_v19 }
  0x92   : > { %5005 = vmatpush3.bf16.msra.mxu0 %v5607_v33  ;;  %v677_v33 = vld [vmem:[%s6515_s18 + $0x170] sm:$0xff] }
  0x93   : > { %5006 = vmatprep.subr.bf16.mxu0 %v5608_v40  ;;  %v755_v40 = vpack.c.bf16 %v699_v36, %v692_v35 }
  0x95   : > { %1249 = vmatmul.mubr.bf16.gmra.mrb[12].mxu0 %v743_v29  ;;  %v672_v29 = vld [vmem:[%s6515_s18 + $0x148] sm:$0xff] }
  0x96   : > { %1256 = vmatprep.mubr.bf16.mxu0 %v751_v31  ;;  %5007 = vmatpush3.bf16.msra.mxu0 %v5609_v41  ;;  %v748_v31 = vpack.c.bf16 %v685_v27, %v678_v26  ;;  %v742_v32 = vpack.c.bf16 %v672_v29, %v665_v28 }
  0x97   : > { %1337 = vmatmul.mubr.bf16.gmra.mrb[12].mxu1 %v745_v34  ;;  %5008 = vmatprep.subr.bf16.mxu0 %v5610_v47  ;;  %v684_v34 = vld [vmem:[%s6515_s18 + $0x1a8] sm:$0xff]  ;;  %v693_v47 = vld [vmem:[%s6515_s18 + $0x1f0] sm:$0xff] }
  0x98   : > { %1344 = vmatprep.mubr.bf16.mxu1 %v753_v37  ;;  %v679_v37 = vld [vmem:[%s6515_s18 + $0x180] sm:$0xff]  ;;  %v747_v39 = vpack.c.bf16 %v684_v34, %v677_v33 }
  0x99   : > { %v749_v41 = vpack.c.bf16 %v686_v38, %v679_v37 }
  0x9a   : > { %5009 = vmatpush3.bf16.msra.mxu0 %v5611_v50 }
  0x9b   : > { %5195 = vmatprep.subr.bf16.mxu0 %v6307_v43 }
  0x9d   : > { %1257 = vmatmul.mubr.bf16.gmra.mrb[16].mxu0 %v750_v46  ;;  %v713_v46 = vld [vmem:[%s6515_s18 + $0x290] sm:$0xff] }
  0x9e   : > { %1264 = vmatprep.mubr.bf16.mxu0 %v758_v48  ;;  %v700_v48 = vld [vmem:[%s6515_s18 + $0x228] sm:$0xff]  ;;  %v762_v50 = vpack.c.bf16 %v713_v46, %v706_v45 }
  0x9f   : > { %1345 = vmatmul.mubr.bf16.gmra.mrb[16].mxu1 %v752_v51  ;;  %v756_v51 = vpack.c.bf16 %v700_v48, %v693_v47 }
  0xa0   : > { %1352 = vmatprep.mubr.bf16.mxu1 %v760_v52  ;;  %v705_v52 = vld [vmem:[%s6515_s18 + $0x250] sm:$0xff] }
  0xa1   : > { %v761_v57 = vpack.c.bf16 %v712_v53, %v705_v52 }
  0xa5   : > { %1265 = vmatmul.mubr.bf16.gmra.mrb[20].mxu0 %v757_v56  ;;  %v714_v56 = vld [vmem:[%s6515_s18 + $0x298] sm:$0xff] }
  0xa6   : > { %1272 = vmatprep.mubr.bf16.mxu0 %v765_v59  ;;  %v763_v59 = vpack.c.bf16 %v714_v56, %v707_v55 }
  0xa7   : > { %1353 = vmatmul.mubr.bf16.gmra.mrb[20].mxu1 %v759_v61  ;;  %v768_v61 = vpack.c.bf16 %v719_v60, %v719_v60 }
  0xa8   : > { %1360 = vmatprep.mubr.bf16.mxu1 %v767_v62  ;;  %v721_v62 = vld [vmem:[%s6515_s18 + $0x2d0] sm:$0xff] }
  0xa9   : > { %v770_v63 = vpack.c.bf16 %v721_v62, %v721_v62 }
  0xad   : > { %1273 = vmatmul.mubr.bf16.gmra.mrb[24].mxu0 %v764_v3  ;;  %v5615_v3 = vld [vmem:[%s8163_s3 + $0x18] sm:$0xff]  }
  0xae   : > { %1400 = vmatprep.mubr.bf16.mxu0 %v727_v4  ;;  %v5616_v4 = vld [vmem:[%s8163_s3 + $0x20] sm:$0xff]  }
  0xaf   : > { %1361 = vmatmul.mubr.bf16.gmra.mrb[24].mxu1 %v766_v5  ;;  %v5617_v5 = vld [vmem:[%s8163_s3 + $0x28] sm:$0xff]  }
  0xb0   : > { %5167 = vmatprep.mubr.msk.bf16.mxu1 %vm6308_vm1, %v6307_v43 }
  0xb5   : > { %1401 = vmatmul.mubr.bf16.vlgmr.msra.gmra.mrb[28].mxu0 %v726_v12  ;;  %v5621_v12 = vld [vmem:[%s8114_s5 + $0x8] sm:$0xff]  }
  0xb6   : > { %1408 = vmatprep.mubr.bf16.mxu0 %v734_v13  ;;  %5196 = vmatpush3.bf16.msra.mxu0 %v5612_v0 }
  0xb7   : > { %5168 = vmatmul.mubr.msk.bf16.vlgmr.msra.gmra.mrb[28].mxu1 %vm1170_vm0, %v728_v14  ;;  %5197 = vmatprep.subr.bf16.mxu0 %v6307_v43 }
  0xb8   : > { %5171 = vmatprep.mubr.msk.bf16.mxu1 %vm6308_vm1, %v6307_v43  ;;  %5240 = vmatpush3.bf16.msra.mxu1 %v5620_v8 }
  0xb9   : > { %5241 = vmatprep.subr.bf16.mxu1 %v6307_v43 }
  0xba   : > { %5198 = vmatpush3.bf16.msra.mxu0 %v5613_v1 }
  0xbb   : > { %5199 = vmatprep.subr.bf16.mxu0 %v6307_v43 }
  0xbc   : > { %5242 = vmatpush3.bf16.msra.mxu1 %v5621_v12 }
  0xbd   : > { %1409 = vmatmul.mubr.bf16.gmra.mrb[32].mxu0 %v733_v21  ;;  %5243 = vmatprep.subr.bf16.mxu1 %v6307_v43 }
  0xbe   : > { %1416 = vmatprep.mubr.bf16.mxu0 %v741_v22  ;;  %5200 = vmatpush3.bf16.msra.mxu0 %v5614_v2  ;;  %v5622_v22 = vld [vmem:[%s8114_s5 + $0x10] sm:$0xff]  }
  0xbf   : > { %5172 = vmatmul.mubr.msk.bf16.gmra.mrb[32].mxu1 %vm1170_vm0, %v735_v23  ;;  %5201 = vmatprep.subr.bf16.mxu0 %v6307_v43 }
  0xc0   : > { %5175 = vmatprep.mubr.msk.bf16.mxu1 %vm6308_vm1, %v6307_v43  ;;  %5244 = vmatpush3.bf16.msra.mxu1 %v5622_v22 }
  0xc1   : > { %5245 = vmatprep.subr.bf16.mxu1 %v6307_v43 }
  0xc2   : > { %5202 = vmatpush3.bf16.msra.mxu0 %v5615_v3 }
  0xc3   : > { %5203 = vmatprep.subr.bf16.mxu0 %v6307_v43 }
  0xc5   : > { %1417 = vmatmul.mubr.bf16.gmra.mrb[36].mxu0 %v740_v30  ;;  %v5623_v30 = vld [vmem:[%s8114_s5 + $0x18] sm:$0xff]  }
  0xc6   : > { %1424 = vmatprep.mubr.bf16.mxu0 %v748_v31  ;;  %5204 = vmatpush3.bf16.msra.mxu0 %v5616_v4 }
  0xc7   : > { %5176 = vmatmul.mubr.msk.bf16.gmra.mrb[36].mxu1 %vm1170_vm0, %v742_v32  ;;  %5205 = vmatprep.subr.bf16.mxu0 %v6307_v43 }
  0xc8   : > { %5179 = vmatprep.mubr.msk.bf16.mxu1 %vm6308_vm1, %v6307_v43  ;;  %5246 = vmatpush3.bf16.msra.mxu1 %v5623_v30 }
  0xc9   : > { %5247 = vmatprep.subr.bf16.mxu1 %v6307_v43 }
  0xca   : > { %5206 = vmatpush3.bf16.msra.mxu0 %v5617_v5 }
  0xcb   : > { %5207 = vmatprep.subr.bf16.mxu0 %v6307_v43 }
  0xcd   : > { %1425 = vmatmul.mubr.bf16.gmra.mrb[40].mxu0 %v747_v39 }
  0xce   : > { %1432 = vmatprep.mubr.bf16.mxu0 %v755_v40  ;;  %5208 = vmatpush3.bf16.msra.mxu0 %v5618_v6  ;;  %v5624_v40 = vld [vmem:[%s8114_s5 + $0x20] sm:$0xff]  }
  0xcf   : > { %5180 = vmatmul.mubr.msk.bf16.gmra.mrb[40].mxu1 %vm1170_vm0, %v749_v41  ;;  %5209 = vmatprep.subr.bf16.mxu0 %v6307_v43 }
  0xd0   : > { %5183 = vmatprep.mubr.msk.bf16.mxu1 %vm6308_vm1, %v6307_v43  ;;  %5248 = vmatpush3.bf16.msra.mxu1 %v5624_v40 }
  0xd1   : > { %5249 = vmatprep.subr.bf16.mxu1 %v6307_v43 }
  0xd2   : > { %5210 = vmatpush3.bf16.msra.mxu0 %v5619_v7 }
  0xd3   : > { %5283 = vmatprep.subr.bf16.mxu0 %v6307_v43 }
  0xd5   : > { %1433 = vmatmul.mubr.bf16.gmra.mrb[44].mxu0 %v754_v49  ;;  %v5625_v49 = vld [vmem:[%s8114_s5 + $0x28] sm:$0xff]  }
  0xd6   : > { %1440 = vmatprep.mubr.bf16.mxu0 %v762_v50  ;;  %5250 = vmatpush3.bf16.msra.mxu1 %v5625_v49 }
  0xd7   : > { %5184 = vmatmul.mubr.msk.bf16.gmra.mrb[44].mxu1 %vm1170_vm0, %v756_v51  ;;  %5251 = vmatprep.subr.bf16.mxu1 %v6307_v43 }
  0xd8   : > { %5187 = vmatprep.mubr.msk.bf16.mxu1 %vm6308_vm1, %v6307_v43 }
  0xdd   : > { %1441 = vmatmul.mubr.bf16.gmra.mrb[48].mxu0 %v761_v57 }
  0xde   : > { %1448 = vmatprep.mubr.bf16.mxu0 %v769_v58 }
  0xdf   : > { %5188 = vmatmul.mubr.msk.bf16.gmra.mrb[48].mxu1 %vm1170_vm0, %v763_v59 }
  0xe0   : > { %5191 = vmatprep.mubr.msk.bf16.mxu1 %vm6308_vm1, %v6307_v43 }
  0xe5   : > { %1449 = vmatmul.mubr.bf16.gmra.mrb[52].mxu0 %v768_v61 }
  0xe6   : > { %5211 = vmatprep.mubr.msk.bf16.mxu0 %vm6308_vm1, %v6307_v43 }
  0xe7   : > { %5192 = vmatmul.mubr.msk.bf16.gmra.mrb[52].mxu1 %vm1170_vm0, %v770_v63 }
  0xe8   : > { %5255 = vmatprep.mubr.msk.bf16.mxu1 %vm6308_vm1, %v6307_v43 }
 0x150   : > { %v4894_v9 = vpop.f32.mrb[0].mxu0 }
 0x151   : > { %v4895_v11 = vpop.f32.mrb[1].mxu0 }
 0x152   : > { %v4896_v13 = vadd.f32 %v4895_v11, %v4894_v9  ;;  %v4897_v14 = vpop.f32.mrb[2].mxu0  ;;  %v4952_v15 = vpop.f32.mrb[0].mxu1 }
 0x153   : > { %v4898_v16 = vpop.f32.mrb[3].mxu0  ;;  %v4953_v19 = vpop.f32.mrb[1].mxu1 }
 0x154   : > { %v1227_v17 = vadd.f32 %v4896_v13, %v6825_v10  ;;  %v4899_v18 = vadd.f32 %v4898_v16, %v4897_v14  ;;  %v4954_v20 = vadd.f32 %v4953_v19, %v4952_v15  ;;  %v4955_v21 = vpop.f32.mrb[2].mxu1 }
 0x155   : > { %v4956_v24 = vpop.f32.mrb[3].mxu1 }
 0x156   : > { %v1230_v23 = vadd.f32 %v4899_v18, %v6825_v10  ;;  %v6837_v25 = vadd.f32 %v4954_v20, %v1227_v17  ;;  %v4957_v26 = vadd.f32 %v4956_v24, %v4955_v21 }
 0x158   : > { %v4900_v27 = vpop.f32.mrb[4].mxu0  ;;  %v6839_v28 = vadd.f32 %v4957_v26, %v1230_v23 }
 0x159   : > { %v4901_v29 = vpop.f32.mrb[5].mxu0 }
 0x15a   : > { %v4902_v31 = vadd.f32 %v4901_v29, %v4900_v27  ;;  %v4903_v32 = vpop.f32.mrb[6].mxu0  ;;  %v4958_v33 = vpop.f32.mrb[4].mxu1 }
 0x15b   : > { %v4904_v34 = vpop.f32.mrb[7].mxu0  ;;  %v4959_v37 = vpop.f32.mrb[5].mxu1 }
 0x15c   : > { %v1235_v35 = vadd.f32 %v4902_v31, %v6825_v10  ;;  %v4905_v36 = vadd.f32 %v4904_v34, %v4903_v32  ;;  %v4960_v38 = vadd.f32 %v4959_v37, %v4958_v33  ;;  %v4961_v39 = vpop.f32.mrb[6].mxu1 }
 0x15d   : > { %v4962_v42 = vpop.f32.mrb[7].mxu1 }
 0x15e   : > { %v1238_v41 = vadd.f32 %v4905_v36, %v6825_v10  ;;  %v6851_v44 = vadd.f32 %v4960_v38, %v1235_v35  ;;  %v4963_v45 = vadd.f32 %v4962_v42, %v4961_v39 }
 0x160   : > { %v4906_v46 = vpop.f32.mrb[8].mxu0  ;;  %v6853_v47 = vadd.f32 %v4963_v45, %v1238_v41 }
 0x161   : > { %v4907_v48 = vpop.f32.mrb[9].mxu0 }
 0x162   : > { %v4908_v50 = vadd.f32 %v4907_v48, %v4906_v46  ;;  %v4909_v51 = vpop.f32.mrb[10].mxu0  ;;  %v4964_v52 = vpop.f32.mrb[8].mxu1 }
 0x163   : > { %v4910_v53 = vpop.f32.mrb[11].mxu0  ;;  %v4965_v56 = vpop.f32.mrb[9].mxu1 }
 0x164   : > { %v1243_v54 = vadd.f32 %v4908_v50, %v6825_v10  ;;  %v4911_v55 = vadd.f32 %v4910_v53, %v4909_v51  ;;  %v4966_v57 = vadd.f32 %v4965_v56, %v4964_v52  ;;  %v4967_v58 = vpop.f32.mrb[10].mxu1 }
 0x165   : > { %v4968_v60 = vpop.f32.mrb[11].mxu1 }
 0x166   : > { %v1246_v59 = vadd.f32 %v4911_v55, %v6825_v10  ;;  %v6862_v61 = vadd.f32 %v4966_v57, %v1243_v54  ;;  %v4969_v62 = vadd.f32 %v4968_v60, %v4967_v58 }
 0x168   : > { %v4912_v63 = vpop.f32.mrb[12].mxu0  ;;  %v6864_v0 = vadd.f32 %v4969_v62, %v1246_v59 }
 0x169   : > { %v4913_v1 = vpop.f32.mrb[13].mxu0 }
 0x16a   : > { %v4914_v2 = vadd.f32 %v4913_v1, %v4912_v63  ;;  %v4915_v3 = vpop.f32.mrb[14].mxu0  ;;  %v4970_v4 = vpop.f32.mrb[12].mxu1 }
 0x16b   : > { %v4916_v5 = vpop.f32.mrb[15].mxu0  ;;  %v4971_v8 = vpop.f32.mrb[13].mxu1 }
 0x16c   : > { %v1251_v6 = vadd.f32 %v4914_v2, %v6825_v10  ;;  %v4917_v7 = vadd.f32 %v4916_v5, %v4915_v3  ;;  %v4972_v9 = vadd.f32 %v4971_v8, %v4970_v4  ;;  %v4973_v11 = vpop.f32.mrb[14].mxu1 }
 0x16d   : > { %v4974_v13 = vpop.f32.mrb[15].mxu1 }
 0x16e   : > { %v1254_v12 = vadd.f32 %v4917_v7, %v6825_v10  ;;  %v6868_v14 = vadd.f32 %v4972_v9, %v1251_v6  ;;  %v4975_v15 = vadd.f32 %v4974_v13, %v4973_v11 }
 0x170   : > { %v4918_v16 = vpop.f32.mrb[16].mxu0  ;;  %v6870_v17 = vadd.f32 %v4975_v15, %v1254_v12 }
 0x171   : > { %v4919_v18 = vpop.f32.mrb[17].mxu0 }
 0x172   : > { %v4920_v19 = vadd.f32 %v4919_v18, %v4918_v16  ;;  %v4921_v20 = vpop.f32.mrb[18].mxu0  ;;  %v4976_v21 = vpop.f32.mrb[16].mxu1 }
 0x173   : > { %v4922_v22 = vpop.f32.mrb[19].mxu0  ;;  %v4977_v26 = vpop.f32.mrb[17].mxu1 }
 0x174   : > { %v1259_v23 = vadd.f32 %v4920_v19, %v6825_v10  ;;  %v4923_v24 = vadd.f32 %v4922_v22, %v4921_v20  ;;  %v4978_v27 = vadd.f32 %v4977_v26, %v4976_v21  ;;  %v4979_v29 = vpop.f32.mrb[18].mxu1 }
 0x175   : > { %v4980_v31 = vpop.f32.mrb[19].mxu1 }
 0x176   : > { %v1262_v30 = vadd.f32 %v4923_v24, %v6825_v10  ;;  %v6874_v32 = vadd.f32 %v4978_v27, %v1259_v23  ;;  %v4981_v33 = vadd.f32 %v4980_v31, %v4979_v29 }
 0x178   : > { %v4924_v34 = vpop.f32.mrb[20].mxu0  ;;  %v6876_v35 = vadd.f32 %v4981_v33, %v1262_v30 }
 0x179   : > { %v4925_v36 = vpop.f32.mrb[21].mxu0 }
 0x17a   : > { %v4926_v37 = vadd.f32 %v4925_v36, %v4924_v34  ;;  %v4927_v38 = vpop.f32.mrb[22].mxu0  ;;  %v4982_v39 = vpop.f32.mrb[20].mxu1 }
 0x17b   : > { %v4928_v40 = vpop.f32.mrb[23].mxu0  ;;  %v4983_v45 = vpop.f32.mrb[21].mxu1 }
 0x17c   : > { %v1267_v41 = vadd.f32 %v4926_v37, %v6825_v10  ;;  %v4929_v42 = vadd.f32 %v4928_v40, %v4927_v38  ;;  %v4984_v46 = vadd.f32 %v4983_v45, %v4982_v39  ;;  %v4985_v48 = vpop.f32.mrb[22].mxu1 }
 0x17d   : > { %v4986_v50 = vpop.f32.mrb[23].mxu1 }
 0x17e   : > { %v1270_v49 = vadd.f32 %v4929_v42, %v6825_v10  ;;  %v6880_v51 = vadd.f32 %v4984_v46, %v1267_v41  ;;  %v4987_v52 = vadd.f32 %v4986_v50, %v4985_v48 }
 0x180   : > { %v4930_v53 = vpop.f32.mrb[24].mxu0  ;;  %v6882_v54 = vadd.f32 %v4987_v52, %v1270_v49 }
 0x181   : > { %v4931_v55 = vpop.f32.mrb[25].mxu0 }
 0x182   : > { %v4932_v56 = vadd.f32 %v4931_v55, %v4930_v53  ;;  %v4933_v57 = vpop.f32.mrb[26].mxu0  ;;  %v4988_v58 = vpop.f32.mrb[24].mxu1 }
 0x183   : > { %v4934_v59 = vpop.f32.mrb[27].mxu0  ;;  %v4989_v62 = vpop.f32.mrb[25].mxu1 }
 0x184   : > { %v1275_v60 = vadd.f32 %v4932_v56, %v6825_v10  ;;  %v4990_v63 = vadd.f32 %v4989_v62, %v4988_v58  ;;  %v4991_v1 = vpop.f32.mrb[26].mxu1 }
 0x185   : > { %v4992_v2 = vpop.f32.mrb[27].mxu1 }
 0x186   : > { %v6885_v3 = vadd.f32 %v4990_v63, %v1275_v60 }
 0x188   : > { %v5010_v4 = vpop.f32.mrb[28].mxu0 }
 0x189   : > { %v5011_v5 = vpop.f32.mrb[29].mxu0 }
 0x18a   : > { %v5012_v6 = vadd.f32 %v5011_v5, %v5010_v4  ;;  %v5013_v7 = vpop.f32.mrb[30].mxu0  ;;  %v1490_v9 = vpop.f32.mrb[28].mxu1 }
 0x18b   : > { %v5014_v8 = vpop.f32.mrb[31].mxu0  ;;  %v5169_v13 = vpop.f32.mrb[29].mxu1 }
 0x18c   : > { %v5015_v11 = vadd.f32 %v5014_v8, %v5013_v7  ;;  %v1403_v12 = vadd.f32 %v5012_v6, %v6837_v25  ;;  %v1493_v15 = vpop.f32.mrb[30].mxu1 }
 0x18d   : > { %v5170_v18 = vpop.f32.mrb[31].mxu1 }
 0x18e   : > { %v1491_v16 = vadd.f32 %v1490_v9, %v1403_v12  ;;  %v1406_v10 = vadd.f32 %v5015_v11, %v6839_v28 }
 0x190   : > { %v1494_v19 = vadd.f32 %v1493_v15, %v1406_v10  ;;  %v5016_v20 = vpop.f32.mrb[32].mxu0  ;;  %5740 = vtanh.f32 %v1491_v16 }
 0x191   : > { %v5017_v21 = vpop.f32.mrb[33].mxu0 }
 0x192   : > { %5742 = vtanh.f32 %v1494_v19  ;;  %v5018_v22 = vadd.f32 %v5017_v21, %v5016_v20  ;;  %v5019_v23 = vpop.f32.mrb[34].mxu0  ;;  %v1498_v26 = vpop.f32.mrb[32].mxu1 }
 0x193   : > { %v5020_v24 = vpop.f32.mrb[35].mxu0  ;;  %v5173_v30 = vpop.f32.mrb[33].mxu1 }
 0x194   : > { %v5021_v27 = vadd.f32 %v5020_v24, %v5019_v23  ;;  %v1411_v29 = vadd.f32 %v5018_v22, %v6851_v44  ;;  %v1501_v25 = vpop.f32.mrb[34].mxu1 }
 0x195   : > { %v5174_v34 = vpop.f32.mrb[35].mxu1 }
 0x196   : > { %v1499_v31 = vadd.f32 %v1498_v26, %v1411_v29  ;;  %v1414_v33 = vadd.f32 %v5021_v27, %v6853_v47 }
 0x198   : > { %v1502_v28 = vadd.f32 %v1501_v25, %v1414_v33  ;;  %v5022_v36 = vpop.f32.mrb[36].mxu0  ;;  %5744 = vtanh.f32 %v1499_v31 }
 0x199   : > { %v5023_v37 = vpop.f32.mrb[37].mxu0 }
 0x19a   : > { %5746 = vtanh.f32 %v1502_v28  ;;  %v5024_v38 = vadd.f32 %v5023_v37, %v5022_v36  ;;  %v5025_v39 = vpop.f32.mrb[38].mxu0  ;;  %v5741_v40 = vpop.eup %5740 }
 0x19b   : > { %v5026_v41 = vpop.f32.mrb[39].mxu0  ;;  %v1506_v42 = vpop.f32.mrb[36].mxu1 }
 0x19c   : > { %v5743_v45 = vpop.eup %5742  ;;  %v5027_v46 = vadd.f32 %v5026_v41, %v5025_v39  ;;  %v1419_v44 = vadd.f32 %v5024_v38, %v6862_v61  ;;  %v5177_v48 = vpop.f32.mrb[37].mxu1 }
 0x19d   : > { %v1509_v49 = vpop.f32.mrb[38].mxu1  ;;  %v1557_v50 = vpack.c.bf16 %v5743_v45, %v5741_v40 }
 0x19e   : > { %v1507_v52 = vadd.f32 %v1506_v42, %v1419_v44  ;;  %v1422_v47 = vadd.f32 %v5027_v46, %v6864_v0  ;;  %v5178_v53 = vpop.f32.mrb[39].mxu1 }
 0x19f   : > { %5212 = vmatmul.mubr.bf16.vlgmr.msra.gmra.mrb[56].mxu0 %v1557_v50 }
 0x1a0   : > { %v1510_v55 = vadd.f32 %v1509_v49, %v1422_v47  ;;  %v5028_v56 = vpop.f32.mrb[40].mxu0  ;;  %5215 = vmatprep.mubr.msk.bf16.mxu0 %vm6308_vm1, %v6307_v43  ;;  %5748 = vtanh.f32 %v1507_v52 }
 0x1a1   : > { %v5029_v57 = vpop.f32.mrb[41].mxu0 }
 0x1a2   : > { %5750 = vtanh.f32 %v1510_v55  ;;  %v5030_v58 = vadd.f32 %v5029_v57, %v5028_v56  ;;  %v5031_v59 = vpop.f32.mrb[42].mxu0  ;;  %v5745_v60 = vpop.eup %5744 }
 0x1a3   : > { %v5032_v61 = vpop.f32.mrb[43].mxu0  ;;  %v1514_v62 = vpop.f32.mrb[40].mxu1 }
 0x1a4   : > { %v5747_v63 = vpop.eup %5746  ;;  %v5033_v1 = vadd.f32 %v5032_v61, %v5031_v59  ;;  %v1427_v2 = vadd.f32 %v5030_v58, %v6868_v14  ;;  %v5181_v0 = vpop.f32.mrb[41].mxu1 }
 0x1a5   : > { %v1517_v4 = vpop.f32.mrb[42].mxu1  ;;  %v1558_v5 = vpack.c.bf16 %v5747_v63, %v5745_v60  ;;  %v5629_v0 = vld [vmem:[%s8116_s7 + $0x8] sm:$0xff]  }
 0x1a6   : > { %v1515_v6 = vadd.f32 %v1514_v62, %v1427_v2  ;;  %v1430_v7 = vadd.f32 %v5033_v1, %v6870_v17  ;;  %v5182_v8 = vpop.f32.mrb[43].mxu1  ;;  %v5627_v1 = vld [vmem:[%s8114_s5 + $0x38] sm:$0xff]   ;;  %v5628_v2 = vld [vmem:[%s8116_s7] sm:$0xff]  }
 0x1a7   : > { %5216 = vmatmul.mubr.bf16.gmra.mrb[60].mxu0 %v1558_v5  ;;  %v5631_v5 = vld [vmem:[%s8116_s7 + $0x18] sm:$0xff]   ;;  %v6949_v8 = vld [vmem:[%s8113_s4] ss:$0 sm:$0xff] }
 0x1a8   : > { %v1518_v9 = vadd.f32 %v1517_v4, %v1430_v7  ;;  %v5034_v11 = vpop.f32.mrb[44].mxu0  ;;  %5219 = vmatprep.mubr.msk.bf16.mxu0 %vm6308_vm1, %v6307_v43  ;;  %5752 = vtanh.f32 %v1515_v6  ;;  %5284 = vmatpush3.bf16.msra.mxu0 %v5628_v2  ;;  %v5630_v4 = vld [vmem:[%s8116_s7 + $0x10] sm:$0xff]   ;;  %v5632_v6 = vld [vmem:[%s8116_s7 + $0x20] sm:$0xff]   ;;  %v5633_v7 = vld [vmem:[%s8116_s7 + $0x28] sm:$0xff]  }
 0x1a9   : > { %v5035_v12 = vpop.f32.mrb[45].mxu0  ;;  %5285 = vmatprep.subr.bf16.mxu0 %v6307_v43 }
 0x1aa   : > { %5754 = vtanh.f32 %v1518_v9  ;;  %v5036_v13 = vadd.f32 %v5035_v12, %v5034_v11  ;;  %v5037_v15 = vpop.f32.mrb[46].mxu0  ;;  %v5749_v16 = vpop.eup %5748 }
 0x1ab   : > { %v5038_v14 = vpop.f32.mrb[47].mxu0  ;;  %v1522_v10 = vpop.f32.mrb[44].mxu1 }
 0x1ac   : > { %v5751_v18 = vpop.eup %5750  ;;  %v5039_v19 = vadd.f32 %v5038_v14, %v5037_v15  ;;  %v1435_v20 = vadd.f32 %v5036_v13, %v6874_v32  ;;  %v5185_v17 = vpop.f32.mrb[45].mxu1  ;;  %5286 = vmatpush3.bf16.msra.mxu0 %v5629_v0 }
 0x1ad   : > { %v1525_v21 = vpop.f32.mrb[46].mxu1  ;;  %v1559_v22 = vpack.c.bf16 %v5751_v18, %v5749_v16  ;;  %5287 = vmatprep.subr.bf16.mxu0 %v6307_v43 }
 0x1ae   : > { %v1523_v23 = vadd.f32 %v1522_v10, %v1435_v20  ;;  %v1438_v24 = vadd.f32 %v5039_v19, %v6876_v35  ;;  %v5186_v26 = vpop.f32.mrb[47].mxu1 }
 0x1af   : > { %5220 = vmatmul.mubr.bf16.gmra.mrb[64].mxu0 %v1559_v22 }
 0x1b0   : > { %v1526_v27 = vadd.f32 %v1525_v21, %v1438_v24  ;;  %v5040_v29 = vpop.f32.mrb[48].mxu0  ;;  %5223 = vmatprep.mubr.msk.bf16.mxu0 %vm6308_vm1, %v6307_v43  ;;  %5756 = vtanh.f32 %v1523_v23  ;;  %5288 = vmatpush3.bf16.msra.mxu0 %v5630_v4 }
 0x1b1   : > { %v5041_v30 = vpop.f32.mrb[49].mxu0  ;;  %5289 = vmatprep.subr.bf16.mxu0 %v6307_v43 }
 0x1b2   : > { %5758 = vtanh.f32 %v1526_v27  ;;  %v5042_v25 = vadd.f32 %v5041_v30, %v5040_v29  ;;  %v5043_v31 = vpop.f32.mrb[50].mxu0  ;;  %v5753_v33 = vpop.eup %5752 }
 0x1b3   : > { %v5044_v32 = vpop.f32.mrb[51].mxu0  ;;  %v1530_v34 = vpop.f32.mrb[48].mxu1 }
 0x1b4   : > { %v5755_v28 = vpop.eup %5754  ;;  %v5045_v36 = vadd.f32 %v5044_v32, %v5043_v31  ;;  %v1443_v37 = vadd.f32 %v5042_v25, %v6880_v51  ;;  %v5189_v35 = vpop.f32.mrb[49].mxu1  ;;  %5290 = vmatpush3.bf16.msra.mxu0 %v5631_v5 }
 0x1b5   : > { %v1533_v38 = vpop.f32.mrb[50].mxu1  ;;  %v1560_v39 = vpack.c.bf16 %v5755_v28, %v5753_v33  ;;  %5291 = vmatprep.subr.bf16.mxu0 %v6307_v43 }
 0x1b6   : > { %v1531_v40 = vadd.f32 %v1530_v34, %v1443_v37  ;;  %v1446_v41 = vadd.f32 %v5045_v36, %v6882_v54  ;;  %v5190_v42 = vpop.f32.mrb[51].mxu1 }
 0x1b7   : > { %5224 = vmatmul.mubr.bf16.gmra.mrb[68].mxu0 %v1560_v39 }
 0x1b8   : > { %v1534_v45 = vadd.f32 %v1533_v38, %v1446_v41  ;;  %v5046_v46 = vpop.f32.mrb[52].mxu0  ;;  %5227 = vmatprep.mubr.msk.bf16.mxu0 %vm6308_vm1, %v6307_v43  ;;  %5760 = vtanh.f32 %v1531_v40  ;;  %5292 = vmatpush3.bf16.msra.mxu0 %v5632_v6 }
 0x1b9   : > { %v5047_v44 = vpop.f32.mrb[53].mxu0  ;;  %5293 = vmatprep.subr.bf16.mxu0 %v6307_v43 }
 0x1ba   : > { %5762 = vtanh.f32 %v1534_v45  ;;  %v5048_v48 = vadd.f32 %v5047_v44, %v5046_v46  ;;  %v5049_v49 = vpop.f32.mrb[54].mxu0  ;;  %v5757_v50 = vpop.eup %5756 }
 0x1bb   : > { %v1538_v51 = vpop.f32.mrb[52].mxu1  ;;  %v5050_v52 = vpop.f32.mrb[55].mxu0 }
 0x1bc   : > { %v5759_v47 = vpop.eup %5758  ;;  %v1451_v53 = vadd.f32 %v5048_v48, %v6885_v3  ;;  %v5193_v55 = vpop.f32.mrb[53].mxu1  ;;  %v5626_v3 = vld [vmem:[%s8114_s5 + $0x30] sm:$0xff]   ;;  %5294 = vmatpush3.bf16.msra.mxu0 %v5633_v7 }
 0x1bd   : > { %v1561_v54 = vpack.c.bf16 %v5759_v47, %v5757_v50  ;;  %v1541_v56 = vpop.f32.mrb[54].mxu1  ;;  %5252 = vmatpush3.bf16.msra.mxu1 %v5626_v3  ;;  %5295 = vmatprep.subr.bf16.mxu0 %v6307_v43  ;;  %v5634_v7 = vld [vmem:[%s8116_s7 + $0x30] sm:$0xff]  }
 0x1be   : > { %v1539_v57 = vadd.f32 %v1538_v51, %v1451_v53  ;;  %v5194_v58 = vpop.f32.mrb[55].mxu1  ;;  %5253 = vmatprep.subr.bf16.mxu1 %v6307_v43 }
 0x1bf   : > { %5228 = vmatmul.mubr.bf16.gmra.mrb[72].mxu0 %v1561_v54 }
 0x1c0   : > { %5764 = vtanh.f32 %v1539_v57  ;;  %5231 = vmatprep.mubr.msk.bf16.mxu0 %vm6308_vm1, %v6307_v43  ;;  %5296 = vmatpush3.bf16.msra.mxu0 %v5634_v7 }
 0x1c1   : > { %5254 = vmatpush3.bf16.msra.mxu1 %v5627_v1  ;;  %5297 = vmatprep.subr.bf16.mxu0 %v6307_v43 }
 0x1c2   : > { %v5761_v59 = vpop.eup %5760  ;;  %5327 = vmatprep.subr.bf16.mxu1 %v6307_v43 }
 0x1c4   : > { %v5763_v60 = vpop.eup %5762 }
 0x1c5   : > { %v1562_v61 = vpack.c.bf16 %v5763_v60, %v5761_v59 }
 0x1c7   : > { %5232 = vmatmul.mubr.bf16.gmra.mrb[76].mxu0 %v1562_v61 }
 0x1c8   : > { %5235 = vmatprep.mubr.msk.bf16.mxu0 %vm6308_vm1, %v6307_v43 }
 0x1ca   : > { %v5765_v62 = vpop.eup %5764 }
 0x1cb   : > { %v1563_v63 = vpack.c.bf16 %v5765_v62, %v5765_v62 }
 0x1cf   : > { %5236 = vmatmul.mubr.bf16.gmra.mrb[80].mxu0 %v1563_v63 }
 0x1d0   : > { %5299 = vmatprep.mubr.msk.bf16.mxu0 %vm6308_vm1, %v6307_v43 }
 0x272   : > { %v1669_v9 = vpop.f32.mrb[56].mxu0 }
 0x273   : > { %v1670_v11 = vadd.f32 %v6949_v8, %v1669_v9  ;;  %v5213_v12 = vpop.f32.mrb[57].mxu0  ;;  %v5636_v9 = vld [vmem:[%s8118_s9] sm:$0xff]  }
 0x274   : > { %v1672_v13 = vpop.f32.mrb[58].mxu0  ;;  %v5638_v12 = vld [vmem:[%s8118_s9 + $0x10] sm:$0xff]  }
 0x275   : > { %v1673_v15 = vadd.f32 %v6949_v8, %v1672_v13  ;;  %v5214_v16 = vpop.f32.mrb[59].mxu0  ;;  %5766 = vtanh.f32 %v1670_v11  ;;  %v5637_v11 = vld [vmem:[%s8118_s9 + $0x8] sm:$0xff]   ;;  %v5639_v13 = vld [vmem:[%s8118_s9 + $0x18] sm:$0xff]  }
 0x276   : > { %v5641_v16 = vld [vmem:[%s8118_s9 + $0x28] sm:$0xff]  }
 0x277   : > { %5768 = vtanh.f32 %v1673_v15  ;;  %v5640_v15 = vld [vmem:[%s8118_s9 + $0x20] sm:$0xff]  }
 0x27a   : > { %v1677_v14 = vpop.f32.mrb[60].mxu0 }
 0x27b   : > { %v1678_v10 = vadd.f32 %v6949_v8, %v1677_v14  ;;  %v5217_v18 = vpop.f32.mrb[61].mxu0  ;;  %v5642_v14 = vld [vmem:[%s8118_s9 + $0x30] sm:$0xff]  }
 0x27c   : > { %v1680_v19 = vpop.f32.mrb[62].mxu0 }
 0x27d   : > { %v1681_v20 = vadd.f32 %v6949_v8, %v1680_v19  ;;  %v5218_v17 = vpop.f32.mrb[63].mxu0  ;;  %5770 = vtanh.f32 %v1678_v10  ;;  %v7017_v10 = vld [vmem:[%s8115_s6] ss:$0 sm:$0xff] }
 0x27f   : > { %5772 = vtanh.f32 %v1681_v20  ;;  %v5767_v21 = vpop.eup %5766 }
 0x281   : > { %v5769_v22 = vpop.eup %5768 }
 0x282   : > { %v1685_v23 = vpop.f32.mrb[64].mxu0  ;;  %v1736_v24 = vpack.c.bf16 %v5769_v22, %v5767_v21 }
 0x283   : > { %v1686_v26 = vadd.f32 %v6949_v8, %v1685_v23  ;;  %v5221_v27 = vpop.f32.mrb[65].mxu0 }
 0x284   : > { %v1688_v29 = vpop.f32.mrb[66].mxu0  ;;  %5256 = vmatmul.mubr.bf16.vlgmr.msra.gmra.mrb[56].mxu1 %v1736_v24 }
 0x285   : > { %v1689_v30 = vadd.f32 %v6949_v8, %v1688_v29  ;;  %v5222_v25 = vpop.f32.mrb[67].mxu0  ;;  %5259 = vmatprep.mubr.msk.bf16.mxu1 %vm6308_vm1, %v6307_v43  ;;  %5774 = vtanh.f32 %v1686_v26  ;;  %5328 = vmatpush3.bf16.msra.mxu1 %v5636_v9 }
 0x286   : > { %5329 = vmatprep.subr.bf16.mxu1 %v6307_v43 }
 0x287   : > { %5776 = vtanh.f32 %v1689_v30  ;;  %v5771_v31 = vpop.eup %5770 }
 0x289   : > { %v5773_v33 = vpop.eup %5772  ;;  %5330 = vmatpush3.bf16.msra.mxu1 %v5637_v11 }
 0x28a   : > { %v1693_v32 = vpop.f32.mrb[68].mxu0  ;;  %v1737_v34 = vpack.c.bf16 %v5773_v33, %v5771_v31  ;;  %5331 = vmatprep.subr.bf16.mxu1 %v6307_v43 }
 0x28b   : > { %v1694_v28 = vadd.f32 %v6949_v8, %v1693_v32  ;;  %v5225_v36 = vpop.f32.mrb[69].mxu0 }
 0x28c   : > { %v1696_v37 = vpop.f32.mrb[70].mxu0  ;;  %5260 = vmatmul.mubr.bf16.gmra.mrb[60].mxu1 %v1737_v34 }
 0x28d   : > { %v1697_v35 = vadd.f32 %v6949_v8, %v1696_v37  ;;  %v5226_v38 = vpop.f32.mrb[71].mxu0  ;;  %5263 = vmatprep.mubr.msk.bf16.mxu1 %vm6308_vm1, %v6307_v43  ;;  %5778 = vtanh.f32 %v1694_v28  ;;  %5332 = vmatpush3.bf16.msra.mxu1 %v5638_v12 }
 0x28e   : > { %5333 = vmatprep.subr.bf16.mxu1 %v6307_v43 }
 0x28f   : > { %5780 = vtanh.f32 %v1697_v35  ;;  %v5775_v39 = vpop.eup %5774 }
 0x291   : > { %v5777_v40 = vpop.eup %5776  ;;  %5334 = vmatpush3.bf16.msra.mxu1 %v5639_v13 }
 0x292   : > { %v1701_v41 = vpop.f32.mrb[72].mxu0  ;;  %v1738_v42 = vpack.c.bf16 %v5777_v40, %v5775_v39  ;;  %5335 = vmatprep.subr.bf16.mxu1 %v6307_v43 }
 0x293   : > { %v1702_v45 = vadd.f32 %v6949_v8, %v1701_v41  ;;  %v5229_v46 = vpop.f32.mrb[73].mxu0 }
 0x294   : > { %v1704_v44 = vpop.f32.mrb[74].mxu0  ;;  %5264 = vmatmul.mubr.bf16.gmra.mrb[64].mxu1 %v1738_v42 }
 0x295   : > { %v1705_v48 = vadd.f32 %v6949_v8, %v1704_v44  ;;  %v5230_v49 = vpop.f32.mrb[75].mxu0  ;;  %5267 = vmatprep.mubr.msk.bf16.mxu1 %vm6308_vm1, %v6307_v43  ;;  %5782 = vtanh.f32 %v1702_v45  ;;  %5336 = vmatpush3.bf16.msra.mxu1 %v5640_v15 }
 0x296   : > { %5337 = vmatprep.subr.bf16.mxu1 %v6307_v43 }
 0x297   : > { %5784 = vtanh.f32 %v1705_v48  ;;  %v5779_v50 = vpop.eup %5778 }
 0x299   : > { %v5781_v51 = vpop.eup %5780  ;;  %5338 = vmatpush3.bf16.msra.mxu1 %v5641_v16 }
 0x29a   : > { %v1709_v52 = vpop.f32.mrb[76].mxu0  ;;  %v1739_v47 = vpack.c.bf16 %v5781_v51, %v5779_v50  ;;  %5339 = vmatprep.subr.bf16.mxu1 %v6307_v43 }
 0x29b   : > { %v1710_v53 = vadd.f32 %v6949_v8, %v1709_v52  ;;  %v5233_v55 = vpop.f32.mrb[77].mxu0 }
 0x29c   : > { %v1712_v54 = vpop.f32.mrb[78].mxu0  ;;  %5268 = vmatmul.mubr.bf16.gmra.mrb[68].mxu1 %v1739_v47 }
 0x29d   : > { %v1713_v56 = vadd.f32 %v6949_v8, %v1712_v54  ;;  %v5234_v57 = vpop.f32.mrb[79].mxu0  ;;  %5271 = vmatprep.mubr.msk.bf16.mxu1 %vm6308_vm1, %v6307_v43  ;;  %5786 = vtanh.f32 %v1710_v53  ;;  %5340 = vmatpush3.bf16.msra.mxu1 %v5642_v14  ;;  %v5643_v14 = vld [vmem:[%s8118_s9 + $0x38] sm:$0xff]  }
 0x29e   : > { %5341 = vmatprep.subr.bf16.mxu1 %v6307_v43 }
 0x29f   : > { %5788 = vtanh.f32 %v1713_v56  ;;  %v5783_v58 = vpop.eup %5782 }
 0x2a1   : > { %v5785_v59 = vpop.eup %5784  ;;  %5342 = vmatpush3.bf16.msra.mxu1 %v5643_v14  ;;  %v5657_v14 = vld [vmem:[%s8122_s13 + $0x28] sm:$0xff]  }
 0x2a2   : > { %v1717_v60 = vpop.f32.mrb[80].mxu0  ;;  %v1740_v61 = vpack.c.bf16 %v5785_v59, %v5783_v58  ;;  %5415 = vmatprep.subr.bf16.mxu1 %v6307_v43 }
 0x2a3   : > { %v1718_v62 = vadd.f32 %v6949_v8, %v1717_v60  ;;  %v5237_v63 = vpop.f32.mrb[81].mxu0  ;;  %v5635_v8 = vld [vmem:[%s8116_s7 + $0x38] sm:$0xff]  }
 0x2a4   : > { %v1720_v3 = vpop.f32.mrb[82].mxu0  ;;  %5272 = vmatmul.mubr.bf16.gmra.mrb[72].mxu1 %v1740_v61  ;;  %5298 = vmatpush3.bf16.msra.mxu0 %v5635_v8 }
 0x2a5   : > { %5790 = vtanh.f32 %v1718_v62  ;;  %v5238_v1 = vpop.f32.mrb[83].mxu0  ;;  %5275 = vmatprep.mubr.msk.bf16.mxu1 %vm6308_vm1, %v6307_v43  ;;  %5371 = vmatprep.subr.bf16.mxu0 %v6307_v43 }
 0x2a7   : > { %v5787_v2 = vpop.eup %5786 }
 0x2a9   : > { %v5789_v0 = vpop.eup %5788 }
 0x2aa   : > { %v1741_v4 = vpack.c.bf16 %v5789_v0, %v5787_v2 }
 0x2ac   : > { %5276 = vmatmul.mubr.bf16.gmra.mrb[76].mxu1 %v1741_v4 }
 0x2ad   : > { %5279 = vmatprep.mubr.msk.bf16.mxu1 %vm6308_vm1, %v6307_v43 }
 0x2af   : > { %v5791_v5 = vpop.eup %5790 }
 0x2b0   : > { %v1742_v6 = vpack.c.bf16 %v5791_v5, %v5791_v5 }
 0x2b4   : > { %5280 = vmatmul.mubr.bf16.gmra.mrb[80].mxu1 %v1742_v6 }
 0x2b5   : > { %5343 = vmatprep.mubr.msk.bf16.mxu1 %vm6308_vm1, %v6307_v43 }
 0x357   : > { %v1848_v18 = vpop.f32.mrb[56].mxu1 }
 0x358   : > { %v1849_v19 = vadd.f32 %v7017_v10, %v1848_v18  ;;  %v5257_v20 = vpop.f32.mrb[57].mxu1  ;;  %v5645_v18 = vld [vmem:[%s8120_s11 + $0x8] sm:$0xff]  }
 0x359   : > { %v1851_v17 = vpop.f32.mrb[58].mxu1  ;;  %v5647_v20 = vld [vmem:[%s8120_s11 + $0x18] sm:$0xff]  }
 0x35a   : > { %v1852_v21 = vadd.f32 %v7017_v10, %v1851_v17  ;;  %v5258_v22 = vpop.f32.mrb[59].mxu1  ;;  %5792 = vtanh.f32 %v1849_v19  ;;  %v5646_v19 = vld [vmem:[%s8120_s11 + $0x10] sm:$0xff]   ;;  %v5648_v17 = vld [vmem:[%s8120_s11 + $0x20] sm:$0xff]  }
 0x35b   : > { %v7077_v22 = vld [vmem:[%s8117_s8] ss:$0 sm:$0xff] }
 0x35c   : > { %5794 = vtanh.f32 %v1852_v21  ;;  %v5649_v21 = vld [vmem:[%s8120_s11 + $0x28] sm:$0xff]  }
 0x35f   : > { %v1856_v23 = vpop.f32.mrb[60].mxu1 }
 0x360   : > { %v1857_v24 = vadd.f32 %v7017_v10, %v1856_v23  ;;  %v5261_v26 = vpop.f32.mrb[61].mxu1 }
 0x361   : > { %v1859_v27 = vpop.f32.mrb[62].mxu1 }
 0x362   : > { %v1860_v29 = vadd.f32 %v7017_v10, %v1859_v27  ;;  %v5262_v30 = vpop.f32.mrb[63].mxu1  ;;  %5796 = vtanh.f32 %v1857_v24 }
 0x364   : > { %5798 = vtanh.f32 %v1860_v29  ;;  %v5793_v25 = vpop.eup %5792 }
 0x366   : > { %v5795_v31 = vpop.eup %5794 }
 0x367   : > { %v1864_v33 = vpop.f32.mrb[64].mxu1  ;;  %v1915_v32 = vpack.c.bf16 %v5795_v31, %v5793_v25 }
 0x368   : > { %v1865_v34 = vadd.f32 %v7017_v10, %v1864_v33  ;;  %v5265_v28 = vpop.f32.mrb[65].mxu1 }
 0x369   : > { %v1867_v36 = vpop.f32.mrb[66].mxu1  ;;  %5300 = vmatmul.mubr.bf16.vlgmr.msra.gmra.mrb[84].mxu0 %v1915_v32 }
 0x36a   : > { %v1868_v37 = vadd.f32 %v7017_v10, %v1867_v36  ;;  %v5266_v35 = vpop.f32.mrb[67].mxu1  ;;  %5303 = vmatprep.mubr.msk.bf16.mxu0 %vm6308_vm1, %v6307_v43  ;;  %5800 = vtanh.f32 %v1865_v34 }
 0x36c   : > { %5802 = vtanh.f32 %v1868_v37  ;;  %v5797_v38 = vpop.eup %5796 }
 0x36e   : > { %v5799_v39 = vpop.eup %5798 }
 0x36f   : > { %v1872_v40 = vpop.f32.mrb[68].mxu1  ;;  %v1916_v41 = vpack.c.bf16 %v5799_v39, %v5797_v38 }
 0x370   : > { %v1873_v42 = vadd.f32 %v7017_v10, %v1872_v40  ;;  %v5269_v45 = vpop.f32.mrb[69].mxu1 }
 0x371   : > { %v1875_v46 = vpop.f32.mrb[70].mxu1  ;;  %5304 = vmatmul.mubr.bf16.gmra.mrb[88].mxu0 %v1916_v41 }
 0x372   : > { %v1876_v44 = vadd.f32 %v7017_v10, %v1875_v46  ;;  %v5270_v48 = vpop.f32.mrb[71].mxu1  ;;  %5307 = vmatprep.mubr.msk.bf16.mxu0 %vm6308_vm1, %v6307_v43  ;;  %5804 = vtanh.f32 %v1873_v42 }
 0x374   : > { %5806 = vtanh.f32 %v1876_v44  ;;  %v5801_v49 = vpop.eup %5800 }
 0x376   : > { %v5803_v50 = vpop.eup %5802 }
 0x377   : > { %v1880_v51 = vpop.f32.mrb[72].mxu1  ;;  %v1917_v52 = vpack.c.bf16 %v5803_v50, %v5801_v49 }
 0x378   : > { %v1881_v47 = vadd.f32 %v7017_v10, %v1880_v51  ;;  %v5273_v53 = vpop.f32.mrb[73].mxu1 }
 0x379   : > { %v1883_v55 = vpop.f32.mrb[74].mxu1  ;;  %5308 = vmatmul.mubr.bf16.gmra.mrb[92].mxu0 %v1917_v52 }
 0x37a   : > { %v1884_v54 = vadd.f32 %v7017_v10, %v1883_v55  ;;  %v5274_v56 = vpop.f32.mrb[75].mxu1  ;;  %5311 = vmatprep.mubr.msk.bf16.mxu0 %vm6308_vm1, %v6307_v43  ;;  %5808 = vtanh.f32 %v1881_v47 }
 0x37c   : > { %5810 = vtanh.f32 %v1884_v54  ;;  %v5805_v57 = vpop.eup %5804 }
 0x37e   : > { %v5807_v58 = vpop.eup %5806 }
 0x37f   : > { %v1888_v59 = vpop.f32.mrb[76].mxu1  ;;  %v1918_v60 = vpack.c.bf16 %v5807_v58, %v5805_v57 }
 0x380   : > { %v1889_v61 = vadd.f32 %v7017_v10, %v1888_v59  ;;  %v5277_v62 = vpop.f32.mrb[77].mxu1 }
 0x381   : > { %v1891_v63 = vpop.f32.mrb[78].mxu1  ;;  %5312 = vmatmul.mubr.bf16.gmra.mrb[96].mxu0 %v1918_v60 }
 0x382   : > { %v1892_v3 = vadd.f32 %v7017_v10, %v1891_v63  ;;  %v5278_v1 = vpop.f32.mrb[79].mxu1  ;;  %5315 = vmatprep.mubr.msk.bf16.mxu0 %vm6308_vm1, %v6307_v43  ;;  %5812 = vtanh.f32 %v1889_v61 }
 0x384   : > { %5814 = vtanh.f32 %v1892_v3  ;;  %v5809_v2 = vpop.eup %5808 }
 0x386   : > { %v5811_v0 = vpop.eup %5810 }
 0x387   : > { %v1896_v4 = vpop.f32.mrb[80].mxu1  ;;  %v1919_v5 = vpack.c.bf16 %v5811_v0, %v5809_v2 }
 0x388   : > { %v1897_v6 = vadd.f32 %v7017_v10, %v1896_v4  ;;  %v5281_v7 = vpop.f32.mrb[81].mxu1  ;;  %v5644_v10 = vld [vmem:[%s8120_s11] sm:$0xff]  }
 0x389   : > { %v1899_v8 = vpop.f32.mrb[82].mxu1  ;;  %5316 = vmatmul.mubr.bf16.gmra.mrb[100].mxu0 %v1919_v5 }
 0x38a   : > { %5816 = vtanh.f32 %v1897_v6  ;;  %v5282_v9 = vpop.f32.mrb[83].mxu1  ;;  %5319 = vmatprep.mubr.msk.bf16.mxu0 %vm6308_vm1, %v6307_v43  ;;  %5372 = vmatpush3.bf16.msra.mxu0 %v5644_v10  ;;  %v5650_v8 = vld [vmem:[%s8120_s11 + $0x30] sm:$0xff]   ;;  %v7150_v10 = vld [vmem:[%s8119_s10] ss:$0 sm:$0xff] }
 0x38b   : > { %5373 = vmatprep.subr.bf16.mxu0 %v6307_v43  ;;  %v5651_v9 = vld [vmem:[%s8120_s11 + $0x38] sm:$0xff]  }
 0x38c   : > { %v5813_v11 = vpop.eup %5812 }
 0x38e   : > { %v5815_v12 = vpop.eup %5814  ;;  %5374 = vmatpush3.bf16.msra.mxu0 %v5645_v18 }
 0x38f   : > { %v1920_v13 = vpack.c.bf16 %v5815_v12, %v5813_v11  ;;  %5375 = vmatprep.subr.bf16.mxu0 %v6307_v43  ;;  %v5652_v11 = vld [vmem:[%s8122_s13] sm:$0xff]   ;;  %v5653_v12 = vld [vmem:[%s8122_s13 + $0x8] sm:$0xff]  }
 0x391   : > { %5320 = vmatmul.mubr.bf16.gmra.mrb[104].mxu0 %v1920_v13  ;;  %v5654_v13 = vld [vmem:[%s8122_s13 + $0x10] sm:$0xff]  }
 0x392   : > { %5323 = vmatprep.mubr.msk.bf16.mxu0 %vm6308_vm1, %v6307_v43  ;;  %5376 = vmatpush3.bf16.msra.mxu0 %v5646_v19 }
 0x393   : > { %5377 = vmatprep.subr.bf16.mxu0 %v6307_v43 }
 0x394   : > { %v5817_v15 = vpop.eup %5816 }
 0x395   : > { %v1921_v16 = vpack.c.bf16 %v5817_v15, %v5817_v15  ;;  %v5655_v15 = vld [vmem:[%s8122_s13 + $0x18] sm:$0xff]  }
 0x396   : > { %5378 = vmatpush3.bf16.msra.mxu0 %v5647_v20 }
 0x397   : > { %5379 = vmatprep.subr.bf16.mxu0 %v6307_v43 }
 0x399   : > { %5324 = vmatmul.mubr.bf16.gmra.mrb[108].mxu0 %v1921_v16  ;;  %v5656_v16 = vld [vmem:[%s8122_s13 + $0x20] sm:$0xff]  }
 0x39a   : > { %5387 = vmatprep.mubr.msk.bf16.mxu0 %vm6308_vm1, %v6307_v43  ;;  %5380 = vmatpush3.bf16.msra.mxu0 %v5648_v17 }
 0x39b   : > { %5381 = vmatprep.subr.bf16.mxu0 %v6307_v43 }
 0x39e   : > { %5382 = vmatpush3.bf16.msra.mxu0 %v5649_v21 }
 0x39f   : > { %5383 = vmatprep.subr.bf16.mxu0 %v6307_v43 }
 0x3a2   : > { %5384 = vmatpush3.bf16.msra.mxu0 %v5650_v8 }
 0x3a3   : > { %5385 = vmatprep.subr.bf16.mxu0 %v6307_v43 }
 0x3a6   : > { %5386 = vmatpush3.bf16.msra.mxu0 %v5651_v9 }
 0x43c   : > { %v2027_v23 = vpop.f32.mrb[84].mxu0 }
 0x43d   : > { %v5301_v24 = vpop.f32.mrb[85].mxu0  ;;  %v2028_v27 = vadd.f32 %v7077_v22, %v2027_v23 }
 0x43e   : > { %v2030_v26 = vpop.f32.mrb[86].mxu0 }
 0x43f   : > { %v2031_v29 = vadd.f32 %v7077_v22, %v2030_v26  ;;  %v5302_v30 = vpop.f32.mrb[87].mxu0 }
 0x441   : > { %v2081_v25 = vpack.c.bf16 %v2031_v29, %v2028_v27 }
 0x443   : > { %4847 = vst [vmem:[%s7082_s0] sm:$0xff] %v2081_v25   ;;  %5344 = vmatmul.mubr.bf16.vlgmr.msra.gmra.mrb[84].mxu1 %v2081_v25 }
 0x444   : > { %v2035_v31 = vpop.f32.mrb[88].mxu0  ;;  %5347 = vmatprep.mubr.msk.bf16.mxu1 %vm6308_vm1, %v6307_v43  ;;  %5416 = vmatpush3.bf16.msra.mxu1 %v5652_v11 }
 0x445   : > { %v5305_v33 = vpop.f32.mrb[89].mxu0  ;;  %v2036_v34 = vadd.f32 %v7077_v22, %v2035_v31  ;;  %5417 = vmatprep.subr.bf16.mxu1 %v6307_v43 }
 0x446   : > { %v2038_v32 = vpop.f32.mrb[90].mxu0 }
 0x447   : > { %v2039_v28 = vadd.f32 %v7077_v22, %v2038_v32  ;;  %v5306_v36 = vpop.f32.mrb[91].mxu0 }
 0x448   : > { %5418 = vmatpush3.bf16.msra.mxu1 %v5653_v12 }
 0x449   : > { %v2082_v37 = vpack.c.bf16 %v2039_v28, %v2036_v34  ;;  %5419 = vmatprep.subr.bf16.mxu1 %v6307_v43 }
 0x44b   : > { %4873 = vst [vmem:[%s7082_s0 + $0x8] sm:$0xff] %v2082_v37   ;;  %5348 = vmatmul.mubr.bf16.gmra.mrb[88].mxu1 %v2082_v37 }
 0x44c   : > { %v2043_v35 = vpop.f32.mrb[92].mxu0  ;;  %5351 = vmatprep.mubr.msk.bf16.mxu1 %vm6308_vm1, %v6307_v43  ;;  %5420 = vmatpush3.bf16.msra.mxu1 %v5654_v13 }
 0x44d   : > { %v5309_v38 = vpop.f32.mrb[93].mxu0  ;;  %v2044_v40 = vadd.f32 %v7077_v22, %v2043_v35  ;;  %5421 = vmatprep.subr.bf16.mxu1 %v6307_v43 }
 0x44e   : > { %v2046_v39 = vpop.f32.mrb[94].mxu0 }
 0x44f   : > { %v2047_v41 = vadd.f32 %v7077_v22, %v2046_v39  ;;  %v5310_v42 = vpop.f32.mrb[95].mxu0 }
 0x450   : > { %5422 = vmatpush3.bf16.msra.mxu1 %v5655_v15 }
 0x451   : > { %v2083_v45 = vpack.c.bf16 %v2047_v41, %v2044_v40  ;;  %5423 = vmatprep.subr.bf16.mxu1 %v6307_v43 }
 0x453   : > { %4874 = vst [vmem:[%s7082_s0 + $0x10] sm:$0xff] %v2083_v45   ;;  %5352 = vmatmul.mubr.bf16.gmra.mrb[92].mxu1 %v2083_v45 }
 0x454   : > { %v2051_v46 = vpop.f32.mrb[96].mxu0  ;;  %5355 = vmatprep.mubr.msk.bf16.mxu1 %vm6308_vm1, %v6307_v43  ;;  %5424 = vmatpush3.bf16.msra.mxu1 %v5656_v16 }
 0x455   : > { %v5313_v44 = vpop.f32.mrb[97].mxu0  ;;  %v2052_v49 = vadd.f32 %v7077_v22, %v2051_v46  ;;  %5425 = vmatprep.subr.bf16.mxu1 %v6307_v43 }
 0x456   : > { %v2054_v48 = vpop.f32.mrb[98].mxu0 }
 0x457   : > { %v2055_v50 = vadd.f32 %v7077_v22, %v2054_v48  ;;  %v5314_v51 = vpop.f32.mrb[99].mxu0 }
 0x458   : > { %5426 = vmatpush3.bf16.msra.mxu1 %v5657_v14  ;;  %v5658_v14 = vld [vmem:[%s8122_s13 + $0x30] sm:$0xff]  }
 0x459   : > { %v2084_v52 = vpack.c.bf16 %v2055_v50, %v2052_v49  ;;  %5427 = vmatprep.subr.bf16.mxu1 %v6307_v43 }
 0x45b   : > { %4875 = vst [vmem:[%s7082_s0 + $0x18] sm:$0xff] %v2084_v52   ;;  %5356 = vmatmul.mubr.bf16.gmra.mrb[96].mxu1 %v2084_v52 }
 0x45c   : > { %v2059_v47 = vpop.f32.mrb[100].mxu0  ;;  %5359 = vmatprep.mubr.msk.bf16.mxu1 %vm6308_vm1, %v6307_v43  ;;  %5428 = vmatpush3.bf16.msra.mxu1 %v5658_v14 }
 0x45d   : > { %v5317_v53 = vpop.f32.mrb[101].mxu0  ;;  %v2060_v54 = vadd.f32 %v7077_v22, %v2059_v47  ;;  %5429 = vmatprep.subr.bf16.mxu1 %v6307_v43 }
 0x45e   : > { %v2062_v55 = vpop.f32.mrb[102].mxu0 }
 0x45f   : > { %v2063_v56 = vadd.f32 %v7077_v22, %v2062_v55  ;;  %v5318_v57 = vpop.f32.mrb[103].mxu0 }
 0x461   : > { %v2085_v58 = vpack.c.bf16 %v2063_v56, %v2060_v54 }
 0x463   : > { %4876 = vst [vmem:[%s7082_s0 + $0x20] sm:$0xff] %v2085_v58   ;;  %5360 = vmatmul.mubr.bf16.gmra.mrb[100].mxu1 %v2085_v58 }
 0x464   : > { %v2067_v59 = vpop.f32.mrb[104].mxu0  ;;  %5363 = vmatprep.mubr.msk.bf16.mxu1 %vm6308_vm1, %v6307_v43 }
 0x465   : > { %v5321_v60 = vpop.f32.mrb[105].mxu0  ;;  %v2068_v62 = vadd.f32 %v7077_v22, %v2067_v59 }
 0x466   : > { %v2070_v61 = vpop.f32.mrb[106].mxu0 }
 0x467   : > { %v2071_v63 = vadd.f32 %v7077_v22, %v2070_v61  ;;  %v5322_v3 = vpop.f32.mrb[107].mxu0 }
 0x469   : > { %v2086_v1 = vpack.c.bf16 %v2071_v63, %v2068_v62 }
 0x46b   : > { %4877 = vst [vmem:[%s7082_s0 + $0x28] sm:$0xff] %v2086_v1   ;;  %5364 = vmatmul.mubr.bf16.gmra.mrb[104].mxu1 %v2086_v1 }
 0x46c   : > { %v2075_v2 = vpop.f32.mrb[108].mxu0  ;;  %5367 = vmatprep.mubr.msk.bf16.mxu1 %vm6308_vm1, %v6307_v43 }
 0x46d   : > { %v2076_v0 = vadd.f32 %v7077_v22, %v2075_v2  ;;  %v5325_v4 = vpop.f32.mrb[109].mxu0 }
 0x46e   : > { %v2078_v5 = vpop.f32.mrb[110].mxu0 }
 0x46f   : > { %v2087_v6 = vpack.c.bf16 %v2076_v0, %v2076_v0  ;;  %v5326_v7 = vpop.f32.mrb[111].mxu0 }
 0x471   : > { %4023 = vst [vmem:[%s7082_s0 + $0x30] sm:$0xf] %v2087_v6 }
 0x473   : > { %5368 = vmatmul.mubr.bf16.gmra.mrb[108].mxu1 %v2087_v6 }
 0x474   : > { %5431 = vmatprep.mubr.msk.bf16.mxu1 %vm6308_vm1, %v6307_v43 }
 0x516   : > { %v2193_v18 = vpop.f32.mrb[84].mxu1 }
 0x517   : > { %v2194_v19 = vadd.f32 %v7150_v10, %v2193_v18  ;;  %v5345_v20 = vpop.f32.mrb[85].mxu1  ;;  %v5660_v18 = vld [vmem:[%s8124_s15] ss:$28 sps:$4 sm:$0xff]  }
 0x518   : > { %v2196_v17 = vpop.f32.mrb[86].mxu1  ;;  %v5665_v20 = vld [vmem:[%s8124_s15 + $0xc] ss:$28 sps:$4 sm:$0xff]  }
 0x519   : > { %v2197_v21 = vadd.f32 %v7150_v10, %v2196_v17  ;;  %v5346_v22 = vpop.f32.mrb[87].mxu1  ;;  %5818 = vtanh.f32 %v2194_v19  ;;  %v5662_v19 = vld [vmem:[%s8124_s15 + $0x4] ss:$28 sps:$4 sm:$0xff]   ;;  %v5668_v17 = vld [vmem:[%s8124_s15 + $0x3c] ss:$28 sps:$4 sm:$0xff]  }
 0x51a   : > { %3014 = vmatprep.subr.bf16.mxu0 %v5662_v19  ;;  %v5674_v22 = vld [vmem:[%s8124_s15 + $0x74] ss:$28 sps:$4 sm:$0xff]  }
 0x51b   : > { %5820 = vtanh.f32 %v2197_v21  ;;  %v5666_v21 = vld [vmem:[%s8124_s15 + $0x38] ss:$28 sps:$4 sm:$0xff]  }
 0x51e   : > { %v2201_v23 = vpop.f32.mrb[88].mxu1 }
 0x51f   : > { %v2202_v24 = vadd.f32 %v7150_v10, %v2201_v23  ;;  %v5349_v26 = vpop.f32.mrb[89].mxu1  ;;  %v5672_v23 = vld [vmem:[%s8124_s15 + $0x70] ss:$28 sps:$4 sm:$0xff]  }
 0x520   : > { %v2204_v27 = vpop.f32.mrb[90].mxu1  ;;  %v5678_v26 = vld [vmem:[%s8124_s15 + $0xa8] ss:$28 sps:$4 sm:$0xff]  }
 0x521   : > { %v2205_v29 = vadd.f32 %v7150_v10, %v2204_v27  ;;  %v5350_v30 = vpop.f32.mrb[91].mxu1  ;;  %5822 = vtanh.f32 %v2202_v24  ;;  %v5680_v24 = vld [vmem:[%s8124_s15 + $0xac] ss:$28 sps:$4 sm:$0xff]   ;;  %v5686_v27 = vld [vmem:[%s8124_s15 + $0xe4] ss:$28 sps:$4 sm:$0xff]  }
 0x522   : > { %v5692_v30 = vld [vmem:[%s8124_s15 + $0x11c] ss:$28 sps:$4 sm:$0xff]  }
 0x523   : > { %5824 = vtanh.f32 %v2205_v29  ;;  %v5819_v25 = vpop.eup %5818  ;;  %v5684_v29 = vld [vmem:[%s8124_s15 + $0xe0] ss:$28 sps:$4 sm:$0xff]  }
 0x525   : > { %v5821_v31 = vpop.eup %5820 }
 0x526   : > { %v2209_v33 = vpop.f32.mrb[92].mxu1  ;;  %v2260_v32 = vpack.c.bf16 %v5821_v31, %v5819_v25  ;;  %v5690_v25 = vld [vmem:[%s8124_s15 + $0x118] ss:$28 sps:$4 sm:$0xff]   ;;  %v7226_v31 = vld [vmem:[%s8121_s12] ss:$0 sm:$0xff] }
 0x527   : > { %v2210_v34 = vadd.f32 %v7150_v10, %v2209_v33  ;;  %v5353_v28 = vpop.f32.mrb[93].mxu1 }
 0x528   : > { %v2212_v36 = vpop.f32.mrb[94].mxu1  ;;  %5388 = vmatmul.mubr.bf16.vlgmr.msra.gmra.mrb[112].mxu0 %v2260_v32 }
 0x529   : > { %v2213_v37 = vadd.f32 %v7150_v10, %v2212_v36  ;;  %v5354_v35 = vpop.f32.mrb[95].mxu1  ;;  %5391 = vmatprep.mubr.msk.bf16.mxu0 %vm6308_vm1, %v6307_v43  ;;  %5826 = vtanh.f32 %v2210_v34  ;;  %3015 = vmatpush1.bf16.msra.mxu0 %v5660_v18  ;;  %v5693_v18 = vld [vmem:[%s8124_s15 + $0x120] ss:$28 sps:$4 sm:$0xff]  }
 0x52a   : > { %3016 = vmatprep.subr.bf16.mxu0 %v5668_v17 }
 0x52b   : > { %5828 = vtanh.f32 %v2213_v37  ;;  %v5823_v38 = vpop.eup %5822 }
 0x52d   : > { %v5825_v39 = vpop.eup %5824  ;;  %3017 = vmatpush1.bf16.msra.mxu0 %v5666_v21 }
 0x52e   : > { %v2217_v40 = vpop.f32.mrb[96].mxu1  ;;  %v2261_v41 = vpack.c.bf16 %v5825_v39, %v5823_v38  ;;  %3018 = vmatprep.subr.bf16.mxu0 %v5674_v22 }
 0x52f   : > { %v2218_v42 = vadd.f32 %v7150_v10, %v2217_v40  ;;  %v5357_v45 = vpop.f32.mrb[97].mxu1 }
 0x530   : > { %v2220_v46 = vpop.f32.mrb[98].mxu1  ;;  %5392 = vmatmul.mubr.bf16.gmra.mrb[116].mxu0 %v2261_v41 }
 0x531   : > { %v2221_v44 = vadd.f32 %v7150_v10, %v2220_v46  ;;  %v5358_v48 = vpop.f32.mrb[99].mxu1  ;;  %5395 = vmatprep.mubr.msk.bf16.mxu0 %vm6308_vm1, %v6307_v43  ;;  %5830 = vtanh.f32 %v2218_v42  ;;  %3019 = vmatpush1.bf16.msra.mxu0 %v5672_v23 }
 0x532   : > { %3020 = vmatprep.subr.bf16.mxu0 %v5680_v24 }
 0x533   : > { %5832 = vtanh.f32 %v2221_v44  ;;  %v5827_v49 = vpop.eup %5826  ;;  %v5663_v44 = vld [vmem:[%s8124_s15 + $0x8] ss:$28 sps:$4 sm:$0xff]  }
 0x535   : > { %v5829_v50 = vpop.eup %5828  ;;  %3021 = vmatpush1.bf16.msra.mxu0 %v5678_v26 }
 0x536   : > { %v2225_v51 = vpop.f32.mrb[100].mxu1  ;;  %v2262_v52 = vpack.c.bf16 %v5829_v50, %v5827_v49  ;;  %3022 = vmatprep.subr.bf16.mxu0 %v5686_v27  ;;  %v5671_v50 = vld [vmem:[%s8124_s15 + $0x44] ss:$28 sps:$4 sm:$0xff]  }
 0x537   : > { %v2226_v47 = vadd.f32 %v7150_v10, %v2225_v51  ;;  %v5361_v53 = vpop.f32.mrb[101].mxu1 }
 0x538   : > { %v2228_v55 = vpop.f32.mrb[102].mxu1  ;;  %5396 = vmatmul.mubr.bf16.gmra.mrb[120].mxu0 %v2262_v52 }
 0x539   : > { %v2229_v54 = vadd.f32 %v7150_v10, %v2228_v55  ;;  %v5362_v56 = vpop.f32.mrb[103].mxu1  ;;  %5399 = vmatprep.mubr.msk.bf16.mxu0 %vm6308_vm1, %v6307_v43  ;;  %5834 = vtanh.f32 %v2226_v47  ;;  %3023 = vmatpush1.bf16.msra.mxu0 %v5684_v29 }
 0x53a   : > { %3024 = vmatprep.subr.bf16.mxu0 %v5692_v30  ;;  %v5677_v56 = vld [vmem:[%s8124_s15 + $0x7c] ss:$28 sps:$4 sm:$0xff]  }
 0x53b   : > { %5836 = vtanh.f32 %v2229_v54  ;;  %v5831_v57 = vpop.eup %5830  ;;  %v5669_v54 = vld [vmem:[%s8124_s15 + $0x40] ss:$28 sps:$4 sm:$0xff]  }
 0x53d   : > { %v5833_v58 = vpop.eup %5832  ;;  %3025 = vmatpush1.bf16.msra.mxu0 %v5690_v25 }
 0x53e   : > { %v2233_v59 = vpop.f32.mrb[104].mxu1  ;;  %v2263_v60 = vpack.c.bf16 %v5833_v58, %v5831_v57 }
 0x53f   : > { %v2234_v61 = vadd.f32 %v7150_v10, %v2233_v59  ;;  %v5365_v62 = vpop.f32.mrb[105].mxu1  ;;  %v5675_v59 = vld [vmem:[%s8124_s15 + $0x78] ss:$28 sps:$4 sm:$0xff]  }
 0x540   : > { %v2236_v63 = vpop.f32.mrb[106].mxu1  ;;  %5400 = vmatmul.mubr.bf16.gmra.mrb[124].mxu0 %v2263_v60  ;;  %v5683_v62 = vld [vmem:[%s8124_s15 + $0xb4] ss:$28 sps:$4 sm:$0xff]  }
 0x541   : > { %v2237_v3 = vadd.f32 %v7150_v10, %v2236_v63  ;;  %v5366_v1 = vpop.f32.mrb[107].mxu1  ;;  %5403 = vmatprep.mubr.msk.bf16.mxu0 %vm6308_vm1, %v6307_v43  ;;  %5838 = vtanh.f32 %v2234_v61 }
 0x543   : > { %5840 = vtanh.f32 %v2237_v3  ;;  %v5835_v2 = vpop.eup %5834 }
 0x545   : > { %v5837_v0 = vpop.eup %5836 }
 0x546   : > { %v2241_v4 = vpop.f32.mrb[108].mxu1  ;;  %v2264_v5 = vpack.c.bf16 %v5837_v0, %v5835_v2 }
 0x547   : > { %v2242_v6 = vadd.f32 %v7150_v10, %v2241_v4  ;;  %v5369_v7 = vpop.f32.mrb[109].mxu1  ;;  %v5659_v10 = vld [vmem:[%s8122_s13 + $0x38] sm:$0xff]   ;;  %v5681_v4 = vld [vmem:[%s8124_s15 + $0xb0] ss:$28 sps:$4 sm:$0xff]  }
 0x548   : > { %v2244_v8 = vpop.f32.mrb[110].mxu1  ;;  %5404 = vmatmul.mubr.bf16.gmra.mrb[128].mxu0 %v2264_v5  ;;  %5430 = vmatpush3.bf16.msra.mxu1 %v5659_v10  ;;  %v5689_v5 = vld [vmem:[%s8124_s15 + $0xec] ss:$28 sps:$4 sm:$0xff]  }
 0x549   : > { %5842 = vtanh.f32 %v2242_v6  ;;  %v5370_v9 = vpop.f32.mrb[111].mxu1  ;;  %5407 = vmatprep.mubr.msk.bf16.mxu0 %vm6308_vm1, %v6307_v43  ;;  %3115 = vmatprep.subr.bf16.mxu1 %v5665_v20  ;;  %v5687_v8 = vld [vmem:[%s8124_s15 + $0xe8] ss:$28 sps:$4 sm:$0xff]  }
 0x54b   : > { %v5839_v11 = vpop.eup %5838 }
 0x54d   : > { %v5841_v12 = vpop.eup %5840 }
 0x54e   : > { %v2265_v13 = vpack.c.bf16 %v5841_v12, %v5839_v11  ;;  %v5695_v12 = vld [vmem:[%s8124_s15 + $0x124] ss:$28 sps:$4 sm:$0xff]  }
 0x550   : > { %5408 = vmatmul.mubr.bf16.gmra.mrb[132].mxu0 %v2265_v13 }
 0x551   : > { %5411 = vmatprep.mubr.msk.bf16.mxu0 %vm6308_vm1, %v6307_v43 }
 0x553   : > { %v5843_v15 = vpop.eup %5842 }
 0x554   : > { %v2266_v16 = vpack.c.bf16 %v5843_v15, %v5843_v15 }
 0x558   : > { %5412 = vmatmul.mubr.bf16.gmra.mrb[136].mxu0 %v2266_v16 }
 0x5fb   : > { %v2372_v33 = vpop.f32.mrb[112].mxu0 }
 0x5fc   : > { %v2373_v32 = vadd.f32 %v7226_v31, %v2372_v33  ;;  %v5389_v34 = vpop.f32.mrb[113].mxu0 }
 0x5fd   : > { %v2375_v28 = vpop.f32.mrb[114].mxu0 }
 0x5fe   : > { %v2376_v36 = vadd.f32 %v7226_v31, %v2375_v28  ;;  %v5390_v37 = vpop.f32.mrb[115].mxu0  ;;  %5844 = vtanh.f32 %v2373_v32 }
 0x600   : > { %5846 = vtanh.f32 %v2376_v36 }
 0x603   : > { %v2380_v35 = vpop.f32.mrb[116].mxu0 }
 0x604   : > { %v2381_v38 = vadd.f32 %v7226_v31, %v2380_v35  ;;  %v5393_v39 = vpop.f32.mrb[117].mxu0 }
 0x605   : > { %v2383_v40 = vpop.f32.mrb[118].mxu0 }
 0x606   : > { %v2384_v41 = vadd.f32 %v7226_v31, %v2383_v40  ;;  %v5394_v42 = vpop.f32.mrb[119].mxu0  ;;  %5848 = vtanh.f32 %v2381_v38 }
 0x607   : > { %v5699_v42 = vld [vmem:[%s8124_s15 + $0x158] ss:$28 sps:$4 sm:$0xff]  }
 0x608   : > { %5850 = vtanh.f32 %v2384_v41  ;;  %v5845_v45 = vpop.eup %5844  ;;  %v5698_v41 = vld [vmem:[%s8124_s15 + $0x154] ss:$28 sps:$4 sm:$0xff]  }
 0x609   : > { %3026 = vmatprep.subr.bf16.mxu0 %v5698_v41 }
 0x60a   : > { %v5847_v46 = vpop.eup %5846 }
 0x60b   : > { %v2388_v48 = vpop.f32.mrb[120].mxu0  ;;  %v2439_v49 = vpack.c.bf16 %v5847_v46, %v5845_v45  ;;  %v5701_v45 = vld [vmem:[%s8124_s15 + $0x15c] ss:$28 sps:$4 sm:$0xff]   ;;  %v5702_v46 = vld [vmem:[%s8124_s15 + $0x188] ss:$28 sps:$4 sm:$0xff]  }
 0x60c   : > { %v2389_v51 = vadd.f32 %v7226_v31, %v2388_v48  ;;  %v5397_v52 = vpop.f32.mrb[121].mxu0  ;;  %v5705_v48 = vld [vmem:[%s8124_s15 + $0x190] ss:$28 sps:$4 sm:$0xff]  }
 0x60d   : > { %v2391_v47 = vpop.f32.mrb[122].mxu0  ;;  %5432 = vmatmul.mubr.bf16.vlgmr.msra.gmra.mrb[112].mxu1 %v2439_v49  ;;  %v5707_v49 = vld [vmem:[%s8124_s15 + $0x194] ss:$28 sps:$4 sm:$0xff]   ;;  %v7319_v52 = vld [vmem:[%s8123_s14] ss:$0 sm:$0xff] }
 0x60e   : > { %v2392_v53 = vadd.f32 %v7226_v31, %v2391_v47  ;;  %v5398_v55 = vpop.f32.mrb[123].mxu0  ;;  %5435 = vmatprep.mubr.msk.bf16.mxu1 %vm6308_vm1, %v6307_v43  ;;  %3116 = vmatpush1.bf16.msra.mxu1 %v5663_v44  ;;  %5852 = vtanh.f32 %v2389_v51  ;;  %v5704_v44 = vld [vmem:[%s8124_s15 + $0x18c] ss:$28 sps:$4 sm:$0xff]   ;;  %v5710_v51 = vld [vmem:[%s8124_s15 + $0x14] ss:$28 sps:$4 sm:$0xff]  }
 0x60f   : > { %3117 = vmatprep.subr.bf16.mxu1 %v5671_v50  ;;  %v6309_v50 = vmov 0  }
 0x610   : > { %5854 = vtanh.f32 %v2392_v53  ;;  %v5849_v57 = vpop.eup %5848  ;;  %3046 = vmatprep.mubr.bf16.mxu0 %v6309_v50 }
 0x612   : > { %v5851_v58 = vpop.eup %5850  ;;  %3118 = vmatpush1.bf16.msra.mxu1 %v5669_v54 }
 0x613   : > { %v2396_v60 = vpop.f32.mrb[124].mxu0  ;;  %v2440_v61 = vpack.c.bf16 %v5851_v58, %v5849_v57  ;;  %3119 = vmatprep.subr.bf16.mxu1 %v5677_v56 }
 0x614   : > { %v2397_v63 = vadd.f32 %v7226_v31, %v2396_v60  ;;  %v5401_v3 = vpop.f32.mrb[125].mxu0 }
 0x615   : > { %v2399_v1 = vpop.f32.mrb[126].mxu0  ;;  %5436 = vmatmul.mubr.bf16.gmra.mrb[116].mxu1 %v2440_v61 }
 0x616   : > { %v2400_v2 = vadd.f32 %v7226_v31, %v2399_v1  ;;  %v5402_v0 = vpop.f32.mrb[127].mxu0  ;;  %5439 = vmatprep.mubr.msk.bf16.mxu1 %vm6308_vm1, %v6307_v43  ;;  %3120 = vmatpush1.bf16.msra.mxu1 %v5675_v59  ;;  %5856 = vtanh.f32 %v2397_v63 }
 0x617   : > { %3121 = vmatprep.subr.bf16.mxu1 %v5683_v62  ;;  %v5711_v0 = vld [vmem:[%s8124_s15 + $0x18] ss:$28 sps:$4 sm:$0xff]  }
 0x618   : > { %5858 = vtanh.f32 %v2400_v2  ;;  %v5853_v6 = vpop.eup %5852  ;;  %v5708_v2 = vld [vmem:[%s8124_s15 + $0x10] ss:$28 sps:$4 sm:$0xff]  }
 0x61a   : > { %v5855_v7 = vpop.eup %5854  ;;  %3122 = vmatpush1.bf16.msra.mxu1 %v5681_v4 }
 0x61b   : > { %v2404_v9 = vpop.f32.mrb[128].mxu0  ;;  %v2441_v11 = vpack.c.bf16 %v5855_v7, %v5853_v6  ;;  %3123 = vmatprep.subr.bf16.mxu1 %v5689_v5 }
 0x61c   : > { %v2405_v13 = vadd.f32 %v7226_v31, %v2404_v9  ;;  %v5405_v15 = vpop.f32.mrb[129].mxu0 }
 0x61d   : > { %v2407_v16 = vpop.f32.mrb[130].mxu0  ;;  %5440 = vmatmul.mubr.bf16.gmra.mrb[120].mxu1 %v2441_v11  ;;  %v5715_v15 = vld [vmem:[%s8124_s15 + $0x50] ss:$28 sps:$4 sm:$0xff]  }
 0x61e   : > { %v2408_v14 = vadd.f32 %v7226_v31, %v2407_v16  ;;  %v5406_v10 = vpop.f32.mrb[131].mxu0  ;;  %5443 = vmatprep.mubr.msk.bf16.mxu1 %vm6308_vm1, %v6307_v43  ;;  %3124 = vmatpush1.bf16.msra.mxu1 %v5687_v8  ;;  %5860 = vtanh.f32 %v2405_v13  ;;  %v5714_v8 = vld [vmem:[%s8124_s15 + $0x4c] ss:$28 sps:$4 sm:$0xff]   ;;  %v5718_v16 = vld [vmem:[%s8124_s15 + $0x84] ss:$28 sps:$4 sm:$0xff]  }
 0x61f   : > { %3125 = vmatprep.subr.bf16.mxu1 %v5695_v12  ;;  %v5712_v13 = vld [vmem:[%s8124_s15 + $0x48] ss:$28 sps:$4 sm:$0xff]  }
 0x620   : > { %5862 = vtanh.f32 %v2408_v14  ;;  %v5857_v19 = vpop.eup %5856 }
 0x622   : > { %v5859_v20 = vpop.eup %5858  ;;  %3126 = vmatpush1.bf16.msra.mxu1 %v5693_v18 }
 0x623   : > { %v2412_v17 = vpop.f32.mrb[132].mxu0  ;;  %v2442_v21 = vpack.c.bf16 %v5859_v20, %v5857_v19  ;;  %3127 = vmatprep.subr.bf16.mxu1 %v5701_v45  ;;  %v5716_v20 = vld [vmem:[%s8124_s15 + $0x80] ss:$28 sps:$4 sm:$0xff]   ;;  %v5731_v45 = vld [vmem:[%s8124_s15 + $0x130] ss:$28 sps:$4 sm:$0xff]  }
 0x624   : > { %v2413_v22 = vadd.f32 %v7226_v31, %v2412_v17  ;;  %v5409_v23 = vpop.f32.mrb[133].mxu0  ;;  %v5719_v17 = vld [vmem:[%s8124_s15 + $0x88] ss:$28 sps:$4 sm:$0xff]  }
 0x625   : > { %v2415_v24 = vpop.f32.mrb[134].mxu0  ;;  %5444 = vmatmul.mubr.bf16.gmra.mrb[124].mxu1 %v2442_v21  ;;  %v5722_v23 = vld [vmem:[%s8124_s15 + $0xbc] ss:$28 sps:$4 sm:$0xff]  }
 0x626   : > { %v2416_v26 = vadd.f32 %v7226_v31, %v2415_v24  ;;  %v5410_v27 = vpop.f32.mrb[135].mxu0  ;;  %5447 = vmatprep.mubr.msk.bf16.mxu1 %vm6308_vm1, %v6307_v43  ;;  %5864 = vtanh.f32 %v2413_v22  ;;  %3128 = vmatpush1.bf16.msra.mxu1 %v5699_v42  ;;  %v5728_v42 = vld [vmem:[%s8124_s15 + $0x128] ss:$28 sps:$4 sm:$0xff]  }
 0x627   : > { %3129 = vmatprep.subr.bf16.mxu1 %v5707_v49 }
 0x628   : > { %5866 = vtanh.f32 %v2416_v26  ;;  %v5861_v29 = vpop.eup %5860 }
 0x62a   : > { %v5863_v30 = vpop.eup %5862  ;;  %3130 = vmatpush1.bf16.msra.mxu1 %v5705_v48 }
 0x62b   : > { %v2420_v25 = vpop.f32.mrb[136].mxu0  ;;  %v2443_v33 = vpack.c.bf16 %v5863_v30, %v5861_v29  ;;  %5459 = vmatprep.subr.bf16.mxu1 %v6307_v43  ;;  %v5720_v29 = vld [vmem:[%s8124_s15 + $0xb8] ss:$28 sps:$4 sm:$0xff]   ;;  %v5723_v30 = vld [vmem:[%s8124_s15 + $0xc0] ss:$28 sps:$4 sm:$0xff]  }
 0x62c   : > { %v2421_v32 = vadd.f32 %v7226_v31, %v2420_v25  ;;  %v5413_v34 = vpop.f32.mrb[137].mxu0  ;;  %v5696_v31 = vld [vmem:[%s8124_s15 + $0x150] ss:$28 sps:$4 sm:$0xff]  }
 0x62d   : > { %v2423_v28 = vpop.f32.mrb[138].mxu0  ;;  %5448 = vmatmul.mubr.bf16.gmra.mrb[128].mxu1 %v2443_v33  ;;  %3027 = vmatpush1.bf16.msra.mxu0 %v5696_v31  ;;  %v5726_v25 = vld [vmem:[%s8124_s15 + $0xf4] ss:$28 sps:$4 sm:$0xff]  }
 0x62e   : > { %5868 = vtanh.f32 %v2421_v32  ;;  %v5414_v36 = vpop.f32.mrb[139].mxu0  ;;  %5451 = vmatprep.mubr.msk.bf16.mxu1 %vm6308_vm1, %v6307_v43  ;;  %3028 = vmatprep.subr.bf16.mxu0 %v5704_v44 }
 0x62f   : > { %v5724_v36 = vld [vmem:[%s8124_s15 + $0xf0] ss:$28 sps:$4 sm:$0xff]  }
 0x630   : > { %v5865_v37 = vpop.eup %5864 }
 0x631   : > { %3029 = vmatpush1.bf16.msra.mxu0 %v5702_v46  ;;  %v5734_v46 = vld [vmem:[%s8124_s15 + $0x164] ss:$28 sps:$4 sm:$0xff]  }
 0x632   : > { %v5867_v35 = vpop.eup %5866  ;;  %3216 = vmatprep.subr.bf16.mxu0 %v5710_v51 }
 0x633   : > { %v2444_v38 = vpack.c.bf16 %v5867_v35, %v5865_v37  ;;  %v5727_v37 = vld [vmem:[%s8124_s15 + $0xf8] ss:$28 sps:$4 sm:$0xff]  }
 0x635   : > { %5452 = vmatmul.mubr.bf16.gmra.mrb[132].mxu1 %v2444_v38 }
 0x636   : > { %5455 = vmatprep.mubr.msk.bf16.mxu1 %vm6308_vm1, %v6307_v43 }
 0x638   : > { %v5869_v39 = vpop.eup %5868 }
 0x639   : > { %v2445_v40 = vpack.c.bf16 %v5869_v39, %v5869_v39  ;;  %v5730_v39 = vld [vmem:[%s8124_s15 + $0x12c] ss:$28 sps:$4 sm:$0xff]  }
 0x63d   : > { %5456 = vmatmul.mubr.bf16.gmra.mrb[136].mxu1 %v2445_v40 }
 0x63e   : > { %3147 = vmatprep.mubr.bf16.mxu1 %v6309_v50 }
 0x6e0   : > { %v2551_v47 = vpop.f32.mrb[112].mxu1 }
 0x6e1   : > { %v2552_v53 = vadd.f32 %v7319_v52, %v2551_v47  ;;  %v5433_v55 = vpop.f32.mrb[113].mxu1  ;;  %v5732_v47 = vld [vmem:[%s8124_s15 + $0x160] ss:$28 sps:$4 sm:$0xff]  }
 0x6e2   : > { %v2554_v54 = vpop.f32.mrb[114].mxu1 }
 0x6e3   : > { %v2555_v56 = vadd.f32 %v7319_v52, %v2554_v54  ;;  %v5434_v57 = vpop.f32.mrb[115].mxu1  ;;  %5870 = vtanh.f32 %v2552_v53  ;;  %v5735_v53 = vld [vmem:[%s8124_s15 + $0x168] ss:$28 sps:$4 sm:$0xff]  }
 0x6e5   : > { %5872 = vtanh.f32 %v2555_v56  ;;  %v5738_v56 = vld [vmem:[%s8124_s15 + $0x19c] ss:$28 sps:$4 sm:$0xff]  }
 0x6e8   : > { %v2559_v58 = vpop.f32.mrb[116].mxu1 }
 0x6e9   : > { %v2560_v59 = vadd.f32 %v7319_v52, %v2559_v58  ;;  %v5437_v60 = vpop.f32.mrb[117].mxu1 }
 0x6ea   : > { %v2562_v61 = vpop.f32.mrb[118].mxu1  ;;  %v5736_v60 = vld [vmem:[%s8124_s15 + $0x198] ss:$28 sps:$4 sm:$0xff]  }
 0x6eb   : > { %v2563_v62 = vadd.f32 %v7319_v52, %v2562_v61  ;;  %v5438_v63 = vpop.f32.mrb[119].mxu1  ;;  %5874 = vtanh.f32 %v2560_v59  ;;  %v5739_v61 = vld [vmem:[%s8124_s15 + $0x1a0] ss:$28 sps:$4 sm:$0xff]  }
 0x6ed   : > { %5876 = vtanh.f32 %v2563_v62  ;;  %v5871_v3 = vpop.eup %5870 }
 0x6ef   : > { %v5873_v1 = vpop.eup %5872 }
 0x6f0   : > { %v2567_v4 = vpop.f32.mrb[120].mxu1  ;;  %v7331_v5 = vpack.c.bf16 %v5873_v1, %v5871_v3 }
 0x6f1   : > { %v2568_v6 = vadd.f32 %v7319_v52, %v2567_v4  ;;  %v5441_v7 = vpop.f32.mrb[121].mxu1 }
 0x6f2   : > { %v2570_v9 = vpop.f32.mrb[122].mxu1  ;;  %3047 = vmatmul.mubr.bf16.vlgmr.msra.gmra.mrb[140].mxu0 %v7331_v5  ;;  %3148 = vmatmul.mubr.bf16.vlgmr.msra.gmra.mrb[140].mxu1 %v7331_v5 }
 0x6f3   : > { %v2571_v11 = vadd.f32 %v7319_v52, %v2570_v9  ;;  %v5442_v12 = vpop.f32.mrb[123].mxu1  ;;  %3217 = vmatpush1.bf16.msra.mxu0 %v5708_v2  ;;  %5460 = vmatpush3.bf16.msra.mxu1 %v5711_v0  ;;  %5878 = vtanh.f32 %v2568_v6 }
 0x6f4   : > { %3056 = vmatprep.mubr.bf16.mxu0 %v6309_v50  ;;  %3157 = vmatprep.mubr.bf16.mxu1 %v6309_v50 }
 0x6f5   : > { %5880 = vtanh.f32 %v2571_v11  ;;  %3218 = vmatprep.subr.bf16.mxu0 %v5714_v8  ;;  %5461 = vmatprep.subr.bf16.mxu1 %v6307_v43  ;;  %v5875_v14 = vpop.eup %5874 }
 0x6f7   : > { %v5877_v10 = vpop.eup %5876  ;;  %3219 = vmatpush1.bf16.msra.mxu0 %v5712_v13  ;;  %5462 = vmatpush3.bf16.msra.mxu1 %v5715_v15 }
 0x6f8   : > { %v2575_v18 = vpop.f32.mrb[124].mxu1  ;;  %v7352_v19 = vpack.c.bf16 %v5877_v10, %v5875_v14  ;;  %3220 = vmatprep.subr.bf16.mxu0 %v5718_v16  ;;  %5463 = vmatprep.subr.bf16.mxu1 %v6307_v43  ;;  %v7474_v16 = vld [vmem:[%s8125_s16] sm:$0x7f] }
 0x6f9   : > { %v2576_v21 = vadd.f32 %v7319_v52, %v2575_v18  ;;  %v5445_v22 = vpop.f32.mrb[125].mxu1 }
 0x6fa   : > { %v2578_v24 = vpop.f32.mrb[126].mxu1  ;;  %3057 = vmatmul.mubr.bf16.gmra.mrb[144].mxu0 %v7352_v19  ;;  %3158 = vmatmul.mubr.bf16.gmra.mrb[144].mxu1 %v7352_v19 }
 0x6fb   : > { %v2579_v26 = vadd.f32 %v7319_v52, %v2578_v24  ;;  %v5446_v27 = vpop.f32.mrb[127].mxu1  ;;  %3066 = vmatprep.mubr.bf16.mxu0 %v6309_v50  ;;  %3167 = vmatprep.mubr.bf16.mxu1 %v6309_v50  ;;  %5882 = vtanh.f32 %v2576_v21 }
 0x6fc   : > { %3221 = vmatpush1.bf16.msra.mxu0 %v5716_v20  ;;  %5464 = vmatpush3.bf16.msra.mxu1 %v5719_v17 }
 0x6fd   : > { %5884 = vtanh.f32 %v2579_v26  ;;  %3222 = vmatprep.subr.bf16.mxu0 %v5722_v23  ;;  %5465 = vmatprep.subr.bf16.mxu1 %v6307_v43  ;;  %v5879_v33 = vpop.eup %5878 }
 0x6ff   : > { %v5881_v32 = vpop.eup %5880 }
 0x700   : > { %v2583_v34 = vpop.f32.mrb[128].mxu1  ;;  %v7380_v28 = vpack.c.bf16 %v5881_v32, %v5879_v33  ;;  %3223 = vmatpush1.bf16.msra.mxu0 %v5720_v29  ;;  %5466 = vmatpush3.bf16.msra.mxu1 %v5723_v30 }
 0x701   : > { %v2584_v35 = vadd.f32 %v7319_v52, %v2583_v34  ;;  %v5449_v38 = vpop.f32.mrb[129].mxu1  ;;  %3224 = vmatprep.subr.bf16.mxu0 %v5726_v25  ;;  %5467 = vmatprep.subr.bf16.mxu1 %v6307_v43 }
 0x702   : > { %v2586_v40 = vpop.f32.mrb[130].mxu1  ;;  %3067 = vmatmul.mubr.bf16.gmra.mrb[148].mxu0 %v7380_v28  ;;  %3168 = vmatmul.mubr.bf16.gmra.mrb[148].mxu1 %v7380_v28 }
 0x703   : > { %v2587_v31 = vadd.f32 %v7319_v52, %v2586_v40  ;;  %v5450_v41 = vpop.f32.mrb[131].mxu1  ;;  %3076 = vmatprep.mubr.bf16.mxu0 %v6309_v50  ;;  %3177 = vmatprep.mubr.bf16.mxu1 %v6309_v50  ;;  %5886 = vtanh.f32 %v2584_v35 }
 0x704   : > { %3225 = vmatpush1.bf16.msra.mxu0 %v5724_v36  ;;  %5468 = vmatpush3.bf16.msra.mxu1 %v5727_v37 }
 0x705   : > { %5888 = vtanh.f32 %v2587_v31  ;;  %3226 = vmatprep.subr.bf16.mxu0 %v5730_v39  ;;  %5469 = vmatprep.subr.bf16.mxu1 %v6307_v43  ;;  %v5883_v44 = vpop.eup %5882 }
 0x707   : > { %v5885_v48 = vpop.eup %5884 }
 0x708   : > { %v2591_v49 = vpop.f32.mrb[132].mxu1  ;;  %v7408_v51 = vpack.c.bf16 %v5885_v48, %v5883_v44  ;;  %3227 = vmatpush1.bf16.msra.mxu0 %v5728_v42  ;;  %5470 = vmatpush3.bf16.msra.mxu1 %v5731_v45 }
 0x709   : > { %v2592_v55 = vadd.f32 %v7319_v52, %v2591_v49  ;;  %v5453_v54 = vpop.f32.mrb[133].mxu1  ;;  %3228 = vmatprep.subr.bf16.mxu0 %v5734_v46  ;;  %5471 = vmatprep.subr.bf16.mxu1 %v6307_v43 }
 0x70a   : > { %v2594_v57 = vpop.f32.mrb[134].mxu1  ;;  %3077 = vmatmul.mubr.bf16.gmra.mrb[152].mxu0 %v7408_v51  ;;  %3178 = vmatmul.mubr.bf16.gmra.mrb[152].mxu1 %v7408_v51 }
 0x70b   : > { %v2595_v58 = vadd.f32 %v7319_v52, %v2594_v57  ;;  %v5454_v59 = vpop.f32.mrb[135].mxu1  ;;  %3086 = vmatprep.mubr.bf16.mxu0 %v6309_v50  ;;  %3187 = vmatprep.mubr.bf16.mxu1 %v6309_v50  ;;  %5890 = vtanh.f32 %v2592_v55 }
 0x70c   : > { %3229 = vmatpush1.bf16.msra.mxu0 %v5732_v47  ;;  %5472 = vmatpush3.bf16.msra.mxu1 %v5735_v53 }
 0x70d   : > { %5892 = vtanh.f32 %v2595_v58  ;;  %3230 = vmatprep.subr.bf16.mxu0 %v5738_v56  ;;  %5473 = vmatprep.subr.bf16.mxu1 %v6307_v43  ;;  %v5887_v62 = vpop.eup %5886 }
 0x70f   : > { %v5889_v63 = vpop.eup %5888 }
 0x710   : > { %v2599_v3 = vpop.f32.mrb[136].mxu1  ;;  %v2622_v1 = vpack.c.bf16 %v5889_v63, %v5887_v62  ;;  %3231 = vmatpush1.bf16.msra.mxu0 %v5736_v60  ;;  %5474 = vmatpush3.bf16.msra.mxu1 %v5739_v61 }
 0x711   : > { %v2600_v2 = vadd.f32 %v7319_v52, %v2599_v3  ;;  %v5457_v0 = vpop.f32.mrb[137].mxu1 }
 0x712   : > { %v2602_v4 = vpop.f32.mrb[138].mxu1  ;;  %3087 = vmatmul.mubr.bf16.gmra.mrb[156].mxu0 %v2622_v1  ;;  %3188 = vmatmul.mubr.bf16.gmra.mrb[156].mxu1 %v2622_v1 }
 0x713   : > { %5894 = vtanh.f32 %v2600_v2  ;;  %v5458_v6 = vpop.f32.mrb[139].mxu1  ;;  %3096 = vmatprep.mubr.bf16.mxu0 %v6309_v50  ;;  %3197 = vmatprep.mubr.bf16.mxu1 %v6309_v50 }
 0x715   : > { %v5891_v7 = vpop.eup %5890 }
 0x717   : > { %v5893_v8 = vpop.eup %5892 }
 0x718   : > { %v2623_v9 = vpack.c.bf16 %v5893_v8, %v5891_v7 }
 0x71a   : > { %3097 = vmatmul.mubr.bf16.gmra.mrb[160].mxu0 %v2623_v9  ;;  %3198 = vmatmul.mubr.bf16.gmra.mrb[160].mxu1 %v2623_v9 }
 0x71b   : > { %3106 = vmatprep.mubr.bf16.mxu0 %v6309_v50  ;;  %3207 = vmatprep.mubr.bf16.mxu1 %v6309_v50 }
 0x71d   : > { %v5895_v52 = vpop.eup %5894 }
 0x71e   : > { %v2624_v11 = vpack.c.bf16 %v5895_v52, %v5895_v52 }
 0x722   : > { %3107 = vmatmul.mubr.bf16.gmra.mrb[164].mxu0 %v2624_v11  ;;  %3208 = vmatmul.mubr.bf16.gmra.mrb[164].mxu1 %v2624_v11 }
 0x723   : > { %3248 = vmatprep.mubr.bf16.mxu0 %v6309_v50  ;;  %5475 = vmatprep.mubr.msk.bf16.mxu1 %vm6308_vm1, %v6307_v43 }
 0x72a   : > { %3249 = vmatmul.mubr.bf16.vlgmr.msra.gmra.mrb[168].mxu0 %v7331_v5  ;;  %5476 = vmatmul.mubr.bf16.vlgmr.msra.gmra.mrb[168].mxu1 %v7331_v5  ;;  %v2691_v5 = vlaneseq }
 0x72b   : > { %3258 = vmatprep.mubr.bf16.mxu0 %v6309_v50  ;;  %5479 = vmatprep.mubr.msk.bf16.mxu1 %vm6308_vm1, %v6307_v43 }
 0x72c   : > { %v7467_v12 = vshrl.u32 %v2691_v5, 7 }
 0x72e   : > { %v2693_v13 = vsub.s32 0, %v7467_v12  ;;  %v2701_v15 = vsub.s32 2, %v7467_v12  ;;  %v2697_v14 = vsub.s32 1, %v7467_v12  ;;  %v2709_v0 = vsub.s32 4, %v7467_v12 }
 0x72f   : > { %v2717_v7 = vsub.s32 6, %v7467_v12 }
 0x730   : > { %v7482_v10 = vrot.slane %v7474_v16, %v2701_v15  ;;  %v7485_v18 = vrot.slane %v7474_v16, %v2697_v14 }
 0x732   : > { %3259 = vmatmul.mubr.bf16.gmra.mrb[172].mxu0 %v7352_v19  ;;  %5480 = vmatmul.mubr.bf16.gmra.mrb[172].mxu1 %v7352_v19 }
 0x733   : > { %3268 = vmatprep.mubr.bf16.mxu0 %v6309_v50  ;;  %5483 = vmatprep.mubr.msk.bf16.mxu1 %vm6308_vm1, %v6307_v43 }
 0x73a   : > { %3269 = vmatmul.mubr.bf16.gmra.mrb[176].mxu0 %v7380_v28  ;;  %5484 = vmatmul.mubr.bf16.gmra.mrb[176].mxu1 %v7380_v28 }
 0x73b   : > { %3278 = vmatprep.mubr.bf16.mxu0 %v6309_v50  ;;  %5487 = vmatprep.mubr.msk.bf16.mxu1 %vm6308_vm1, %v6307_v43 }
 0x742   : > { %3279 = vmatmul.mubr.bf16.gmra.mrb[180].mxu0 %v7408_v51  ;;  %5488 = vmatmul.mubr.bf16.gmra.mrb[180].mxu1 %v7408_v51 }
 0x743   : > { %3288 = vmatprep.mubr.bf16.mxu0 %v6309_v50  ;;  %5491 = vmatprep.mubr.msk.bf16.mxu1 %vm6308_vm1, %v6307_v43 }
 0x74a   : > { %3289 = vmatmul.mubr.bf16.gmra.mrb[184].mxu0 %v2622_v1  ;;  %5492 = vmatmul.mubr.bf16.gmra.mrb[184].mxu1 %v2622_v1 }
 0x74b   : > { %3298 = vmatprep.mubr.bf16.mxu0 %v6309_v50  ;;  %5495 = vmatprep.mubr.msk.bf16.mxu1 %vm6308_vm1, %v6307_v43 }
 0x752   : > { %3299 = vmatmul.mubr.bf16.gmra.mrb[188].mxu0 %v2623_v9  ;;  %5496 = vmatmul.mubr.bf16.gmra.mrb[188].mxu1 %v2623_v9 }
 0x753   : > { %3308 = vmatprep.mubr.bf16.mxu0 %v6309_v50  ;;  %5499 = vmatprep.mubr.msk.bf16.mxu1 %vm6308_vm1, %v6307_v43  ;;  %v2705_v50 = vsub.s32 3, %v7467_v12  ;;  %v7479_v43 = vrot.slane %v7474_v16, %v2693_v13 }
 0x755   : > { %v7488_v19 = vrot.slane %v7474_v16, %v2705_v50 }
 0x75a   : > { %3309 = vmatmul.mubr.bf16.gmra.mrb[192].mxu0 %v2624_v11  ;;  %5500 = vmatmul.mubr.bf16.gmra.mrb[192].mxu1 %v2624_v11 }
 0x7c5   : > { %v3048_v20 = vpop.f32.mrb[140].mxu0  ;;  %v3149_v17 = vpop.f32.mrb[140].mxu1 }
 0x7c6   : > { %v3049_v21 = vadd.f32 %v3048_v20, %v7479_v43  ;;  %v3150_v22 = vadd.f32 %v3149_v17, %v7482_v10  ;;  %v3050_v23 = vpop.f32.mrb[141].mxu0  ;;  %v3151_v24 = vpop.f32.mrb[141].mxu1 }
 0x7c7   : > { %v3051_v26 = vadd.f32 %v3050_v23, %v7485_v18  ;;  %v3152_v27 = vadd.f32 %v3151_v24, %v7488_v19  ;;  %v3052_v29 = vpop.f32.mrb[142].mxu0  ;;  %v3153_v30 = vpop.f32.mrb[142].mxu1  ;;  %v7509_v23 = vrot.slane %v7474_v16, %v2709_v0  ;;  %v2713_v24 = vsub.s32 5, %v7467_v12 }
 0x7c8   : > { %v3053_v25 = vadd.f32 %v3052_v29, %v7479_v43  ;;  %v3154_v33 = vadd.f32 %v3153_v30, %v7482_v10  ;;  %v3054_v32 = vpop.f32.mrb[143].mxu0  ;;  %v3155_v34 = vpop.f32.mrb[143].mxu1  ;;  %v3405_v37 = vsub.f32 0.0, %v3049_v21  ;;  %v3407_v35 = vsub.f32 0.0, %v3150_v22 }
 0x7c9   : > { %v3055_v28 = vadd.f32 %v3054_v32, %v7485_v18  ;;  %v3156_v36 = vadd.f32 %v3155_v34, %v7488_v19  ;;  %v3406_v40 = vsub.f32 0.0, %v3051_v26  ;;  %v3408_v31 = vsub.f32 0.0, %v3152_v27 }
 0x7ca   : > { %v3412_v38 = vsub.f32 0.0, %v3053_v25  ;;  %v3414_v39 = vsub.f32 0.0, %v3154_v33 }
 0x7cb   : > { %v3413_v41 = vsub.f32 0.0, %v3055_v28  ;;  %v3415_v42 = vsub.f32 0.0, %v3156_v36 }
 0x7cc   : > { %v3496_v45 = vpack.c.bf16 %v3412_v38, %v3405_v37  ;;  %v3498_v46 = vpack.c.bf16 %v3414_v39, %v3407_v35 }
 0x7cd   : > { %v3497_v44 = vpack.c.bf16 %v3413_v41, %v3406_v40  ;;  %v3499_v48 = vpack.c.bf16 %v3415_v42, %v3408_v31  ;;  %v3058_v49 = vpop.f32.mrb[144].mxu0  ;;  %v3159_v51 = vpop.f32.mrb[144].mxu1  ;;  %v7517_v40 = vrot.slane %v7474_v16, %v2717_v7 }
 0x7ce   : > { %v3546_v47 = vmul.bf16 1069105081, %v3496_v45  ;;  %v3552_v53 = vmul.bf16 1069105081, %v3498_v46  ;;  %v3059_v55 = vadd.f32 %v3058_v49, %v7479_v43  ;;  %v3060_v54 = vpop.f32.mrb[145].mxu0  ;;  %v3161_v56 = vpop.f32.mrb[145].mxu1  ;;  %v3160_v59 = vadd.f32 %v3159_v51, %v7482_v10 }
 0x7cf   : > { %v3549_v57 = vmul.bf16 1069105081, %v3497_v44  ;;  %v3555_v58 = vmul.bf16 1069105081, %v3499_v48  ;;  %v3061_v60 = vadd.f32 %v3060_v54, %v7485_v18  ;;  %v3062_v61 = vpop.f32.mrb[146].mxu0  ;;  %v3163_v62 = vpop.f32.mrb[146].mxu1  ;;  %v3162_v63 = vadd.f32 %v3161_v56, %v7488_v19 }
 0x7d0   : > { %5896 = vpow.bf16 %v3546_v47  ;;  %v3063_v3 = vadd.f32 %v3062_v61, %v7479_v43  ;;  %v3064_v1 = vpop.f32.mrb[147].mxu0  ;;  %v3165_v2 = vpop.f32.mrb[147].mxu1  ;;  %v3419_v4 = vsub.f32 0.0, %v3059_v55  ;;  %v3164_v6 = vadd.f32 %v3163_v62, %v7482_v10 }
 0x7d1   : > { %5898 = vpow.bf16 %v3552_v53  ;;  %v3065_v9 = vadd.f32 %v3064_v1, %v7485_v18  ;;  %v3166_v52 = vadd.f32 %v3165_v2, %v7488_v19  ;;  %v3421_v11 = vsub.f32 0.0, %v3160_v59 }
 0x7d2   : > { %5900 = vpow.bf16 %v3549_v57  ;;  %v3426_v8 = vsub.f32 0.0, %v3063_v3  ;;  %v3420_v5 = vsub.f32 0.0, %v3061_v60  ;;  %v3428_v13 = vsub.f32 0.0, %v3164_v6 }
 0x7d3   : > { %5902 = vpow.bf16 %v3555_v58  ;;  %v3422_v15 = vsub.f32 0.0, %v3162_v63  ;;  %v3427_v50 = vsub.f32 0.0, %v3065_v9  ;;  %v3429_v20 = vsub.f32 0.0, %v3166_v52 }
 0x7d4   : > { %v3503_v14 = vpack.c.bf16 %v3426_v8, %v3419_v4  ;;  %v3505_v17 = vpack.c.bf16 %v3428_v13, %v3421_v11  ;;  %v7520_v45 = vrot.slane %v7474_v16, %v2713_v24 }
 0x7d5   : > { %v3068_v21 = vpop.f32.mrb[148].mxu0  ;;  %v3169_v22 = vpop.f32.mrb[148].mxu1  ;;  %v3504_v27 = vpack.c.bf16 %v3427_v50, %v3420_v5  ;;  %v3506_v29 = vpack.c.bf16 %v3429_v20, %v3422_v15 }
 0x7d6   : > { %v3567_v26 = vmul.bf16 1069105081, %v3503_v14  ;;  %v3069_v30 = vadd.f32 %v3068_v21, %v7479_v43  ;;  %v3070_v25 = vpop.f32.mrb[149].mxu0  ;;  %v3171_v33 = vpop.f32.mrb[149].mxu1  ;;  %v3573_v32 = vmul.bf16 1069105081, %v3505_v17  ;;  %v3170_v34 = vadd.f32 %v3169_v22, %v7482_v10 }
 0x7d7   : > { %v3071_v28 = vadd.f32 %v3070_v25, %v7485_v18  ;;  %v3172_v36 = vadd.f32 %v3171_v33, %v7488_v19  ;;  %v3072_v37 = vpop.f32.mrb[150].mxu0  ;;  %v3173_v35 = vpop.f32.mrb[150].mxu1  ;;  %v3570_v38 = vmul.bf16 1069105081, %v3504_v27  ;;  %v3576_v39 = vmul.bf16 1069105081, %v3506_v29 }
 0x7d8   : > { %5904 = vpow.bf16 %v3567_v26  ;;  %v3074_v12 = vpop.f32.mrb[151].mxu0  ;;  %v3433_v31 = vsub.f32 0.0, %v3069_v30  ;;  %v3435_v41 = vsub.f32 0.0, %v3170_v34  ;;  %v3175_v42 = vpop.f32.mrb[151].mxu1  ;;  %v3073_v46 = vadd.f32 %v3072_v37, %v7479_v43 }
 0x7d9   : > { %5906 = vpow.bf16 %v3573_v32  ;;  %v3174_v44 = vadd.f32 %v3173_v35, %v7482_v10  ;;  %v3075_v48 = vadd.f32 %v3074_v12, %v7485_v18  ;;  %v3434_v51 = vsub.f32 0.0, %v3071_v28 }
 0x7da   : > { %5908 = vpow.bf16 %v3570_v38  ;;  %v3436_v47 = vsub.f32 0.0, %v3172_v36  ;;  %v3176_v53 = vadd.f32 %v3175_v42, %v7488_v19  ;;  %v3440_v57 = vsub.f32 0.0, %v3073_v46 }
 0x7db   : > { %v5897_v49 = vpop.eup %5896  ;;  %5910 = vpow.bf16 %v3576_v39  ;;  %v3442_v58 = vsub.f32 0.0, %v3174_v44  ;;  %v3441_v61 = vsub.f32 0.0, %v3075_v48 }
 0x7dc   : > { %v5899_v55 = vpop.eup %5898  ;;  %v3692_v54 = vunpack.c.l.bf16 %v5897_v49  ;;  %v3699_v56 = vunpack.c.h.bf16 %v5897_v49  ;;  %v3443_v62 = vsub.f32 0.0, %v3176_v53  ;;  %v7534_v20 = vpack.c.bf16 %v3440_v57, %v3433_v31 }
 0x7dd   : > { %v5901_v16 = vpop.eup %5900  ;;  %v3694_v59 = vunpack.c.l.bf16 %v5899_v55  ;;  %v3701_v60 = vunpack.c.h.bf16 %v5899_v55  ;;  %v3078_v63 = vpop.f32.mrb[152].mxu0  ;;  %v7540_v26 = vpack.c.bf16 %v3442_v58, %v3435_v41  ;;  %v7543_v29 = vpack.c.bf16 %v3441_v61, %v3434_v51 }
 0x7de   : > { %v3179_v3 = vpop.f32.mrb[152].mxu1  ;;  %v5903_v1 = vpop.eup %5902  ;;  %v3783_v2 = vadd.f32 1.0, %v3692_v54  ;;  %v3790_v0 = vadd.f32 1.0, %v3699_v56  ;;  %v3693_v4 = vunpack.c.l.bf16 %v5901_v16  ;;  %v3700_v6 = vunpack.c.h.bf16 %v5901_v16 }
 0x7df   : > { %v7526_v7 = vpop.f32.mrb[153].mxu0  ;;  %v7528_v8 = vpop.f32.mrb[153].mxu1  ;;  %v3785_v9 = vadd.f32 1.0, %v3694_v59  ;;  %v3792_v52 = vadd.f32 1.0, %v3701_v60  ;;  %v3695_v11 = vunpack.c.l.bf16 %v5903_v1  ;;  %v3702_v5 = vunpack.c.h.bf16 %v5903_v1 }
 0x7e0   : > { %v7530_v13 = vpop.f32.mrb[154].mxu0  ;;  %v7532_v15 = vpop.f32.mrb[154].mxu1  ;;  %5912 = vrcp.f32 %v3783_v2  ;;  %v3784_v14 = vadd.f32 1.0, %v3693_v4  ;;  %v3791_v50 = vadd.f32 1.0, %v3700_v6  ;;  %v3588_v27 = vmul.bf16 1069105081, %v7534_v20 }
 0x7e1   : > { %v7536_v17 = vpop.f32.mrb[155].mxu0  ;;  %v7538_v21 = vpop.f32.mrb[155].mxu1  ;;  %5914 = vrcp.f32 %v3790_v0  ;;  %v3786_v22 = vadd.f32 1.0, %v3695_v11  ;;  %v3793_v24 = vadd.f32 1.0, %v3702_v5  ;;  %v7545_v30 = vpack.c.bf16 %v3443_v62, %v3436_v47 }
 0x7e2   : > { %5916 = vrcp.f32 %v3785_v9  ;;  %v3594_v33 = vmul.bf16 1069105081, %v7540_v26  ;;  %v7549_v32 = vadd.f32 %v3078_v63, %v7479_v43  ;;  %v7552_v34 = vadd.f32 %v3179_v3, %v7482_v10 }
 0x7e3   : > { %v5905_v25 = vpop.eup %5904  ;;  %5918 = vrcp.f32 %v3792_v52  ;;  %v3591_v35 = vmul.bf16 1069105081, %v7543_v29  ;;  %v3597_v31 = vmul.bf16 1069105081, %v7545_v30  ;;  %v3081_v4 = vadd.f32 %v7526_v7, %v7485_v18 }
 0x7e4   : > { %v5907_v28 = vpop.eup %5906  ;;  %5920 = vrcp.f32 %v3784_v14  ;;  %v3706_v36 = vunpack.c.l.bf16 %v5905_v25  ;;  %v3713_v37 = vunpack.c.h.bf16 %v5905_v25  ;;  %v3447_v63 = vsub.f32 0.0, %v7549_v32 }
 0x7e5   : > { %v5909_v38 = vpop.eup %5908  ;;  %5922 = vrcp.f32 %v3791_v50  ;;  %v3708_v39 = vunpack.c.l.bf16 %v5907_v28  ;;  %v3715_v12 = vunpack.c.h.bf16 %v5907_v28  ;;  %v3088_v41 = vpop.f32.mrb[156].mxu0  ;;  %v3449_v3 = vsub.f32 0.0, %v7552_v34 }
 0x7e6   : > { %v7556_v42 = vpop.f32.mrb[156].mxu1  ;;  %v5911_v46 = vpop.eup %5910  ;;  %5924 = vrcp.f32 %v3786_v22  ;;  %v3797_v44 = vadd.f32 1.0, %v3706_v36  ;;  %v3804_v48 = vadd.f32 1.0, %v3713_v37  ;;  %v3707_v49 = vunpack.c.l.bf16 %v5909_v38 }
 0x7e7   : > { %v7558_v51 = vpop.f32.mrb[157].mxu0  ;;  %v7560_v47 = vpop.f32.mrb[157].mxu1  ;;  %5926 = vrcp.f32 %v3793_v24  ;;  %v3799_v53 = vadd.f32 1.0, %v3708_v39  ;;  %v3806_v55 = vadd.f32 1.0, %v3715_v12  ;;  %v3714_v54 = vunpack.c.h.bf16 %v5909_v38 }
 0x7e8   : > { %v7562_v56 = vpop.f32.mrb[158].mxu0  ;;  %v7564_v57 = vpop.f32.mrb[158].mxu1  ;;  %5928 = vrcp.f32 %v3797_v44  ;;  %v3798_v58 = vadd.f32 1.0, %v3707_v49  ;;  %v3709_v16 = vunpack.c.l.bf16 %v5911_v46  ;;  %v3716_v59 = vunpack.c.h.bf16 %v5911_v46 }
 0x7e9   : > { %v7566_v60 = vpop.f32.mrb[159].mxu0  ;;  %v7568_v61 = vpop.f32.mrb[159].mxu1  ;;  %5930 = vrcp.f32 %v3804_v48  ;;  %v3805_v62 = vadd.f32 1.0, %v3714_v54  ;;  %v3182_v9 = vadd.f32 %v7528_v8, %v7488_v19  ;;  %v3083_v52 = vadd.f32 %v7530_v13, %v7479_v43 }
 0x7ea   : > { %v5913_v1 = vpop.eup %5912  ;;  %5932 = vrcp.f32 %v3799_v53  ;;  %v3800_v2 = vadd.f32 1.0, %v3709_v16  ;;  %v3807_v0 = vadd.f32 1.0, %v3716_v59  ;;  %v3184_v11 = vadd.f32 %v7532_v15, %v7482_v10 }
 0x7eb   : > { %v5915_v6 = vpop.eup %5914  ;;  %5934 = vrcp.f32 %v3806_v55  ;;  %v3448_v14 = vsub.f32 0.0, %v3081_v4  ;;  %v3085_v50 = vadd.f32 %v7536_v17, %v7485_v18  ;;  %v3186_v7 = vadd.f32 %v7538_v21, %v7488_v19 }
 0x7ec   : > { %v5917_v5 = vpop.eup %5916  ;;  %5936 = vrcp.f32 %v3798_v58  ;;  %v3450_v24 = vsub.f32 0.0, %v3182_v9  ;;  %v3454_v25 = vsub.f32 0.0, %v3083_v52  ;;  %v3456_v8 = vsub.f32 0.0, %v3184_v11 }
 0x7ed   : > { %v5919_v22 = vpop.eup %5918  ;;  %5938 = vrcp.f32 %v3805_v62  ;;  %v7585_v32 = vpop.f32.mrb[160].mxu0  ;;  %v3455_v15 = vsub.f32 0.0, %v3085_v50  ;;  %v3457_v28 = vsub.f32 0.0, %v3186_v7  ;;  %v7590_v36 = vadd.f32 %v3088_v41, %v7479_v43 }
 0x7ee   : > { %v7587_v13 = vpop.f32.mrb[160].mxu1  ;;  %v5921_v34 = vpop.eup %5920  ;;  %5940 = vrcp.f32 %v3800_v2  ;;  %v3517_v39 = vpack.c.bf16 %v3454_v25, %v3447_v63  ;;  %v3519_v12 = vpack.c.bf16 %v3456_v8, %v3449_v3  ;;  %v3190_v26 = vadd.f32 %v7556_v42, %v7482_v10 }
 0x7ef   : > { %v7592_v17 = vpop.f32.mrb[161].mxu0  ;;  %v7594_v37 = vpop.f32.mrb[161].mxu1  ;;  %v4790_v38 = vpack.c.bf16 %v5921_v34, %v5913_v1  ;;  %5942 = vrcp.f32 %v3807_v0  ;;  %v3518_v41 = vpack.c.bf16 %v3455_v15, %v3448_v14  ;;  %v3520_v53 = vpack.c.bf16 %v3457_v28, %v3450_v24 }
 0x7f0   : > { %v5923_v21 = vpop.eup %5922  ;;  %v7596_v46 = vpop.f32.mrb[162].mxu0  ;;  %5944 = vpow.bf16 %v3588_v27  ;;  %v3609_v20 = vmul.bf16 1069105081, %v3517_v39  ;;  %v3615_v27 = vmul.bf16 1069105081, %v3519_v12  ;;  %v3461_v2 = vsub.f32 0.0, %v7590_v36 }
 0x7f1   : > { %v7598_v44 = vpop.f32.mrb[162].mxu1  ;;  %v5925_v48 = vpop.eup %5924  ;;  %v4794_v49 = vpack.c.bf16 %v5923_v21, %v5915_v6  ;;  %4317 = vst [vmem:[%s7608_s19] sm:$0xff] %v4790_v38  ;;  %5946 = vpow.bf16 %v3594_v33  ;;  %v3612_v63 = vmul.bf16 1069105081, %v3518_v41  ;;  %v3618_v3 = vmul.bf16 1069105081, %v3520_v53 }
 0x7f2   : > { %v7602_v55 = vpop.f32.mrb[163].mxu0  ;;  %v7604_v54 = vpop.f32.mrb[163].mxu1  ;;  %v4791_v16 = vpack.c.bf16 %v5925_v48, %v5917_v5  ;;  %5948 = vpow.bf16 %v3591_v35  ;;  %v3091_v33 = vadd.f32 %v7558_v51, %v7485_v18  ;;  %v3192_v29 = vadd.f32 %v7560_v47, %v7488_v19 }
 0x7f3   : > { %v5927_v58 = vpop.eup %5926  ;;  %4322 = vst [vmem:[%s7608_s19 + $0x1c] sm:$0xff] %v4794_v49  ;;  %5950 = vpow.bf16 %v3597_v31  ;;  %v3093_v35 = vadd.f32 %v7562_v56, %v7479_v43  ;;  %v3194_v30 = vadd.f32 %v7564_v57, %v7482_v10  ;;  %v3463_v4 = vsub.f32 0.0, %v3190_v26 }
 0x7f4   : > { %v5929_v59 = vpop.eup %5928  ;;  %v4795_v62 = vpack.c.bf16 %v5927_v58, %v5919_v22  ;;  %4318 = vst [vmem:[%s7608_s19 + $0x8] sm:$0xff] %v4791_v16  ;;  %5952 = vpow.bf16 %v3609_v20  ;;  %v3462_v6 = vsub.f32 0.0, %v3091_v33  ;;  %v3095_v42 = vadd.f32 %v7566_v60, %v7485_v18 }
 0x7f5   : > { %v5931_v1 = vpop.eup %5930  ;;  %5954 = vpow.bf16 %v3615_v27  ;;  %v7633_v51 = vpop.f32.mrb[164].mxu0  ;;  %v3464_v47 = vsub.f32 0.0, %v3192_v29  ;;  %v3468_v11 = vsub.f32 0.0, %v3093_v35  ;;  %v3470_v5 = vsub.f32 0.0, %v3194_v30 }
 0x7f6   : > { %v5933_v0 = vpop.eup %5932  ;;  %4323 = vst [vmem:[%s7608_s19 + $0x24] sm:$0xff] %v4795_v62  ;;  %v7635_v9 = vpop.f32.mrb[164].mxu1  ;;  %5956 = vpow.bf16 %v3612_v63  ;;  %v3469_v7 = vsub.f32 0.0, %v3095_v42  ;;  %v3196_v60 = vadd.f32 %v7568_v61, %v7488_v19  ;;  %v7645_v28 = vadd.f32 %v7585_v32, %v7479_v43 }
 0x7f7   : > { %v5935_v31 = vpop.eup %5934  ;;  %v7637_v56 = vpop.f32.mrb[165].mxu0  ;;  %5958 = vpow.bf16 %v3618_v3  ;;  %v3524_v34 = vpack.c.bf16 %v3468_v11, %v3461_v2  ;;  %v3526_v15 = vpack.c.bf16 %v3470_v5, %v3463_v4  ;;  %v7652_v48 = vadd.f32 %v7587_v13, %v7482_v10 }
 0x7f8   : > { %v5937_v52 = vpop.eup %5936  ;;  %v7639_v14 = vpop.f32.mrb[165].mxu1  ;;  %v7648_v12 = vpack.c.bf16 %v3469_v7, %v3462_v6  ;;  %v3471_v61 = vsub.f32 0.0, %v3196_v60  ;;  %v3475_v32 = vsub.f32 0.0, %v7645_v28  ;;  %v7668_v3 = vadd.f32 %v7594_v37, %v7488_v19 }
 0x7f9   : > { %v5939_v57 = vpop.eup %5938  ;;  %v4798_v50 = vpack.c.bf16 %v5937_v52, %v5929_v59  ;;  %v3112_v22 = vpop.f32.mrb[166].mxu0  ;;  %v3630_v41 = vmul.bf16 1069105081, %v3524_v34  ;;  %v3636_v53 = vmul.bf16 1069105081, %v3526_v15  ;;  %v3477_v27 = vsub.f32 0.0, %v7652_v48 }
 0x7fa   : > { %v3213_v24 = vpop.f32.mrb[166].mxu1  ;;  %v5941_v25 = vpop.eup %5940  ;;  %v4802_v8 = vpack.c.bf16 %v5939_v57, %v5931_v1  ;;  %v3633_v16 = vmul.bf16 1069105081, %v7648_v12  ;;  %v7658_v20 = vpack.c.bf16 %v3471_v61, %v3464_v47  ;;  %v7663_v59 = vadd.f32 %v7592_v17, %v7485_v18 }
 0x7fb   : > { %v3113_v36 = vpop.f32.mrb[167].mxu0  ;;  %v3214_v21 = vpop.f32.mrb[167].mxu1  ;;  %4326 = vst [vmem:[%s7608_s19 + $0x38] sm:$0xff] %v4798_v50  ;;  %v4799_v39 = vpack.c.bf16 %v5941_v25, %v5933_v0  ;;  %5960 = vpow.bf16 %v3630_v41  ;;  %v3210_v28 = vadd.f32 %v7635_v9, %v7482_v10 }
 0x7fc   : > { %v5943_v38 = vpop.eup %5942  ;;  %4330 = vst [vmem:[%s7608_s19 + $0x54] sm:$0xff] %v4802_v8  ;;  %5962 = vpow.bf16 %v3636_v53  ;;  %v3639_v33 = vmul.bf16 1069105081, %v7658_v20 }
 0x7fd   : > { %v4803_v49 = vpack.c.bf16 %v5943_v38, %v5935_v31  ;;  %v5945_v58 = vpop.eup %5944  ;;  %4327 = vst [vmem:[%s7608_s19 + $0x40] sm:$0xff] %v4799_v39  ;;  %v7671_v0 = vpop.f32.mrb[168].mxu0 }
 0x7fe   : > { %v5947_v13 = vpop.eup %5946  ;;  %v3720_v62 = vunpack.c.l.bf16 %v5945_v58  ;;  %v3727_v63 = vunpack.c.h.bf16 %v5945_v58  ;;  %v7673_v29 = vpop.f32.mrb[168].mxu1 }
 0x7ff   : > { %4331 = vst [vmem:[%s7608_s19 + $0x5c] sm:$0xff] %v4803_v49  ;;  %v5949_v1 = vpop.eup %5948  ;;  %v3722_v2 = vunpack.c.l.bf16 %v5947_v13  ;;  %v3729_v26 = vunpack.c.h.bf16 %v5947_v13  ;;  %v7675_v6 = vpop.f32.mrb[169].mxu0 }
 0x800   : > { %v5951_v17 = vpop.eup %5950  ;;  %v3811_v35 = vadd.f32 1.0, %v3720_v62  ;;  %v3818_v30 = vadd.f32 1.0, %v3727_v63  ;;  %v3721_v31 = vunpack.c.l.bf16 %v5949_v1  ;;  %v3728_v4 = vunpack.c.h.bf16 %v5949_v1  ;;  %v5477_v42 = vpop.f32.mrb[169].mxu1 }
 0x801   : > { %v5953_v37 = vpop.eup %5952  ;;  %v3813_v52 = vadd.f32 1.0, %v3722_v2  ;;  %v3820_v47 = vadd.f32 1.0, %v3729_v26  ;;  %v3723_v11 = vunpack.c.l.bf16 %v5951_v17  ;;  %v3730_v5 = vunpack.c.h.bf16 %v5951_v17  ;;  %v7677_v57 = vpop.f32.mrb[170].mxu0 }
 0x802   : > { %v7679_v50 = vpop.f32.mrb[170].mxu1  ;;  %v5955_v7 = vpop.eup %5954  ;;  %5964 = vrcp.f32 %v3811_v35  ;;  %v3812_v60 = vadd.f32 1.0, %v3721_v31  ;;  %v3819_v22 = vadd.f32 1.0, %v3728_v4  ;;  %v3734_v24 = vunpack.c.l.bf16 %v5953_v37 }
 0x803   : > { %v7681_v25 = vpop.f32.mrb[171].mxu0  ;;  %v5478_v8 = vpop.f32.mrb[171].mxu1  ;;  %5966 = vrcp.f32 %v3818_v30  ;;  %v3814_v15 = vadd.f32 1.0, %v3723_v11  ;;  %v3821_v36 = vadd.f32 1.0, %v3730_v5  ;;  %v3741_v21 = vunpack.c.h.bf16 %v5953_v37 }
 0x804   : > { %v5957_v34 = vpop.eup %5956  ;;  %5968 = vrcp.f32 %v3813_v52  ;;  %v3825_v39 = vadd.f32 1.0, %v3734_v24  ;;  %v3736_v61 = vunpack.c.l.bf16 %v5955_v7  ;;  %v3743_v49 = vunpack.c.h.bf16 %v5955_v7 }
 0x805   : > { %v5959_v38 = vpop.eup %5958  ;;  %5970 = vrcp.f32 %v3820_v47  ;;  %v3832_v41 = vadd.f32 1.0, %v3741_v21  ;;  %v3735_v53 = vunpack.c.l.bf16 %v5957_v34  ;;  %v3742_v58 = vunpack.c.h.bf16 %v5957_v34  ;;  %v7683_v17 = vpop.f32.mrb[172].mxu0 }
 0x806   : > { %5972 = vrcp.f32 %v3812_v60  ;;  %v3827_v13 = vadd.f32 1.0, %v3736_v61  ;;  %v3834_v62 = vadd.f32 1.0, %v3743_v49  ;;  %v3737_v63 = vunpack.c.l.bf16 %v5959_v38  ;;  %v7685_v35 = vpop.f32.mrb[172].mxu1  ;;  %v7689_v42 = vpop.f32.mrb[173].mxu0 }
 0x807   : > { %5974 = vrcp.f32 %v3819_v22  ;;  %v3826_v1 = vadd.f32 1.0, %v3735_v53  ;;  %v3833_v2 = vadd.f32 1.0, %v3742_v58  ;;  %v3744_v26 = vunpack.c.h.bf16 %v5959_v38  ;;  %v5481_v37 = vpop.f32.mrb[173].mxu1  ;;  %v5961_v52 = vpop.eup %5960 }
 0x808   : > { %5976 = vrcp.f32 %v3814_v15  ;;  %v3828_v30 = vadd.f32 1.0, %v3737_v63  ;;  %v3476_v31 = vsub.f32 0.0, %v7663_v59  ;;  %v3478_v4 = vsub.f32 0.0, %v7668_v3  ;;  %v7695_v7 = vpop.f32.mrb[174].mxu0  ;;  %v7697_v60 = vpop.f32.mrb[174].mxu1 }
 0x809   : > { %5978 = vrcp.f32 %v3821_v36  ;;  %v3835_v47 = vadd.f32 1.0, %v3744_v26  ;;  %v3103_v11 = vadd.f32 %v7596_v46, %v7479_v43  ;;  %v3204_v5 = vadd.f32 %v7598_v44, %v7482_v10  ;;  %v5963_v22 = vpop.eup %5962  ;;  %v7701_v8 = vpop.f32.mrb[175].mxu0 }
 0x80a   : > { %5980 = vrcp.f32 %v3825_v39  ;;  %v3748_v59 = vunpack.c.l.bf16 %v5961_v52  ;;  %v3755_v3 = vunpack.c.h.bf16 %v5961_v52  ;;  %v3105_v24 = vadd.f32 %v7602_v55, %v7485_v18  ;;  %v5482_v34 = vpop.f32.mrb[175].mxu1 }
 0x80b   : > { %5982 = vrcp.f32 %v3832_v41  ;;  %v3750_v15 = vunpack.c.l.bf16 %v5963_v22  ;;  %v3757_v46 = vunpack.c.h.bf16 %v5963_v22  ;;  %v3482_v36 = vsub.f32 0.0, %v3103_v11 }
 0x80c   : > { %v5965_v21 = vpop.eup %5964  ;;  %5984 = vrcp.f32 %v3827_v13  ;;  %v3839_v44 = vadd.f32 1.0, %v3748_v59  ;;  %v3846_v38 = vadd.f32 1.0, %v3755_v3  ;;  %v3484_v61 = vsub.f32 0.0, %v3204_v5 }
 0x80d   : > { %v5967_v49 = vpop.eup %5966  ;;  %5986 = vrcp.f32 %v3834_v62  ;;  %v3841_v39 = vadd.f32 1.0, %v3750_v15  ;;  %v3848_v53 = vadd.f32 1.0, %v3757_v46  ;;  %v7705_v58 = vpack.c.bf16 %v3482_v36, %v3475_v32  ;;  %v7718_v32 = vpop.f32.mrb[176].mxu0 }
 0x80e   : > { %v5969_v55 = vpop.eup %5968  ;;  %5988 = vrcp.f32 %v3826_v1  ;;  %v7709_v41 = vpack.c.bf16 %v3484_v61, %v3477_v27  ;;  %v3483_v63 = vsub.f32 0.0, %v3105_v24  ;;  %v3206_v13 = vadd.f32 %v7604_v54, %v7488_v19  ;;  %v7720_v1 = vpop.f32.mrb[176].mxu1 }
 0x80f   : > { %v5971_v26 = vpop.eup %5970  ;;  %5990 = vrcp.f32 %v3833_v2  ;;  %v3651_v62 = vmul.bf16 1069105081, %v7705_v58  ;;  %v3109_v37 = vadd.f32 %v7633_v51, %v7479_v43  ;;  %v7725_v2 = vpop.f32.mrb[177].mxu0  ;;  %v3491_v10 = vsub.f32 0.0, %v3210_v28 }
 0x810   : > { %v5973_v48 = vpop.eup %5972  ;;  %5992 = vrcp.f32 %v3828_v30  ;;  %v3657_v27 = vmul.bf16 1069105081, %v7709_v41  ;;  %v7723_v52 = vpack.c.bf16 %v3483_v63, %v3476_v31  ;;  %v3485_v54 = vsub.f32 0.0, %v3206_v13  ;;  %v5485_v11 = vpop.f32.mrb[177].mxu1 }
 0x811   : > { %v5975_v5 = vpop.eup %5974  ;;  %v4806_v43 = vpack.c.bf16 %v5973_v48, %v5965_v21  ;;  %5994 = vrcp.f32 %v3835_v47  ;;  %v3489_v51 = vsub.f32 0.0, %v3109_v37  ;;  %v7727_v9 = vpop.f32.mrb[178].mxu0  ;;  %v3540_v36 = vpack.c.bf16 %v3491_v10, %v3491_v10 }
 0x812   : > { %v7729_v22 = vpop.f32.mrb[178].mxu1  ;;  %v5977_v30 = vpop.eup %5976  ;;  %v4810_v59 = vpack.c.bf16 %v5975_v5, %v5967_v49  ;;  %5996 = vrcp.f32 %v3839_v44  ;;  %v3654_v31 = vmul.bf16 1069105081, %v7723_v52  ;;  %v3534_v3 = vpack.c.bf16 %v3485_v54, %v3478_v4 }
 0x813   : > { %v7732_v24 = vpop.f32.mrb[179].mxu0  ;;  %v5486_v34 = vpop.f32.mrb[179].mxu1  ;;  %4334 = vst [vmem:[%s7608_s19 + $0x70] sm:$0xff] %v4806_v43  ;;  %v4807_v47 = vpack.c.bf16 %v5977_v30, %v5969_v55  ;;  %5998 = vrcp.f32 %v3846_v38  ;;  %v3538_v46 = vpack.c.bf16 %v3489_v51, %v3489_v51  ;;  %v3111_v44 = vadd.f32 %v7637_v56, %v7485_v18 }
 0x814   : > { %v5979_v15 = vpop.eup %5978  ;;  %4338 = vst [vmem:[%s7608_s19 + $0x8c] sm:$0xff] %v4810_v59  ;;  %6000 = vrcp.f32 %v3841_v39  ;;  %v3660_v49 = vmul.bf16 1069105081, %v3534_v3  ;;  %v3678_v41 = vmul.bf16 1069105081, %v3540_v36  ;;  %v3212_v55 = vadd.f32 %v7639_v14, %v7488_v19 }
 0x815   : > { %v5981_v21 = vpop.eup %5980  ;;  %v4811_v61 = vpack.c.bf16 %v5979_v15, %v5971_v26  ;;  %4335 = vst [vmem:[%s7608_s19 + $0x78] sm:$0xff] %v4807_v47  ;;  %6002 = vrcp.f32 %v3848_v53  ;;  %v3672_v58 = vmul.bf16 1069105081, %v3538_v46  ;;  %v3490_v63 = vsub.f32 0.0, %v3111_v44  ;;  %v7754_v12 = vpop.f32.mrb[180].mxu0 }
 0x816   : > { %v5983_v4 = vpop.eup %5982  ;;  %6004 = vpow.bf16 %v3633_v16  ;;  %v3251_v39 = vadd.f32 %v7671_v0, %v7509_v23  ;;  %v3352_v18 = vadd.f32 %v7673_v29, %v7517_v40  ;;  %v3492_v53 = vsub.f32 0.0, %v3212_v55  ;;  %v7756_v16 = vpop.f32.mrb[180].mxu1 }
 0x817   : > { %v5985_v38 = vpop.eup %5984  ;;  %4339 = vst [vmem:[%s7608_s19 + $0x94] sm:$0xff] %v4811_v61  ;;  %6006 = vpow.bf16 %v3639_v33  ;;  %v3253_v19 = vadd.f32 %v7675_v6, %v7520_v45  ;;  %v3255_v14 = vadd.f32 %v7677_v57, %v7509_v23  ;;  %v3539_v0 = vpack.c.bf16 %v3490_v63, %v3490_v63  ;;  %v7758_v37 = vpop.f32.mrb[181].mxu0 }
 0x818   : > { %v5987_v56 = vpop.eup %5986  ;;  %6008 = vpow.bf16 %v3651_v62  ;;  %v3409_v26 = vsub.f32 0.0, %v3251_v39  ;;  %v3411_v29 = vsub.f32 0.0, %v3352_v18  ;;  %v5489_v20 = vpop.f32.mrb[181].mxu1  ;;  %v3541_v6 = vpack.c.bf16 %v3492_v53, %v3492_v53 }
 0x819   : > { %v5989_v13 = vpop.eup %5988  ;;  %6010 = vpow.bf16 %v3657_v27  ;;  %v3410_v48 = vsub.f32 0.0, %v3253_v19  ;;  %v7760_v52 = vpop.f32.mrb[182].mxu0  ;;  %v3675_v62 = vmul.bf16 1069105081, %v3539_v0  ;;  %v3416_v5 = vsub.f32 0.0, %v3255_v14 }
 0x81a   : > { %v5991_v33 = vpop.eup %5990  ;;  %v4814_v28 = vpack.c.bf16 %v5989_v13, %v5981_v21  ;;  %v7762_v57 = vpop.f32.mrb[182].mxu1  ;;  %6012 = vpow.bf16 %v3654_v31  ;;  %v3681_v27 = vmul.bf16 1069105081, %v3541_v6  ;;  %v3355_v59 = vadd.f32 %v7679_v50, %v7517_v40 }
 0x81b   : > { %v5993_v54 = vpop.eup %5992  ;;  %v4818_v11 = vpack.c.bf16 %v5991_v33, %v5983_v4  ;;  %v7764_v43 = vpop.f32.mrb[183].mxu0  ;;  %6014 = vpow.bf16 %v3660_v49  ;;  %v3500_v31 = vpack.c.bf16 %v3416_v5, %v3409_v26  ;;  %v3257_v15 = vadd.f32 %v7681_v25, %v7520_v45 }
 0x81c   : > { %v5490_v51 = vpop.f32.mrb[183].mxu1  ;;  %v5995_v10 = vpop.eup %5994  ;;  %4342 = vst [vmem:[%s7608_s19 + $0xa8] sm:$0xff] %v4814_v28  ;;  %v4815_v30 = vpack.c.bf16 %v5993_v54, %v5985_v38  ;;  %6016 = vpow.bf16 %v3672_v58  ;;  %v3418_v46 = vsub.f32 0.0, %v3355_v59  ;;  %v7779_v36 = vadd.f32 %v7683_v17, %v7509_v23 }
 0x81d   : > { %v7769_v3 = vpop.eup %5996  ;;  %4346 = vst [vmem:[%s7608_s19 + $0xc4] sm:$0xff] %v4818_v11  ;;  %v4819_v34 = vpack.c.bf16 %v5995_v10, %v5987_v56  ;;  %6018 = vpow.bf16 %v3678_v41  ;;  %v7783_v50 = vadd.f32 %v7685_v35, %v7517_v40  ;;  %v3558_v61 = vmul.bf16 1069105081, %v3500_v31  ;;  %v7794_v17 = vpop.f32.mrb[184].mxu0 }
 0x81e   : > { %v7774_v47 = vpop.eup %5998  ;;  %4343 = vst [vmem:[%s7608_s19 + $0xb0] sm:$0xff] %v4815_v30  ;;  %6020 = vpow.bf16 %v3675_v62  ;;  %v3417_v49 = vsub.f32 0.0, %v3257_v15  ;;  %v7790_v25 = vadd.f32 %v7689_v42, %v7520_v45  ;;  %v3502_v4 = vpack.c.bf16 %v3418_v46, %v3411_v29  ;;  %v7796_v58 = vpop.f32.mrb[184].mxu1 }
 0x81f   : > { %v7785_v21 = vpop.eup %6000  ;;  %4347 = vst [vmem:[%s7608_s19 + $0xcc] sm:$0xff] %v4819_v34  ;;  %6022 = vpow.bf16 %v3681_v27  ;;  %v3423_v41 = vsub.f32 0.0, %v7779_v36  ;;  %v3425_v55 = vsub.f32 0.0, %v7783_v50  ;;  %v7802_v38 = vpop.f32.mrb[185].mxu0  ;;  %v7807_v56 = vadd.f32 %v7695_v7, %v7509_v23 }
 0x820   : > { %v7792_v44 = vpop.eup %6002  ;;  %6024 = vpow.bf16 %v3558_v61  ;;  %v7798_v35 = vpack.c.bf16 %v3417_v49, %v3410_v48  ;;  %v5493_v63 = vpop.f32.mrb[185].mxu1  ;;  %v3564_v39 = vmul.bf16 1069105081, %v3502_v4  ;;  %v7811_v53 = vadd.f32 %v7697_v60, %v7517_v40 }
 0x821   : > { %v6005_v42 = vpop.eup %6004  ;;  %v7813_v19 = vpop.f32.mrb[186].mxu0  ;;  %v7819_v29 = vadd.f32 %v7701_v8, %v7520_v45  ;;  %v7823_v20 = vadd.f32 %v7718_v32, %v7509_v23  ;;  %v3430_v15 = vsub.f32 0.0, %v7807_v56 }
 0x822   : > { %v7815_v14 = vpop.f32.mrb[186].mxu1  ;;  %v6007_v13 = vpop.eup %6006  ;;  %v3749_v0 = vunpack.c.l.bf16 %v6005_v42  ;;  %v3756_v26 = vunpack.c.h.bf16 %v6005_v42  ;;  %6026 = vpow.bf16 %v3564_v39  ;;  %v3432_v4 = vsub.f32 0.0, %v7811_v53 }
 0x823   : > { %v7825_v7 = vpop.f32.mrb[187].mxu0  ;;  %v5494_v33 = vpop.f32.mrb[187].mxu1  ;;  %v3751_v28 = vunpack.c.l.bf16 %v6007_v13  ;;  %v3758_v6 = vunpack.c.h.bf16 %v6007_v13 }
 0x824   : > { %v6009_v60 = vpop.eup %6008  ;;  %v3840_v11 = vadd.f32 1.0, %v3749_v0  ;;  %v3847_v62 = vadd.f32 1.0, %v3756_v26 }
 0x825   : > { %v6011_v54 = vpop.eup %6010  ;;  %v3762_v5 = vunpack.c.l.bf16 %v6009_v60  ;;  %v3769_v51 = vunpack.c.h.bf16 %v6009_v60  ;;  %v3842_v10 = vadd.f32 1.0, %v3751_v28  ;;  %v3849_v30 = vadd.f32 1.0, %v3758_v6  ;;  %v7830_v63 = vpop.f32.mrb[188].mxu0 }
 0x826   : > { %v6013_v8 = vpop.eup %6012  ;;  %v3764_v27 = vunpack.c.l.bf16 %v6011_v54  ;;  %v3771_v32 = vunpack.c.h.bf16 %v6011_v54  ;;  %6028 = vrcp.f32 %v3840_v11  ;;  %v7832_v42 = vpop.f32.mrb[188].mxu1 }
 0x827   : > { %v6015_v59 = vpop.eup %6014  ;;  %v3853_v34 = vadd.f32 1.0, %v3762_v5  ;;  %v3763_v31 = vunpack.c.l.bf16 %v6013_v8  ;;  %6030 = vrcp.f32 %v3847_v62  ;;  %v3860_v61 = vadd.f32 1.0, %v3769_v51  ;;  %v7834_v33 = vpop.f32.mrb[189].mxu0 }
 0x828   : > { %v6017_v46 = vpop.eup %6016  ;;  %v3770_v49 = vunpack.c.h.bf16 %v6013_v8  ;;  %6032 = vrcp.f32 %v3842_v10  ;;  %v3855_v13 = vadd.f32 1.0, %v3764_v27  ;;  %v3765_v0 = vunpack.c.l.bf16 %v6015_v59  ;;  %v5497_v60 = vpop.f32.mrb[189].mxu1 }
 0x829   : > { %v6019_v39 = vpop.eup %6018  ;;  %v3772_v26 = vunpack.c.h.bf16 %v6015_v59  ;;  %6034 = vrcp.f32 %v3849_v30  ;;  %v3862_v56 = vadd.f32 1.0, %v3771_v32  ;;  %v3776_v6 = vunpack.c.l.bf16 %v6017_v46  ;;  %v7836_v11 = vpop.f32.mrb[190].mxu0 }
 0x82a   : > { %v6021_v28 = vpop.eup %6020  ;;  %v3778_v54 = vunpack.c.l.bf16 %v6019_v39  ;;  %v7838_v53 = vpop.f32.mrb[190].mxu1  ;;  %6036 = vrcp.f32 %v3853_v34  ;;  %v3854_v5 = vadd.f32 1.0, %v3763_v31  ;;  %v3861_v51 = vadd.f32 1.0, %v3770_v49 }
 0x82b   : > { %v6023_v62 = vpop.eup %6022  ;;  %v3777_v8 = vunpack.c.l.bf16 %v6021_v28  ;;  %v7840_v10 = vpop.f32.mrb[191].mxu0  ;;  %6038 = vrcp.f32 %v3860_v61  ;;  %v3856_v60 = vadd.f32 1.0, %v3765_v0  ;;  %v3863_v48 = vadd.f32 1.0, %v3772_v26 }
 0x82c   : > { %v5498_v27 = vpop.f32.mrb[191].mxu1  ;;  %v6025_v59 = vpop.eup %6024  ;;  %v3779_v30 = vunpack.c.l.bf16 %v6023_v62  ;;  %6040 = vrcp.f32 %v3855_v13  ;;  %v3867_v32 = vadd.f32 1.0, %v3776_v6  ;;  %v3869_v18 = vadd.f32 1.0, %v3778_v54 }
 0x82d   : > { %v3696_v46 = vunpack.c.l.bf16 %v6025_v59  ;;  %v3703_v39 = vunpack.c.h.bf16 %v6025_v59  ;;  %6042 = vrcp.f32 %v3862_v56  ;;  %v7844_v34 = vpack.c.bf16 %v3430_v15, %v3423_v41  ;;  %v6027_v49 = vpop.eup %6026  ;;  %v7853_v6 = vpop.f32.mrb[192].mxu0 }
 0x82e   : > { %v7848_v31 = vpack.c.bf16 %v3432_v4, %v3425_v55  ;;  %6044 = vrcp.f32 %v3854_v5  ;;  %v3868_v61 = vadd.f32 1.0, %v3777_v8  ;;  %v3870_v0 = vadd.f32 1.0, %v3779_v30  ;;  %v7855_v36 = vpop.f32.mrb[192].mxu1  ;;  %v7862_v54 = vpop.f32.mrb[193].mxu0 }
 0x82f   : > { %v3431_v26 = vsub.f32 0.0, %v7819_v29  ;;  %6046 = vrcp.f32 %v3861_v51  ;;  %v3787_v13 = vadd.f32 1.0, %v3696_v46  ;;  %v7851_v28 = vadd.f32 1.0, %v3703_v39  ;;  %v5501_v29 = vpop.f32.mrb[193].mxu1  ;;  %v3314_v27 = vpop.f32.mrb[194].mxu0 }
 0x830   : > { %v3698_v56 = vunpack.c.l.bf16 %v6027_v49  ;;  %v6029_v41 = vpop.eup %6028  ;;  %6048 = vrcp.f32 %v3856_v60  ;;  %v3705_v50 = vunpack.c.h.bf16 %v6027_v49  ;;  %v3579_v55 = vmul.bf16 1069105081, %v7844_v34  ;;  %v3402_v59 = vpop.f32.mrb[194].mxu1 }
 0x831   : > { %v8165_v15 = vsub.f32 0.0, %v7790_v25  ;;  %v6031_v62 = vpop.eup %6030  ;;  %v4822_v5 = vpack.c.bf16 %v6029_v41, %v7769_v3  ;;  %6050 = vrcp.f32 %v3863_v48  ;;  %v3585_v51 = vmul.bf16 1069105081, %v7848_v31  ;;  %v3315_v39 = vpop.f32.mrb[195].mxu0 }
 0x832   : > { %v3437_v8 = vsub.f32 0.0, %v7823_v20  ;;  %v6033_v60 = vpop.eup %6032  ;;  %v4826_v25 = vpack.c.bf16 %v6031_v62, %v7774_v47  ;;  %6052 = vrcp.f32 %v3867_v32  ;;  %v3789_v30 = vadd.f32 1.0, %v3698_v56  ;;  %v5502_v49 = vpop.f32.mrb[195].mxu1 }
 0x833   : > { %v7860_v4 = vpack.c.bf16 %v3431_v26, %v8165_v15  ;;  %v3368_v46 = vadd.f32 %v7720_v1, %v7517_v40  ;;  %v6035_v3 = vpop.eup %6034  ;;  %4350 = vst [vmem:[%s7608_s19 + $0xe0] sm:$0xff] %v4822_v5  ;;  %v4823_v48 = vpack.c.bf16 %v6033_v60, %v7785_v21  ;;  %6054 = vrcp.f32 %v3869_v18 }
 0x834   : > { %v3273_v20 = vadd.f32 %v7725_v2, %v7520_v45  ;;  %v3275_v47 = vadd.f32 %v7727_v9, %v7509_v23  ;;  %v6037_v32 = vpop.eup %6036  ;;  %4354 = vst [vmem:[%s7608_s19 + $0xfc] sm:$0xff] %v4826_v25  ;;  %v4827_v26 = vpack.c.bf16 %v6035_v3, %v7792_v44  ;;  %6056 = vrcp.f32 %v3868_v61 }
 0x835   : > { %v3796_v1 = vadd.f32 1.0, %v3705_v50  ;;  %v3371_v56 = vadd.f32 %v7729_v22, %v7517_v40  ;;  %v6039_v41 = vpop.eup %6038  ;;  %4351 = vst [vmem:[%s7608_s19 + $0xe8] sm:$0xff] %v4823_v48  ;;  %6058 = vrcp.f32 %v3870_v0  ;;  %v3582_v21 = vmul.bf16 1069105081, %v7860_v4 }
 0x836   : > { %v3444_v18 = vsub.f32 0.0, %v3275_v47  ;;  %v3277_v2 = vadd.f32 %v7732_v24, %v7520_v45  ;;  %v6041_v15 = vpop.eup %6040  ;;  %4355 = vst [vmem:[%s7608_s19 + $0x104] sm:$0xff] %v4827_v26  ;;  %v3439_v9 = vsub.f32 0.0, %v3368_v46  ;;  %v3281_v44 = vadd.f32 %v7754_v12, %v7509_v23 }
 0x837   : > { %v3446_v29 = vsub.f32 0.0, %v3371_v56  ;;  %v3376_v61 = vadd.f32 %v7756_v16, %v7517_v40  ;;  %v6043_v22 = vpop.eup %6042  ;;  %6060 = vrcp.f32 %v3787_v13  ;;  %v3438_v50 = vsub.f32 0.0, %v3273_v20 }
 0x838   : > { %v3514_v0 = vpack.c.bf16 %v3444_v18, %v3437_v8  ;;  %v3445_v62 = vsub.f32 0.0, %v3277_v2  ;;  %v6045_v4 = vpop.eup %6044  ;;  %6062 = vrcp.f32 %v3789_v30  ;;  %v3451_v24 = vsub.f32 0.0, %v3281_v44 }
 0x839   : > { %v3516_v5 = vpack.c.bf16 %v3446_v29, %v3439_v9  ;;  %v3283_v27 = vadd.f32 %v7758_v37, %v7520_v45  ;;  %v6047_v59 = vpop.eup %6046  ;;  %v4830_v60 = vpack.c.bf16 %v6045_v4, %v6037_v32  ;;  %6064 = vrcp.f32 %v3796_v1 }
 0x83a   : > { %v3515_v12 = vpack.c.bf16 %v3445_v62, %v3438_v50  ;;  %v3453_v25 = vsub.f32 0.0, %v3376_v61  ;;  %v6049_v16 = vpop.eup %6048  ;;  %v4834_v46 = vpack.c.bf16 %v6047_v59, %v6039_v41  ;;  %v8166_v13 = vmul.bf16 1069105081, %v7798_v35 }
 0x83b   : > { %v3600_v8 = vmul.bf16 1069105081, %v3514_v0  ;;  %v3606_v30 = vmul.bf16 1069105081, %v3516_v5  ;;  %v6051_v39 = vpop.eup %6050  ;;  %4358 = vst [vmem:[%s7608_s19 + $0x118] sm:$0xff] %v4830_v60  ;;  %v4831_v49 = vpack.c.bf16 %v6049_v16, %v6041_v15  ;;  %v3285_v3 = vadd.f32 %v7760_v52, %v7509_v23 }
 0x83c   : > { %6066 = vpow.bf16 %v8166_v13  ;;  %v3603_v37 = vmul.bf16 1069105081, %v3515_v12  ;;  %v6053_v48 = vpop.eup %6052  ;;  %4362 = vst [vmem:[%s7608_s19 + $0x134] sm:$0xff] %v4834_v46  ;;  %v4835_v20 = vpack.c.bf16 %v6051_v39, %v6043_v22  ;;  %v3379_v35 = vadd.f32 %v7762_v57, %v7517_v40 }
 0x83d   : > { %6068 = vpow.bf16 %v3579_v55  ;;  %v3287_v47 = vadd.f32 %v7764_v43, %v7520_v45  ;;  %v6055_v32 = vpop.eup %6054  ;;  %4359 = vst [vmem:[%s7608_s19 + $0x120] sm:$0xff] %v4831_v49  ;;  %v3458_v34 = vsub.f32 0.0, %v3285_v3  ;;  %v3291_v55 = vadd.f32 %v7794_v17, %v7509_v23 }
 0x83e   : > { %6070 = vpow.bf16 %v3585_v51  ;;  %v3384_v52 = vadd.f32 %v7796_v58, %v7517_v40  ;;  %v6057_v26 = vpop.eup %6056  ;;  %4363 = vst [vmem:[%s7608_s19 + $0x13c] sm:$0xff] %v4835_v20  ;;  %v3452_v31 = vsub.f32 0.0, %v3283_v27  ;;  %v3460_v51 = vsub.f32 0.0, %v3379_v35 }
 0x83f   : > { %6072 = vpow.bf16 %v3582_v21  ;;  %v3459_v57 = vsub.f32 0.0, %v3287_v47  ;;  %v6059_v1 = vpop.eup %6058  ;;  %v4838_v43 = vpack.c.bf16 %v6057_v26, %v6053_v48  ;;  %v3521_v56 = vpack.c.bf16 %v3458_v34, %v3451_v24 }
 0x840   : > { %6074 = vpow.bf16 %v3600_v8  ;;  %v3293_v41 = vadd.f32 %v7802_v38, %v7520_v45  ;;  %v4839_v21 = vpack.c.bf16 %v6059_v1, %v6055_v32  ;;  %v3523_v17 = vpack.c.bf16 %v3460_v51, %v3453_v25 }
 0x841   : > { %6076 = vpow.bf16 %v3606_v30  ;;  %v3522_v18 = vpack.c.bf16 %v3459_v57, %v3452_v31  ;;  %v7913_v58 = vpop.eup %6060  ;;  %4366 = vst [vmem:[%s7608_s19 + $0x150] sm:$0xff] %v4838_v43  ;;  %v3621_v2 = vmul.bf16 1069105081, %v3521_v56  ;;  %v3465_v15 = vsub.f32 0.0, %v3291_v55 }
 0x842   : > { %6078 = vpow.bf16 %v3603_v37  ;;  %v3467_v9 = vsub.f32 0.0, %v3384_v52  ;;  %v3295_v29 = vadd.f32 %v7813_v19, %v7509_v23  ;;  %v6063_v44 = vpop.eup %6062  ;;  %4367 = vst [vmem:[%s7608_s19 + $0x158] sm:$0xff] %v4839_v21  ;;  %v3627_v61 = vmul.bf16 1069105081, %v3523_v17 }
 0x843   : > { %v3624_v22 = vmul.bf16 1069105081, %v3522_v18  ;;  %v3387_v38 = vadd.f32 %v7815_v14, %v7517_v40  ;;  %v3297_v50 = vadd.f32 %v7825_v7, %v7520_v45  ;;  %v6065_v0 = vpop.eup %6064  ;;  %v4793_v62 = vpack.c.bf16 %v6063_v44, %v6063_v44 }
 0x844   : > { %6080 = vpow.bf16 %v3621_v2  ;;  %v3466_v4 = vsub.f32 0.0, %v3293_v41  ;;  %v3472_v5 = vsub.f32 0.0, %v3295_v29  ;;  %v4797_v24 = vpack.c.bf16 %v6065_v0, %v6065_v0 }
 0x845   : > { %6082 = vpow.bf16 %v3627_v61  ;;  %v3474_v19 = vsub.f32 0.0, %v3387_v38  ;;  %v3473_v27 = vsub.f32 0.0, %v3297_v50  ;;  %4321 = vst.msk [vmem:[%s7608_s19 + $0x18] sm:$0xf] %vm4320_vm2, %v4793_v62  ;;  %v7929_v14 = vadd.f32 %v7830_v63, %v7509_v23 }
 0x846   : > { %6084 = vpow.bf16 %v3624_v22  ;;  %v7925_v60 = vpack.c.bf16 %v3472_v5, %v3465_v15  ;;  %4325 = vst.msk [vmem:[%s7608_s19 + $0x34] sm:$0xf] %vm4320_vm2, %v4797_v24  ;;  %v7940_v39 = vadd.f32 %v7832_v42, %v7517_v40 }
 0x847   : > { %v6067_v59 = vpop.eup %6066  ;;  %v7933_v16 = vpack.c.bf16 %v3474_v19, %v3467_v9  ;;  %v7935_v46 = vpack.c.bf16 %v3473_v27, %v3466_v4  ;;  %6086 = vrcp.f32 %v7851_v28  ;;  %v3479_v26 = vsub.f32 0.0, %v7929_v14 }
 0x848   : > { %v6069_v7 = vpop.eup %6068  ;;  %v3697_v12 = vunpack.c.l.bf16 %v6067_v59  ;;  %v3704_v25 = vunpack.c.h.bf16 %v6067_v59  ;;  %v3481_v57 = vsub.f32 0.0, %v7940_v39  ;;  %v3642_v14 = vmul.bf16 1069105081, %v7925_v60 }
 0x849   : > { %v6071_v13 = vpop.eup %6070  ;;  %v3710_v8 = vunpack.c.l.bf16 %v6069_v7  ;;  %v3717_v30 = vunpack.c.h.bf16 %v6069_v7 }
 0x84a   : > { %v6073_v63 = vpop.eup %6072  ;;  %v3788_v49 = vadd.f32 1.0, %v3697_v12  ;;  %v3795_v37 = vadd.f32 1.0, %v3704_v25  ;;  %v3712_v3 = vunpack.c.l.bf16 %v6071_v13  ;;  %v3719_v48 = vunpack.c.h.bf16 %v6071_v13 }
 0x84b   : > { %v6075_v20 = vpop.eup %6074  ;;  %v3801_v35 = vadd.f32 1.0, %v3710_v8  ;;  %v3808_v47 = vadd.f32 1.0, %v3717_v30  ;;  %v3711_v32 = vunpack.c.l.bf16 %v6073_v63  ;;  %v3718_v34 = vunpack.c.h.bf16 %v6073_v63 }
 0x84c   : > { %v6077_v55 = vpop.eup %6076  ;;  %6088 = vrcp.f32 %v3788_v49  ;;  %v3803_v52 = vadd.f32 1.0, %v3712_v3  ;;  %v3724_v28 = vunpack.c.l.bf16 %v6075_v20  ;;  %v3810_v42 = vadd.f32 1.0, %v3719_v48 }
 0x84d   : > { %v6079_v31 = vpop.eup %6078  ;;  %6090 = vrcp.f32 %v3795_v37  ;;  %v3731_v51 = vunpack.c.h.bf16 %v6075_v20  ;;  %v3802_v1 = vadd.f32 1.0, %v3711_v32  ;;  %v3726_v43 = vunpack.c.l.bf16 %v6077_v55 }
 0x84e   : > { %6092 = vrcp.f32 %v3801_v35  ;;  %v3733_v56 = vunpack.c.h.bf16 %v6077_v55  ;;  %v3809_v41 = vadd.f32 1.0, %v3718_v34  ;;  %v3725_v21 = vunpack.c.l.bf16 %v6079_v31 }
 0x84f   : > { %6094 = vrcp.f32 %v3808_v47  ;;  %v3732_v17 = vunpack.c.h.bf16 %v6079_v31  ;;  %v6081_v18 = vpop.eup %6080  ;;  %v3815_v2 = vadd.f32 1.0, %v3724_v28  ;;  %v3822_v15 = vadd.f32 1.0, %v3731_v51 }
 0x850   : > { %6096 = vrcp.f32 %v3803_v52  ;;  %v3817_v9 = vadd.f32 1.0, %v3726_v43  ;;  %v6083_v29 = vpop.eup %6082  ;;  %v3824_v44 = vadd.f32 1.0, %v3733_v56  ;;  %v3816_v61 = vadd.f32 1.0, %v3725_v21 }
 0x851   : > { %6098 = vrcp.f32 %v3810_v42  ;;  %v3738_v22 = vunpack.c.l.bf16 %v6081_v18  ;;  %v6085_v38 = vpop.eup %6084  ;;  %v3745_v50 = vunpack.c.h.bf16 %v6081_v18  ;;  %v3740_v0 = vunpack.c.l.bf16 %v6083_v29 }
 0x852   : > { %6100 = vrcp.f32 %v3802_v1  ;;  %v3747_v62 = vunpack.c.h.bf16 %v6083_v29  ;;  %v6087_v4 = vpop.eup %6086  ;;  %v3823_v5 = vadd.f32 1.0, %v3732_v17  ;;  %v3739_v24 = vunpack.c.l.bf16 %v6085_v38 }
 0x853   : > { %6102 = vrcp.f32 %v3809_v41  ;;  %v3746_v19 = vunpack.c.h.bf16 %v6085_v38  ;;  %v3829_v27 = vadd.f32 1.0, %v3738_v22  ;;  %v3836_v59 = vadd.f32 1.0, %v3745_v50 }
 0x854   : > { %6104 = vrcp.f32 %v3815_v2  ;;  %v3831_v7 = vadd.f32 1.0, %v3740_v0  ;;  %v3838_v12 = vadd.f32 1.0, %v3747_v62  ;;  %v3830_v25 = vadd.f32 1.0, %v3739_v24 }
 0x855   : > { %6106 = vrcp.f32 %v3822_v15  ;;  %v3837_v13 = vadd.f32 1.0, %v3746_v19  ;;  %v3303_v30 = vadd.f32 %v7834_v33, %v7520_v45  ;;  %v3305_v63 = vadd.f32 %v7836_v11, %v7509_v23 }
 0x856   : > { %v6089_v8 = vpop.eup %6088  ;;  %6108 = vrcp.f32 %v3817_v9  ;;  %v3395_v49 = vadd.f32 %v7838_v53, %v7517_v40  ;;  %v3307_v48 = vadd.f32 %v7840_v10, %v7520_v45  ;;  %v3311_v20 = vadd.f32 %v7853_v6, %v7509_v23 }
 0x857   : > { %v6091_v37 = vpop.eup %6090  ;;  %v4792_v3 = vpack.c.bf16 %v6089_v8, %v7913_v58  ;;  %6110 = vrcp.f32 %v3824_v44  ;;  %v3480_v33 = vsub.f32 0.0, %v3303_v30  ;;  %v3486_v32 = vsub.f32 0.0, %v3305_v63 }
 0x858   : > { %v6093_v35 = vpop.eup %6092  ;;  %v4796_v47 = vpack.c.bf16 %v6091_v37, %v6087_v4  ;;  %6112 = vrcp.f32 %v3816_v61  ;;  %v3488_v53 = vsub.f32 0.0, %v3395_v49  ;;  %v3487_v34 = vsub.f32 0.0, %v3307_v48 }
 0x859   : > { %v6095_v11 = vpop.eup %6094  ;;  %4319 = vst [vmem:[%s7608_s19 + $0x10] sm:$0xff] %v4792_v3  ;;  %6114 = vrcp.f32 %v3823_v5  ;;  %v3493_v55 = vsub.f32 0.0, %v3311_v20  ;;  %v3535_v10 = vpack.c.bf16 %v3486_v32, %v3479_v26  ;;  %v3400_v23 = vadd.f32 %v7855_v36, %v7517_v40 }
 0x85a   : > { %v6097_v58 = vpop.eup %6096  ;;  %4324 = vst [vmem:[%s7608_s19 + $0x2c] sm:$0xff] %v4796_v47  ;;  %6116 = vrcp.f32 %v3829_v27  ;;  %v3313_v6 = vadd.f32 %v7862_v54, %v7520_v45  ;;  %v3537_v31 = vpack.c.bf16 %v3488_v53, %v3481_v57  ;;  %v3536_v42 = vpack.c.bf16 %v3487_v34, %v3480_v33 }
 0x85b   : > { %v6099_v52 = vpop.eup %6098  ;;  %v4801_v28 = vpack.c.bf16 %v6097_v58, %v6097_v58  ;;  %6118 = vrcp.f32 %v3836_v59  ;;  %v3648_v45 = vmul.bf16 1069105081, %v7933_v16  ;;  %v3645_v36 = vmul.bf16 1069105081, %v7935_v46 }
 0x85c   : > { %v6101_v51 = vpop.eup %6100  ;;  %v4805_v1 = vpack.c.bf16 %v6099_v52, %v6099_v52  ;;  %6120 = vrcp.f32 %v3831_v7  ;;  %v3542_v57 = vpack.c.bf16 %v3493_v55, %v3493_v55  ;;  %v3495_v43 = vsub.f32 0.0, %v3400_v23 }
 0x85d   : > { %v6103_v26 = vpop.eup %6102  ;;  %4329 = vst.msk [vmem:[%s7608_s19 + $0x50] sm:$0xf] %vm4320_vm2, %v4801_v28  ;;  %v4800_v40 = vpack.c.bf16 %v6101_v51, %v6093_v35  ;;  %6122 = vrcp.f32 %v3838_v12  ;;  %v3663_v60 = vmul.bf16 1069105081, %v3535_v10  ;;  %v3494_v41 = vsub.f32 0.0, %v3313_v6 }
 0x85e   : > { %v6105_v54 = vpop.eup %6104  ;;  %4333 = vst.msk [vmem:[%s7608_s19 + $0x6c] sm:$0xf] %vm4320_vm2, %v4805_v1  ;;  %v4804_v39 = vpack.c.bf16 %v6103_v26, %v6095_v11  ;;  %6124 = vrcp.f32 %v3830_v25  ;;  %v3669_v17 = vmul.bf16 1069105081, %v3537_v31  ;;  %v3544_v16 = vpack.c.bf16 %v3495_v43, %v3495_v43 }
 0x85f   : > { %v6107_v56 = vpop.eup %6106  ;;  %4328 = vst [vmem:[%s7608_s19 + $0x48] sm:$0xff] %v4800_v40  ;;  %6126 = vrcp.f32 %v3837_v13  ;;  %v3666_v2 = vmul.bf16 1069105081, %v3536_v42  ;;  %v3543_v15 = vpack.c.bf16 %v3494_v41, %v3494_v41  ;;  %v3684_v44 = vmul.bf16 1069105081, %v3542_v57 }
 0x860   : > { %v6109_v21 = vpop.eup %6108  ;;  %4332 = vst [vmem:[%s7608_s19 + $0x64] sm:$0xff] %v4804_v39  ;;  %6128 = vpow.bf16 %v3642_v14  ;;  %v3690_v38 = vmul.bf16 1069105081, %v3544_v16 }
 0x861   : > { %v6111_v46 = vpop.eup %6110  ;;  %v4809_v18 = vpack.c.bf16 %v6109_v21, %v6109_v21  ;;  %6130 = vpow.bf16 %v3648_v45  ;;  %v3687_v62 = vmul.bf16 1069105081, %v3543_v15 }
 0x862   : > { %v6113_v9 = vpop.eup %6112  ;;  %v4813_v29 = vpack.c.bf16 %v6111_v46, %v6111_v46  ;;  %6132 = vpow.bf16 %v3645_v36 }
 0x863   : > { %v6115_v61 = vpop.eup %6114  ;;  %4337 = vst.msk [vmem:[%s7608_s19 + $0x88] sm:$0xf] %vm4320_vm2, %v4809_v18  ;;  %v4808_v22 = vpack.c.bf16 %v6113_v9, %v6105_v54  ;;  %6134 = vpow.bf16 %v3663_v60 }
 0x864   : > { %v6117_v50 = vpop.eup %6116  ;;  %4341 = vst.msk [vmem:[%s7608_s19 + $0xa4] sm:$0xf] %vm4320_vm2, %v4813_v29  ;;  %v4812_v0 = vpack.c.bf16 %v6115_v61, %v6107_v56  ;;  %6136 = vpow.bf16 %v3669_v17 }
 0x865   : > { %v6119_v4 = vpop.eup %6118  ;;  %4336 = vst [vmem:[%s7608_s19 + $0x80] sm:$0xff] %v4808_v22  ;;  %6138 = vpow.bf16 %v3666_v2 }
 0x866   : > { %v6121_v5 = vpop.eup %6120  ;;  %4340 = vst [vmem:[%s7608_s19 + $0x9c] sm:$0xff] %v4812_v0  ;;  %6140 = vpow.bf16 %v3684_v44 }
 0x867   : > { %v6123_v24 = vpop.eup %6122  ;;  %v4817_v19 = vpack.c.bf16 %v6121_v5, %v6121_v5  ;;  %6142 = vpow.bf16 %v3690_v38 }
 0x868   : > { %v6125_v27 = vpop.eup %6124  ;;  %v4821_v59 = vpack.c.bf16 %v6123_v24, %v6123_v24  ;;  %6144 = vpow.bf16 %v3687_v62 }
 0x869   : > { %v6127_v7 = vpop.eup %6126  ;;  %4345 = vst.msk [vmem:[%s7608_s19 + $0xc0] sm:$0xf] %vm4320_vm2, %v4817_v19  ;;  %v4816_v12 = vpack.c.bf16 %v6125_v27, %v6117_v50 }
 0x86a   : > { %4349 = vst.msk [vmem:[%s7608_s19 + $0xdc] sm:$0xf] %vm4320_vm2, %v4821_v59  ;;  %v4820_v25 = vpack.c.bf16 %v6127_v7, %v6119_v4 }
 0x86b   : > { %v6129_v13 = vpop.eup %6128  ;;  %4344 = vst [vmem:[%s7608_s19 + $0xb8] sm:$0xff] %v4816_v12 }
 0x86c   : > { %v6131_v8 = vpop.eup %6130  ;;  %4348 = vst [vmem:[%s7608_s19 + $0xd4] sm:$0xff] %v4820_v25  ;;  %v3752_v30 = vunpack.c.l.bf16 %v6129_v13  ;;  %v3759_v63 = vunpack.c.h.bf16 %v6129_v13 }
 0x86d   : > { %v6133_v49 = vpop.eup %6132  ;;  %v3754_v37 = vunpack.c.l.bf16 %v6131_v8  ;;  %v3761_v3 = vunpack.c.h.bf16 %v6131_v8 }
 0x86e   : > { %v6135_v48 = vpop.eup %6134  ;;  %v3843_v20 = vadd.f32 1.0, %v3752_v30  ;;  %v3850_v35 = vadd.f32 1.0, %v3759_v63  ;;  %v3753_v47 = vunpack.c.l.bf16 %v6133_v49  ;;  %v3760_v33 = vunpack.c.h.bf16 %v6133_v49 }
 0x86f   : > { %v6137_v32 = vpop.eup %6136  ;;  %v3845_v11 = vadd.f32 1.0, %v3754_v37  ;;  %v3852_v53 = vadd.f32 1.0, %v3761_v3  ;;  %v3766_v34 = vunpack.c.l.bf16 %v6135_v48  ;;  %v3773_v55 = vunpack.c.h.bf16 %v6135_v48 }
 0x870   : > { %v6139_v58 = vpop.eup %6138  ;;  %6146 = vrcp.f32 %v3843_v20  ;;  %v3844_v10 = vadd.f32 1.0, %v3753_v47  ;;  %v3768_v23 = vunpack.c.l.bf16 %v6137_v32  ;;  %v3851_v52 = vadd.f32 1.0, %v3760_v33 }
 0x871   : > { %v6141_v6 = vpop.eup %6140  ;;  %6148 = vrcp.f32 %v3850_v35  ;;  %v3775_v28 = vunpack.c.h.bf16 %v6137_v32  ;;  %v3857_v42 = vadd.f32 1.0, %v3766_v34  ;;  %v3767_v51 = vunpack.c.l.bf16 %v6139_v58 }
 0x872   : > { %v6143_v31 = vpop.eup %6142  ;;  %6150 = vrcp.f32 %v3845_v11  ;;  %v3864_v14 = vadd.f32 1.0, %v3773_v55  ;;  %v3774_v26 = vunpack.c.h.bf16 %v6139_v58  ;;  %v3859_v40 = vadd.f32 1.0, %v3768_v23 }
 0x873   : > { %v6145_v1 = vpop.eup %6144  ;;  %6152 = vrcp.f32 %v3852_v53  ;;  %v3780_v45 = vunpack.c.l.bf16 %v6141_v6  ;;  %v3866_v36 = vadd.f32 1.0, %v3775_v28  ;;  %v3782_v54 = vunpack.c.l.bf16 %v6143_v31 }
 0x874   : > { %6154 = vrcp.f32 %v3844_v10  ;;  %v3858_v39 = vadd.f32 1.0, %v3767_v51  ;;  %v3781_v57 = vunpack.c.l.bf16 %v6145_v1  ;;  %v3865_v43 = vadd.f32 1.0, %v3774_v26 }
 0x875   : > { %6156 = vrcp.f32 %v3851_v52  ;;  %v3871_v56 = vadd.f32 1.0, %v3780_v45  ;;  %v3873_v60 = vadd.f32 1.0, %v3782_v54 }
 0x876   : > { %6158 = vrcp.f32 %v3857_v42  ;;  %v3872_v21 = vadd.f32 1.0, %v3781_v57 }
 0x877   : > { %6160 = vrcp.f32 %v3864_v14 }
 0x878   : > { %6162 = vrcp.f32 %v3859_v40 }
 0x879   : > { %6164 = vrcp.f32 %v3866_v36 }
 0x87a   : > { %v6147_v41 = vpop.eup %6146  ;;  %6166 = vrcp.f32 %v3858_v39 }
 0x87b   : > { %v6149_v17 = vpop.eup %6148  ;;  %6168 = vrcp.f32 %v3865_v43 }
 0x87c   : > { %v6151_v16 = vpop.eup %6150  ;;  %6170 = vrcp.f32 %v3871_v56 }
 0x87d   : > { %v6153_v46 = vpop.eup %6152  ;;  %v4825_v18 = vpack.c.bf16 %v6151_v16, %v6151_v16  ;;  %6172 = vrcp.f32 %v3873_v60 }
 0x87e   : > { %v6155_v2 = vpop.eup %6154  ;;  %v4829_v15 = vpack.c.bf16 %v6153_v46, %v6153_v46  ;;  %6174 = vrcp.f32 %v3872_v21 }
 0x87f   : > { %v6157_v9 = vpop.eup %6156  ;;  %4353 = vst.msk [vmem:[%s7608_s19 + $0xf8] sm:$0xf] %vm4320_vm2, %v4825_v18  ;;  %v4824_v29 = vpack.c.bf16 %v6155_v2, %v6147_v41 }
 0x880   : > { %v6159_v44 = vpop.eup %6158  ;;  %4357 = vst.msk [vmem:[%s7608_s19 + $0x114] sm:$0xf] %vm4320_vm2, %v4829_v15  ;;  %v4828_v61 = vpack.c.bf16 %v6157_v9, %v6149_v17 }
 0x881   : > { %v6161_v22 = vpop.eup %6160  ;;  %4352 = vst [vmem:[%s7608_s19 + $0xf0] sm:$0xff] %v4824_v29 }
 0x882   : > { %v6163_v38 = vpop.eup %6162  ;;  %4356 = vst [vmem:[%s7608_s19 + $0x10c] sm:$0xff] %v4828_v61 }
 0x883   : > { %v6165_v50 = vpop.eup %6164  ;;  %v4833_v0 = vpack.c.bf16 %v6163_v38, %v6163_v38 }
 0x884   : > { %v6167_v62 = vpop.eup %6166  ;;  %v4837_v4 = vpack.c.bf16 %v6165_v50, %v6165_v50 }
 0x885   : > { %v6169_v5 = vpop.eup %6168  ;;  %4361 = vst.msk [vmem:[%s7608_s19 + $0x130] sm:$0xf] %vm4320_vm2, %v4833_v0  ;;  %v4832_v24 = vpack.c.bf16 %v6167_v62, %v6159_v44  ;;  %4382 = sbr.rel (!%p6455_p9) target bundleno = 2218 (0x8aa), region = 96 }
 0x886   : > { %v6171_v19 = vpop.eup %6170  ;;  %4365 = vst.msk [vmem:[%s7608_s19 + $0x14c] sm:$0xf] %vm4320_vm2, %v4837_v4  ;;  %v4836_v27 = vpack.c.bf16 %v6169_v5, %v6161_v22 }
 0x887   : > { %v6173_v59 = vpop.eup %6172  ;;  %4360 = vst [vmem:[%s7608_s19 + $0x128] sm:$0xff] %v4832_v24 }
 0x888   : > { %v6175_v7 = vpop.eup %6174  ;;  %4364 = vst [vmem:[%s7608_s19 + $0x144] sm:$0xff] %v4836_v27  ;;  %v4841_v12 = vpack.c.bf16 %v6173_v59, %v6173_v59 }
 0x889   : > { %v4840_v25 = vpack.c.bf16 %v6175_v7, %v6171_v19 }
 0x88a   : > { %4369 = vst.msk [vmem:[%s7608_s19 + $0x168] sm:$0xf] %vm4320_vm2, %v4841_v12 }
 0x88b   : > { %4368 = vst [vmem:[%s7608_s19 + $0x160] sm:$0xff] %v4840_v25 }
 0x88c   : > { %s8189_s23 = smov (!%p4385_p6, %s4384_s23), 13 }
 0x88d   : > { %s8006_s25 = sshll.u32 %s8189_s23, 6 }
 0x88e   : > { %s4389_s22 = ssub.s32 832, %s8006_s25 }
 0x88f   : > { %4390 = vsyncadd %s8143_s27, %s4389_s22  ;;  %p4766_p10 = scmp.ne.s32.totalorder %s8006_s25, 0  ;;  %s4842_s2 = smul.u32 832, %s8168_s29 }
 0x890   : > { %s4395_s24 = sshll.u32 %s7082_s0, 4  ;;  %s8169_s1 = sld [smem:[#allocation22_spill]]  ;;  %s8019_s24 = int_to_ptr.vmem [resolvable:$true] %s4395_s24 }
 0x891   : > { %s6204_s23 = scalar_lea.vmem %s8019_s24, %s8006_s25  ;;  %s6310_s22 = smov [#allocation5]  }
 0x892   : > { %p6205_p11 = scmp.ne.s32.totalorder %s8019_s24, %s6204_s23  ;;  %s6208_s27 = sshll.u32 %s6310_s22, 4  ;;  %s6209_s27 = int_to_ptr.vmem [resolvable:$false] %s6208_s27 }
 0x893   : > { %s6210_s29 = scalar_lea.vmem %s6209_s27, 1664  ;;  %p6211_p0 = scmp.lt.s32.totalorder %s8019_s24, %s6209_s27 }
 0x894   : > { %p6206_p13 = pnand %p6205_p11, %p4766_p10  ;;  %p6212_p1 = scmp.lt.s32.totalorder %s6210_s29, %s6204_s23 }
 0x896   : > { %s8017_s26 = scalar_lea.hbm %s8169_s1, %s4842_s2  ;;  %p6207_p12 = pneg %p6206_p13 }
 0x897   : > { %p6213_p3 = por %p6212_p1, %p6211_p0 }
 0x899   : > { %p6214_p4 = pnand %p6213_p3, %p6207_p12 }
 0x89b   : > { %6217 = shalt.err (!%p6214_p4)
}
 0x89c   : > { %s6218_s0 = scalar_lea.hbm %s8017_s26, %s8006_s25  ;;  %s6222_s18 = scalar_lea.hbm %s8169_s1, 1600 }
 0x89d   : > { %p6219_p5 = scmp.ne.s32.totalorder %s8017_s26, %s6218_s0  ;;  %p6223_p8 = scmp.lt.u32.totalorder %s8017_s26, %s8169_s1 }
 0x89e   : > { %p6224_p6 = scmp.lt.u32.totalorder %s6222_s18, %s6218_s0  ;;  %p6226_p13 = scmp.lt.u32.totalorder %s6218_s0, %s8017_s26 }
 0x89f   : > { %p6220_p2 = pnand %p6219_p5, %p4766_p10 }
 0x8a0   : > { %p6225_p11 = por %p6224_p6, %p6223_p8 }
 0x8a1   : > { %p6221_p7 = pneg %p6220_p2 }
 0x8a2   : > { %p6227_p12 = por %p6226_p13, %p6225_p11 }
 0x8a4   : > { %p6228_p0 = pnand %p6227_p12, %p6221_p7 }
 0x8a6   : > { %6231 = shalt.err (!%p6228_p0)
}
 0x8a7   : > { %s6311_s22 = smov 64   ;;  %s6312_s29 = smov 4  }
 0x8a8   : > { %s8170_s21 = scalar_lea.sflag [#allocation4], %s6511_s20 }
 0x8a9   : > { %4401 = dma.vmem_to_hbm [thread:$0]  (%p4766_p10), %s8019_s24, %s8006_s25, %s8017_s26, %s8170_s21, %s6311_s22, %s6311_s22, %s6312_s29  }
 0x8aa PF: > { %4404 = sbr.rel (!%p6455_p9) target bundleno = 2260 (0x8d4), region = 100  ;;  %s8172_s18 = sld [smem:[#allocation13_spill]] (%p6455_p9) }
 0x8ab   : > { %s8173_s3 = scalar_lea.sflag (%p6455_p9), [#allocation7], %s6511_s20 }
 0x8b0   : > { %s4405_s0 = smul.u32 (%p6455_p9), 13, %s8172_s18 }
 0x8b2   : > { %s4406_s27 = ssub.s32 25, %s4405_s0 }
 0x8b3   : > { %p4407_p1 = scmp.lt.s32.totalorder %s4406_s27, 13 }
 0x8b5   : > { %s8191_s27 = smov (!%p4407_p1, %s4406_s27), 13 }
 0x8b6   : > { %s8050_s23 = smul.u32 448, %s8191_s27 }
 0x8b8   : > { %s4412_s1 = ssub.s32 5824, %s8050_s23 }
 0x8b9   : > { %4413 = vsyncadd %s8173_s3, %s4412_s1  ;;  %p4772_p10 = scmp.ne.s32.totalorder %s8050_s23, 0  ;;  %s5520_s25 = smul.u32 5824, %s8172_s18 }
 0x8ba   : > { %s4419_s24 = sshll.u32 %s7608_s19, 4  ;;  %s8174_s29 = sld [smem:[#allocation23_spill]]  ;;  %s8063_s24 = int_to_ptr.vmem [resolvable:$true] %s4419_s24 }
 0x8bb   : > { %s6232_s0 = scalar_lea.vmem %s8063_s24, %s8050_s23  ;;  %s6313_s3 = smov [#allocation6]  }
 0x8bc   : > { %p6233_p9 = scmp.ne.s32.totalorder %s8063_s24, %s6232_s0  ;;  %s6236_s1 = sshll.u32 %s6313_s3, 4  ;;  %s6237_s1 = int_to_ptr.vmem [resolvable:$false] %s6236_s1 }
 0x8bd   : > { %s6238_s18 = scalar_lea.vmem %s6237_s1, 11648  ;;  %p6239_p5 = scmp.lt.s32.totalorder %s8063_s24, %s6237_s1 }
 0x8be   : > { %p6234_p3 = pnand %p6233_p9, %p4772_p10  ;;  %p6240_p2 = scmp.lt.s32.totalorder %s6238_s18, %s6232_s0 }
 0x8c0   : > { %s8175_s21 = smov %s8174_s29  ;;  %s8061_s2 = scalar_lea.hbm %s8174_s29, %s5520_s25 }
 0x8c1   : > { %p6235_p4 = pneg %p6234_p3  ;;  %p6241_p7 = por %p6240_p2, %p6239_p5 }
 0x8c3   : > { %p6242_p8 = pnand %p6241_p7, %p6235_p4 }
 0x8c5   : > { %6245 = shalt.err (!%p6242_p8)
}
 0x8c6   : > { %s6246_s19 = scalar_lea.hbm %s8061_s2, %s8050_s23  ;;  %s6250_s26 = scalar_lea.hbm %s8175_s21, 11200 }
 0x8c7   : > { %p6247_p6 = scmp.ne.s32.totalorder %s8061_s2, %s6246_s19  ;;  %p6251_p12 = scmp.lt.u32.totalorder %s8061_s2, %s8175_s21 }
 0x8c8   : > { %p6252_p0 = scmp.lt.u32.totalorder %s6250_s26, %s6246_s19  ;;  %p6254_p9 = scmp.lt.u32.totalorder %s6246_s19, %s8061_s2 }
 0x8c9   : > { %p6248_p11 = pnand %p6247_p6, %p4772_p10 }
 0x8ca   : > { %p6253_p1 = por %p6252_p0, %p6251_p12 }
 0x8cb   : > { %p6249_p13 = pneg %p6248_p11 }
 0x8cc   : > { %p6255_p3 = por %p6254_p9, %p6253_p1 }
 0x8ce   : > { %p6256_p4 = pnand %p6255_p3, %p6249_p13 }
 0x8d0   : > { %6259 = shalt.err (!%p6256_p4)
}
 0x8d1   : > { %s6314_s0 = smov 448   ;;  %s6315_s3 = smov 28  }
 0x8d2   : > { %s8176_s1 = scalar_lea.sflag [#allocation7], %s6511_s20 }
 0x8d3   : > { %4425 = dma.vmem_to_hbm [thread:$0]  (%p4772_p10), %s8063_s24, %s8050_s23, %s8061_s2, %s8176_s1, %s6314_s0, %s6314_s0, %s6315_s3  }
 0x8d4 PF: > { %s8177_s18 = sld [smem:[#allocation11_spill]]  ;;  %s8178_s27 = sld [smem:[#allocation17_spill]] }
 0x8d5   : > { %p8180_p2 = scmp.ge.s32.totalorder %s6302_s30, 2 }
 0x8da   : > { %s4434_s25 = sand.u32 1, %s8177_s18   ;;  %p8179_p5 = scmp.ne.s32.totalorder %s8178_s27, 0 }
 0x8db   : > { %s4435_s19 = scalar_lea.sflag [#allocation4], %s4434_s25 }
 0x8dc   : > { %p5513_p7 = pnand %p8180_p2, %p8179_p5 }
 0x8de   : > { %6281 = dma.done.wait (!%p5513_p7), %s4435_s19, 832  }
 0x8df   : > { %6283 = vsyncadd (!%p5513_p7), %s4435_s19, 4294966464  ;;  %s4444_s26 = scalar_lea.sflag [#allocation7], %s4434_s25 }
 0x8e0   : > { %6285 = dma.done.wait (!%p5513_p7), %s4444_s26, 5824  }
 0x8e1   : > { %6287 = vsyncadd (!%p5513_p7), %s4444_s26, 4294961472  ;;  %s8181_s30 = sld [smem:[#allocation14_spill]]  ;;  %s8182_s22 = sld [smem:[#allocation12_spill]] }
 0x8e2   : > { %s8183_s29 = sld [smem:[#allocation15_spill]]  ;;  %s8184_s27 = smov %s6294_s28 }
 0x8e7   : > { %p35_p10 = scmp.ge.s32.totalorder %s8181_s30, 4   ;;  %s8185_s28 = smov %s8182_s22 }
 0x8e9   :  { %37 = sbr.rel (!%p35_p10) target bundleno = 14 (0xe), region = 150 }
 0x8f0   :  { %4449 = vsyncpa [#allocation3], 1 }
 0x8f1   :  { %4451 = vsyncpa [#allocation3 + $0x1], 1 }
 0x8f2   :  { %4452 = vsyncpa [#allocation4], 1 }
 0x8f3   :  { %4454 = vsyncpa [#allocation4 + $0x1], 1 }
 0x8f4   :  { %4455 = vsyncpa [#allocation7], 1 }
 0x8f5   :  { %4457 = vsyncpa [#allocation7 + $0x1], 1 }

</bundles_post_ra>
